<compile_context>
chip_gen: v7x
topology: tpu7x:2x2x1
jax: 0.10.0
libtpu: 0.0.40
codegen_flags: <defaults>
</compile_context>

<pallas_src>
import functools

import jax
import jax.numpy as jnp
from jax.experimental import pallas as pl
from jax.experimental.pallas import tpu as pltpu

KSIZE = 7
PAD = 3


def _tree_sum(terms):
    terms = list(terms)
    while len(terms) > 1:
        nxt = [terms[i] + terms[i + 1] for i in range(0, len(terms) - 1, 2)]
        if len(terms) % 2:
            nxt.append(terms[-1])
        terms = nxt
    return terms[0]


def _conv_bn_sigmoid(mx, avg, wv, bn_a, bn_b, masks, H, W):
    """7x7 conv (2->1 ch, pad=3, no bias) + folded BN + sigmoid.

    mx, avg: (n, H*W) f32 lane-dense maps.  Returns (n, H*W) f32.
    """
    n = mx.shape[0]
    HW = H * W
    PADW = PAD * W

    # Row (kh) shifts: pad by PAD*W zeros on both ends; a shift by
    # (kh - PAD) * W is then a plain slice at offset kh*W (row shifts never
    # cross a row boundary, so no mask is needed).
    zrow = jnp.zeros((n, PADW), jnp.float32)
    mx_p = jnp.concatenate([zrow, mx, zrow], axis=-1)
    avg_p = jnp.concatenate([zrow, avg, zrow], axis=-1)
    r_mx = [mx_p[:, kh * W: kh * W + HW] for kh in range(KSIZE)]
    r_avg = [avg_p[:, kh * W: kh * W + HW] for kh in range(KSIZE)]

    def widx(c, kh, kw):                                    # conv_w flat index
        return c * KSIZE * KSIZE + kh * KSIZE + kw

    # Weighted accumulation over (channel, kh) for each kw; two independent
    # partial accumulators per kw keep the VALU dependency chains short.
    h_maps = []
    for kw in range(KSIZE):
        acc_max = wv[widx(0, 0, kw)] * r_mx[0]
        acc_avg = wv[widx(1, 0, kw)] * r_avg[0]
        for kh in range(1, KSIZE):
            acc_max = acc_max + wv[widx(0, kh, kw)] * r_mx[kh]
            acc_avg = acc_avg + wv[widx(1, kh, kw)] * r_avg[kh]
        h_maps.append(acc_max + acc_avg)

    # Column (kw) shifts: pad by PAD, slice, then zero the columns that
    # crossed a row boundary using precomputed 0/1 masks (no in-kernel iota).
    zcol = jnp.zeros((n, PAD), jnp.float32)
    conv_terms = []
    for kw in range(KSIZE):
        if kw == PAD:                                       # dw == 0: no shift
            conv_terms.append(h_maps[kw])
            continue
        hp = jnp.concatenate([zcol, h_maps[kw], zcol], axis=-1)
        conv_terms.append(hp[:, kw: kw + HW] * masks[kw: kw + 1, :])
    conv = _tree_sum(conv_terms)                            # (n, HW)

    return jax.nn.sigmoid(bn_a * conv + bn_b)


def _fused_kernel(w_ref, bn_ref, mask_ref, x_ref, o_ref, *, H, W):
    """Fused single-pass step: x_ref / o_ref are (bblk, C, H*W)."""
    # Hoisted scalar parameters (read SMEM once, before the conv loops).
    wv = [w_ref[i] for i in range(2 * KSIZE * KSIZE)]
    bn_a = bn_ref[0]
    bn_b = bn_ref[1]
    masks = mask_ref[...]                                   # (KSIZE, HW) f32

    xb = x_ref[...]                                         # (bblk, C, HW), input dtype
    C = xb.shape[1]
    # Channel max in the input dtype (exact); mean accumulated in f32.
    mx = jnp.max(xb, axis=1).astype(jnp.float32)            # (bblk, HW)
    avg = jnp.sum(xb, axis=1, dtype=jnp.float32) * (1.0 / C)

    att = _conv_bn_sigmoid(mx, avg, wv, bn_a, bn_b, masks, H, W)

    # Broadcast multiply in the input dtype; single lane-dense store.
    o_ref[...] = (xb * att.astype(xb.dtype)[:, None, :]).astype(o_ref.dtype)


def _att_kernel(w_ref, bn_ref, mask_ref, x_ref, att_ref, mx_acc, sum_acc, *, H, W, C):
    """Fallback pass (a): grid (batch blocks, C chunks).  Accumulates the
    channel max / sum over C chunks and emits the attention map at the last
    chunk.  x_ref: (bblk, c_chunk, HW); att_ref: (bblk, 1, HW) f32."""
    c = pl.program_id(1)

    @pl.when(c == 0)
    def _():
        mx_acc[...] = jnp.full_like(mx_acc, -jnp.inf)
        sum_acc[...] = jnp.zeros_like(sum_acc)

    xb = x_ref[...]
    mx_acc[...] = jnp.maximum(mx_acc[...], jnp.max(xb, axis=1).astype(jnp.float32))
    sum_acc[...] = sum_acc[...] + jnp.sum(xb, axis=1, dtype=jnp.float32)

    @pl.when(c == pl.num_programs(1) - 1)
    def _():
        wv = [w_ref[i] for i in range(2 * KSIZE * KSIZE)]
        bn_a = bn_ref[0]
        bn_b = bn_ref[1]
        masks = mask_ref[...]
        avg = sum_acc[...] * (1.0 / C)
        att = _conv_bn_sigmoid(mx_acc[...], avg, wv, bn_a, bn_b, masks, H, W)
        att_ref[...] = att[:, None, :]


def _mul_kernel(att_ref, x_ref, o_ref):
    """Fallback pass (b): C-tiled broadcast multiply o = x * att."""
    xb = x_ref[...]
    o_ref[...] = (xb * att_ref[...].astype(xb.dtype)).astype(o_ref.dtype)


def _vmem_capacity_bytes():
    """Physical VMEM per TensorCore; conservative 64 MiB (v7x) if unknown."""
    try:
        info = pltpu.get_tpu_info()
        for name in ("vmem_capacity_bytes", "vmem_size_bytes", "vmem_bytes"):
            cap = getattr(info, name, None)
            if cap:
                return int(cap)
    except Exception:
        pass
    return 64 << 20


def spatial_attention(x, conv_w, gamma, beta, running_mean, running_var,
                      eps=1e-5, *, max_block_bytes=None, vmem_limit_bytes=None):
    """x: (B, C, H, W); conv_w: (1, 2, 7, 7); BN params: shape (1,) each."""
    B, C, H, W = x.shape
    HW = H * W
    out_dtype = x.dtype
    itemsize = x.dtype.itemsize

    # Fold eval-mode BatchNorm into an affine transform of the conv output.
    a = gamma.astype(jnp.float32) / jnp.sqrt(running_var.astype(jnp.float32) + eps)
    b = beta.astype(jnp.float32) - running_mean.astype(jnp.float32) * a
    bn_params = jnp.concatenate([a.reshape(1), b.reshape(1)]).astype(jnp.float32)
    w_flat = conv_w.reshape(-1).astype(jnp.float32)          # (2*7*7,)

    # Precomputed column-validity masks (0/1 f32) in the flattened layout.
    col = jnp.arange(HW, dtype=jnp.int32) % W
    dws = jnp.arange(KSIZE, dtype=jnp.int32) - PAD
    col_mask = (((col[None, :] + dws[:, None]) >= 0)
                & ((col[None, :] + dws[:, None]) < W)).astype(jnp.float32)

    # Lane-dense layout: flatten the spatial dims (free, contiguous reshape).
    xf = x.reshape(B, C, HW)

    # --- Block / VMEM sizing (HBM-streaming bound => big per-step blocks). --
    vmem_cap = _vmem_capacity_bytes()
    if max_block_bytes is None:
        # ~8 MiB/step on 64 MiB-VMEM parts (v7x), ~16 MiB on 128 MiB parts.
        max_block_bytes = vmem_cap // 8
    if vmem_limit_bytes is None:
        # 2x double-buffered in + out blocks + f32 temporaries + headroom,
        # clamped to ~75% of physical VMEM (48 MiB v7x, 96 MiB v5e/v6e).
        vmem_limit_bytes = int(min(max(4 * max_block_bytes + (8 << 20), 32 << 20),
                                   (vmem_cap * 3) // 4))

    smem_specs = [
        pl.BlockSpec(memory_space=pltpu.MemorySpace.SMEM),   # conv weights
        pl.BlockSpec(memory_space=pltpu.MemorySpace.SMEM),   # folded BN (a, b)
    ]

    def compiler_params(sem):
        return pltpu.CompilerParams(dimension_semantics=sem,
                                    vmem_limit_bytes=vmem_limit_bytes)

    # --- Fused single-pass path: whole (bblk, C, HW) block in VMEM. ---------
    # Largest bblk dividing B whose block fits the budget while keeping >= 2
    # grid steps on the batch axis (so v7x's two TensorCores both get work).
    per_elem_bytes = C * HW * itemsize
    fused_cands = [d for d in range(1, B + 1)
                   if B % d == 0
                   and d * per_elem_bytes <= max_block_bytes
                   and B // d >= min(2, B)]
    if fused_cands:
        bblk = max(fused_cands)
        out_flat = pl.pallas_call(
            functools.partial(_fused_kernel, H=H, W=W),
            out_shape=jax.ShapeDtypeStruct((B, C, HW), out_dtype),
            grid_spec=pltpu.PrefetchScalarGridSpec(
                num_scalar_prefetch=0,
                grid=(B // bblk,),
                in_specs=smem_specs + [
                    pl.BlockSpec((KSIZE, HW), lambda g: (0, 0)),        # col masks
                    pl.BlockSpec((bblk, C, HW), lambda g: (g, 0, 0)),   # x block
                ],
                out_specs=pl.BlockSpec((bblk, C, HW), lambda g: (g, 0, 0)),
            ),
            compiler_params=compiler_params(("parallel",)),
        )(w_flat, bn_params, col_mask, xf)
        return out_flat.reshape(B, C, H, W)

    # --- Fallback for very large C*HW (e.g. v7x 64 MiB VMEM): two passes. ---
    # (a) C-chunked reduction producing the attention map, (b) C-tiled
    # broadcast multiply.  Costs one extra HBM read of x, but every block
    # stays comfortably inside VMEM.
    legal_c = [d for d in range(1, C + 1) if C % d == 0 and (d % 8 == 0 or d == C)]
    fitting_c = [d for d in legal_c if d * HW * itemsize <= max_block_bytes]
    c_chunk = max(fitting_c) if fitting_c else min(legal_c)
    n_c = C // c_chunk

    b_cands = [d for d in range(1, B + 1)
               if B % d == 0
               and d * c_chunk * HW * itemsize <= max_block_bytes
               and B // d >= min(2, B)]
    bblk = max(b_cands) if b_cands else 1

    att = pl.pallas_call(
        functools.partial(_att_kernel, H=H, W=W, C=C),
        out_shape=jax.ShapeDtypeStruct((B, 1, HW), jnp.float32),
        grid_spec=pltpu.PrefetchScalarGridSpec(
            num_scalar_prefetch=0,
            grid=(B // bblk, n_c),
            in_specs=smem_specs + [
                pl.BlockSpec((KSIZE, HW), lambda g, c: (0, 0)),
                pl.BlockSpec((bblk, c_chunk, HW), lambda g, c: (g, c, 0)),
            ],
            out_specs=pl.BlockSpec((bblk, 1, HW), lambda g, c: (g, 0, 0)),
            scratch_shapes=[pltpu.VMEM((bblk, HW), jnp.float32),    # running max
                            pltpu.VMEM((bblk, HW), jnp.float32)],   # running sum
        ),
        compiler_params=compiler_params(("parallel", "arbitrary")),
    )(w_flat, bn_params, col_mask, xf)

    out_flat = pl.pallas_call(
        _mul_kernel,
        out_shape=jax.ShapeDtypeStruct((B, C, HW), out_dtype),
        grid_spec=pltpu.PrefetchScalarGridSpec(
            num_scalar_prefetch=0,
            grid=(B // bblk, n_c),
            in_specs=[
                pl.BlockSpec((bblk, 1, HW), lambda g, c: (g, 0, 0)),
                pl.BlockSpec((bblk, c_chunk, HW), lambda g, c: (g, c, 0)),
            ],
            out_specs=pl.BlockSpec((bblk, c_chunk, HW), lambda g, c: (g, c, 0)),
        ),
        compiler_params=compiler_params(("parallel", "parallel")),
    )(att, xf)

    return out_flat.reshape(B, C, H, W)


def _reference(x, conv_w, gamma, beta, running_mean, running_var, eps=1e-5):
    mx = jnp.max(x, axis=1, keepdims=True)
    avg = jnp.mean(x, axis=1, keepdims=True)
    cat = jnp.concatenate([mx, avg], axis=1)                 # (B, 2, H, W)
    conv = jax.lax.conv_general_dilated(
        cat, conv_w, window_strides=(1, 1), padding=[(PAD, PAD), (PAD, PAD)],
        dimension_numbers=("NCHW", "OIHW", "NCHW"))
    bn = gamma.reshape(1, 1, 1, 1) * (conv - running_mean.reshape(1, 1, 1, 1)) \
        / jnp.sqrt(running_var.reshape(1, 1, 1, 1) + eps) + beta.reshape(1, 1, 1, 1)
    return x * jax.nn.sigmoid(bn)


if __name__ == "__main__":
    key = jax.random.PRNGKey(0)
    kx, kw, kx2, kw2 = jax.random.split(key, 4)

    # Deterministic parameter init (Conv2d(2, 1, 7, 7), bias=False) + fresh BN.
    gamma = jnp.ones((1,), jnp.float32)
    beta = jnp.zeros((1,), jnp.float32)
    running_mean = jnp.zeros((1,), jnp.float32)
    running_var = jnp.ones((1,), jnp.float32)

    # Main check: small shape, fused single-pass path.
    B, C, H, W = 2, 4, 16, 16
    x = jax.random.normal(kx, (B, C, H, W), dtype=jnp.float32)
    conv_w = 0.1 * jax.random.normal(kw, (1, 2, KSIZE, KSIZE), dtype=jnp.float32)

    out = spatial_attention(x, conv_w, gamma, beta, running_mean, running_var)
    out = jax.block_until_ready(out)
    ref = _reference(x, conv_w, gamma, beta, running_mean, running_var)
    assert out.shape == (B, C, H, W)
    err = float(jnp.max(jnp.abs(out - ref)))
    assert jnp.allclose(out, ref, atol=1e-4, rtol=1e-4), err

    # Secondary check: force the large-feature-map fallback (C-chunked
    # reduction + C-tiled multiply) by shrinking the per-block budget.
    B2, C2, H2, W2 = 2, 16, 16, 16
    x2 = jax.random.normal(kx2, (B2, C2, H2, W2), dtype=jnp.float32)
    conv_w2 = 0.1 * jax.random.normal(kw2, (1, 2, KSIZE, KSIZE), dtype=jnp.float32)
    out2 = spatial_attention(
        x2, conv_w2, gamma, beta, running_mean, running_var,
        max_block_bytes=8 * H2 * W2 * x2.dtype.itemsize)     # -> c_chunk=8, 2 chunks
    out2 = jax.block_until_ready(out2)
    ref2 = _reference(x2, conv_w2, gamma, beta, running_mean, running_var)
    err2 = float(jnp.max(jnp.abs(out2 - ref2)))
    assert jnp.allclose(out2, ref2, atol=1e-4, rtol=1e-4), err2

    print("KERNEL_OK")
</pallas_src>

<mosaic_0001>
module attributes {stable_mosaic.version = 11 : i64} {
  func.func @_fused_kernel(%arg0: i32, %arg1: memref<98xf32, #tpu.memory_space<smem>>, %arg2: memref<2xf32, #tpu.memory_space<smem>>, %arg3: memref<7x256xf32, #tpu.memory_space<vmem>>, %arg4: memref<1x4x256xf32, #tpu.memory_space<vmem>>, %arg5: memref<1x4x256xf32, #tpu.memory_space<vmem>>) attributes {dimension_semantics = [#tpu.dimension_semantics<parallel>], iteration_bounds = array<i64: 2>, scalar_prefetch = 0 : i64, scratch_operands = 0 : i64, tpu.core_type = #tpu.core_type<tc>, window_params = [{transform_indices = @transform_0, window_bounds = array<i64: 98>}, {transform_indices = @transform_1, window_bounds = array<i64: 2>}, {pipeline_mode = #tpu.pipeline_mode<synchronous>, transform_indices = @transform_2, window_bounds = array<i64: 7, 256>}, {transform_indices = @transform_3, window_bounds = array<i64: 1, 4, 256>}, {transform_indices = @transform_4, window_bounds = array<i64: 1, 4, 256>}]} {
    %c0 = arith.constant 0 : index
    %0 = memref.load %arg1[%c0] : memref<98xf32, #tpu.memory_space<smem>>
    %c1 = arith.constant 1 : index
    %1 = memref.load %arg1[%c1] : memref<98xf32, #tpu.memory_space<smem>>
    %c2 = arith.constant 2 : index
    %2 = memref.load %arg1[%c2] : memref<98xf32, #tpu.memory_space<smem>>
    %c3 = arith.constant 3 : index
    %3 = memref.load %arg1[%c3] : memref<98xf32, #tpu.memory_space<smem>>
    %c4 = arith.constant 4 : index
    %4 = memref.load %arg1[%c4] : memref<98xf32, #tpu.memory_space<smem>>
    %c5 = arith.constant 5 : index
    %5 = memref.load %arg1[%c5] : memref<98xf32, #tpu.memory_space<smem>>
    %c6 = arith.constant 6 : index
    %6 = memref.load %arg1[%c6] : memref<98xf32, #tpu.memory_space<smem>>
    %c7 = arith.constant 7 : index
    %7 = memref.load %arg1[%c7] : memref<98xf32, #tpu.memory_space<smem>>
    %c8 = arith.constant 8 : index
    %8 = memref.load %arg1[%c8] : memref<98xf32, #tpu.memory_space<smem>>
    %c9 = arith.constant 9 : index
    %9 = memref.load %arg1[%c9] : memref<98xf32, #tpu.memory_space<smem>>
    %c10 = arith.constant 10 : index
    %10 = memref.load %arg1[%c10] : memref<98xf32, #tpu.memory_space<smem>>
    %c11 = arith.constant 11 : index
    %11 = memref.load %arg1[%c11] : memref<98xf32, #tpu.memory_space<smem>>
    %c12 = arith.constant 12 : index
    %12 = memref.load %arg1[%c12] : memref<98xf32, #tpu.memory_space<smem>>
    %c13 = arith.constant 13 : index
    %13 = memref.load %arg1[%c13] : memref<98xf32, #tpu.memory_space<smem>>
    %c14 = arith.constant 14 : index
    %14 = memref.load %arg1[%c14] : memref<98xf32, #tpu.memory_space<smem>>
    %c15 = arith.constant 15 : index
    %15 = memref.load %arg1[%c15] : memref<98xf32, #tpu.memory_space<smem>>
    %c16 = arith.constant 16 : index
    %16 = memref.load %arg1[%c16] : memref<98xf32, #tpu.memory_space<smem>>
    %c17 = arith.constant 17 : index
    %17 = memref.load %arg1[%c17] : memref<98xf32, #tpu.memory_space<smem>>
    %c18 = arith.constant 18 : index
    %18 = memref.load %arg1[%c18] : memref<98xf32, #tpu.memory_space<smem>>
    %c19 = arith.constant 19 : index
    %19 = memref.load %arg1[%c19] : memref<98xf32, #tpu.memory_space<smem>>
    %c20 = arith.constant 20 : index
    %20 = memref.load %arg1[%c20] : memref<98xf32, #tpu.memory_space<smem>>
    %c21 = arith.constant 21 : index
    %21 = memref.load %arg1[%c21] : memref<98xf32, #tpu.memory_space<smem>>
    %c22 = arith.constant 22 : index
    %22 = memref.load %arg1[%c22] : memref<98xf32, #tpu.memory_space<smem>>
    %c23 = arith.constant 23 : index
    %23 = memref.load %arg1[%c23] : memref<98xf32, #tpu.memory_space<smem>>
    %c24 = arith.constant 24 : index
    %24 = memref.load %arg1[%c24] : memref<98xf32, #tpu.memory_space<smem>>
    %c25 = arith.constant 25 : index
    %25 = memref.load %arg1[%c25] : memref<98xf32, #tpu.memory_space<smem>>
    %c26 = arith.constant 26 : index
    %26 = memref.load %arg1[%c26] : memref<98xf32, #tpu.memory_space<smem>>
    %c27 = arith.constant 27 : index
    %27 = memref.load %arg1[%c27] : memref<98xf32, #tpu.memory_space<smem>>
    %c28 = arith.constant 28 : index
    %28 = memref.load %arg1[%c28] : memref<98xf32, #tpu.memory_space<smem>>
    %c29 = arith.constant 29 : index
    %29 = memref.load %arg1[%c29] : memref<98xf32, #tpu.memory_space<smem>>
    %c30 = arith.constant 30 : index
    %30 = memref.load %arg1[%c30] : memref<98xf32, #tpu.memory_space<smem>>
    %c31 = arith.constant 31 : index
    %31 = memref.load %arg1[%c31] : memref<98xf32, #tpu.memory_space<smem>>
    %c32 = arith.constant 32 : index
    %32 = memref.load %arg1[%c32] : memref<98xf32, #tpu.memory_space<smem>>
    %c33 = arith.constant 33 : index
    %33 = memref.load %arg1[%c33] : memref<98xf32, #tpu.memory_space<smem>>
    %c34 = arith.constant 34 : index
    %34 = memref.load %arg1[%c34] : memref<98xf32, #tpu.memory_space<smem>>
    %c35 = arith.constant 35 : index
    %35 = memref.load %arg1[%c35] : memref<98xf32, #tpu.memory_space<smem>>
    %c36 = arith.constant 36 : index
    %36 = memref.load %arg1[%c36] : memref<98xf32, #tpu.memory_space<smem>>
    %c37 = arith.constant 37 : index
    %37 = memref.load %arg1[%c37] : memref<98xf32, #tpu.memory_space<smem>>
    %c38 = arith.constant 38 : index
    %38 = memref.load %arg1[%c38] : memref<98xf32, #tpu.memory_space<smem>>
    %c39 = arith.constant 39 : index
    %39 = memref.load %arg1[%c39] : memref<98xf32, #tpu.memory_space<smem>>
    %c40 = arith.constant 40 : index
    %40 = memref.load %arg1[%c40] : memref<98xf32, #tpu.memory_space<smem>>
    %c41 = arith.constant 41 : index
    %41 = memref.load %arg1[%c41] : memref<98xf32, #tpu.memory_space<smem>>
    %c42 = arith.constant 42 : index
    %42 = memref.load %arg1[%c42] : memref<98xf32, #tpu.memory_space<smem>>
    %c43 = arith.constant 43 : index
    %43 = memref.load %arg1[%c43] : memref<98xf32, #tpu.memory_space<smem>>
    %c44 = arith.constant 44 : index
    %44 = memref.load %arg1[%c44] : memref<98xf32, #tpu.memory_space<smem>>
    %c45 = arith.constant 45 : index
    %45 = memref.load %arg1[%c45] : memref<98xf32, #tpu.memory_space<smem>>
    %c46 = arith.constant 46 : index
    %46 = memref.load %arg1[%c46] : memref<98xf32, #tpu.memory_space<smem>>
    %c47 = arith.constant 47 : index
    %47 = memref.load %arg1[%c47] : memref<98xf32, #tpu.memory_space<smem>>
    %c48 = arith.constant 48 : index
    %48 = memref.load %arg1[%c48] : memref<98xf32, #tpu.memory_space<smem>>
    %c49 = arith.constant 49 : index
    %49 = memref.load %arg1[%c49] : memref<98xf32, #tpu.memory_space<smem>>
    %c50 = arith.constant 50 : index
    %50 = memref.load %arg1[%c50] : memref<98xf32, #tpu.memory_space<smem>>
    %c51 = arith.constant 51 : index
    %51 = memref.load %arg1[%c51] : memref<98xf32, #tpu.memory_space<smem>>
    %c52 = arith.constant 52 : index
    %52 = memref.load %arg1[%c52] : memref<98xf32, #tpu.memory_space<smem>>
    %c53 = arith.constant 53 : index
    %53 = memref.load %arg1[%c53] : memref<98xf32, #tpu.memory_space<smem>>
    %c54 = arith.constant 54 : index
    %54 = memref.load %arg1[%c54] : memref<98xf32, #tpu.memory_space<smem>>
    %c55 = arith.constant 55 : index
    %55 = memref.load %arg1[%c55] : memref<98xf32, #tpu.memory_space<smem>>
    %c56 = arith.constant 56 : index
    %56 = memref.load %arg1[%c56] : memref<98xf32, #tpu.memory_space<smem>>
    %c57 = arith.constant 57 : index
    %57 = memref.load %arg1[%c57] : memref<98xf32, #tpu.memory_space<smem>>
    %c58 = arith.constant 58 : index
    %58 = memref.load %arg1[%c58] : memref<98xf32, #tpu.memory_space<smem>>
    %c59 = arith.constant 59 : index
    %59 = memref.load %arg1[%c59] : memref<98xf32, #tpu.memory_space<smem>>
    %c60 = arith.constant 60 : index
    %60 = memref.load %arg1[%c60] : memref<98xf32, #tpu.memory_space<smem>>
    %c61 = arith.constant 61 : index
    %61 = memref.load %arg1[%c61] : memref<98xf32, #tpu.memory_space<smem>>
    %c62 = arith.constant 62 : index
    %62 = memref.load %arg1[%c62] : memref<98xf32, #tpu.memory_space<smem>>
    %c63 = arith.constant 63 : index
    %63 = memref.load %arg1[%c63] : memref<98xf32, #tpu.memory_space<smem>>
    %c64 = arith.constant 64 : index
    %64 = memref.load %arg1[%c64] : memref<98xf32, #tpu.memory_space<smem>>
    %c65 = arith.constant 65 : index
    %65 = memref.load %arg1[%c65] : memref<98xf32, #tpu.memory_space<smem>>
    %c66 = arith.constant 66 : index
    %66 = memref.load %arg1[%c66] : memref<98xf32, #tpu.memory_space<smem>>
    %c67 = arith.constant 67 : index
    %67 = memref.load %arg1[%c67] : memref<98xf32, #tpu.memory_space<smem>>
    %c68 = arith.constant 68 : index
    %68 = memref.load %arg1[%c68] : memref<98xf32, #tpu.memory_space<smem>>
    %c69 = arith.constant 69 : index
    %69 = memref.load %arg1[%c69] : memref<98xf32, #tpu.memory_space<smem>>
    %c70 = arith.constant 70 : index
    %70 = memref.load %arg1[%c70] : memref<98xf32, #tpu.memory_space<smem>>
    %c71 = arith.constant 71 : index
    %71 = memref.load %arg1[%c71] : memref<98xf32, #tpu.memory_space<smem>>
    %c72 = arith.constant 72 : index
    %72 = memref.load %arg1[%c72] : memref<98xf32, #tpu.memory_space<smem>>
    %c73 = arith.constant 73 : index
    %73 = memref.load %arg1[%c73] : memref<98xf32, #tpu.memory_space<smem>>
    %c74 = arith.constant 74 : index
    %74 = memref.load %arg1[%c74] : memref<98xf32, #tpu.memory_space<smem>>
    %c75 = arith.constant 75 : index
    %75 = memref.load %arg1[%c75] : memref<98xf32, #tpu.memory_space<smem>>
    %c76 = arith.constant 76 : index
    %76 = memref.load %arg1[%c76] : memref<98xf32, #tpu.memory_space<smem>>
    %c77 = arith.constant 77 : index
    %77 = memref.load %arg1[%c77] : memref<98xf32, #tpu.memory_space<smem>>
    %c78 = arith.constant 78 : index
    %78 = memref.load %arg1[%c78] : memref<98xf32, #tpu.memory_space<smem>>
    %c79 = arith.constant 79 : index
    %79 = memref.load %arg1[%c79] : memref<98xf32, #tpu.memory_space<smem>>
    %c80 = arith.constant 80 : index
    %80 = memref.load %arg1[%c80] : memref<98xf32, #tpu.memory_space<smem>>
    %c81 = arith.constant 81 : index
    %81 = memref.load %arg1[%c81] : memref<98xf32, #tpu.memory_space<smem>>
    %c82 = arith.constant 82 : index
    %82 = memref.load %arg1[%c82] : memref<98xf32, #tpu.memory_space<smem>>
    %c83 = arith.constant 83 : index
    %83 = memref.load %arg1[%c83] : memref<98xf32, #tpu.memory_space<smem>>
    %c84 = arith.constant 84 : index
    %84 = memref.load %arg1[%c84] : memref<98xf32, #tpu.memory_space<smem>>
    %c85 = arith.constant 85 : index
    %85 = memref.load %arg1[%c85] : memref<98xf32, #tpu.memory_space<smem>>
    %c86 = arith.constant 86 : index
    %86 = memref.load %arg1[%c86] : memref<98xf32, #tpu.memory_space<smem>>
    %c87 = arith.constant 87 : index
    %87 = memref.load %arg1[%c87] : memref<98xf32, #tpu.memory_space<smem>>
    %c88 = arith.constant 88 : index
    %88 = memref.load %arg1[%c88] : memref<98xf32, #tpu.memory_space<smem>>
    %c89 = arith.constant 89 : index
    %89 = memref.load %arg1[%c89] : memref<98xf32, #tpu.memory_space<smem>>
    %c90 = arith.constant 90 : index
    %90 = memref.load %arg1[%c90] : memref<98xf32, #tpu.memory_space<smem>>
    %c91 = arith.constant 91 : index
    %91 = memref.load %arg1[%c91] : memref<98xf32, #tpu.memory_space<smem>>
    %c92 = arith.constant 92 : index
    %92 = memref.load %arg1[%c92] : memref<98xf32, #tpu.memory_space<smem>>
    %c93 = arith.constant 93 : index
    %93 = memref.load %arg1[%c93] : memref<98xf32, #tpu.memory_space<smem>>
    %c94 = arith.constant 94 : index
    %94 = memref.load %arg1[%c94] : memref<98xf32, #tpu.memory_space<smem>>
    %c95 = arith.constant 95 : index
    %95 = memref.load %arg1[%c95] : memref<98xf32, #tpu.memory_space<smem>>
    %c96 = arith.constant 96 : index
    %96 = memref.load %arg1[%c96] : memref<98xf32, #tpu.memory_space<smem>>
    %c97 = arith.constant 97 : index
    %97 = memref.load %arg1[%c97] : memref<98xf32, #tpu.memory_space<smem>>
    %c0_0 = arith.constant 0 : index
    %98 = memref.load %arg2[%c0_0] : memref<2xf32, #tpu.memory_space<smem>>
    %c1_1 = arith.constant 1 : index
    %99 = memref.load %arg2[%c1_1] : memref<2xf32, #tpu.memory_space<smem>>
    %c0_2 = arith.constant 0 : index
    %c0_3 = arith.constant 0 : index
    %100 = vector.load %arg3[%c0_2, %c0_3] : memref<7x256xf32, #tpu.memory_space<vmem>>, vector<7x256xf32>
    %c0_4 = arith.constant 0 : index
    %c0_5 = arith.constant 0 : index
    %c0_6 = arith.constant 0 : index
    %101 = vector.load %arg4[%c0_4, %c0_5, %c0_6] : memref<1x4x256xf32, #tpu.memory_space<vmem>>, vector<1x4x256xf32>
    %cst = arith.constant dense<0xFF800000> : vector<1x256xf32>
    %102 = vector.multi_reduction <maximumf>, %101, %cst [1] : vector<1x4x256xf32> to vector<1x256xf32>
    %cst_7 = arith.constant dense<0.000000e+00> : vector<1x256xf32>
    %103 = vector.multi_reduction <add>, %101, %cst_7 [1] : vector<1x4x256xf32> to vector<1x256xf32>
    %cst_8 = arith.constant 2.500000e-01 : f32
    %104 = vector.broadcast %cst_8 : f32 to vector<1x256xf32>
    %105 = arith.mulf %103, %104 : vector<1x256xf32>
    %cst_9 = arith.constant 0.000000e+00 : f32
    %106 = vector.broadcast %cst_9 : f32 to vector<1x48xf32>
    %107 = tpu.concatenate %106, %102, %106 in 1 : vector<1x48xf32>, vector<1x256xf32>, vector<1x48xf32> -> vector<1x352xf32>
    %108 = tpu.concatenate %106, %105, %106 in 1 : vector<1x48xf32>, vector<1x256xf32>, vector<1x48xf32> -> vector<1x352xf32>
    %109 = vector.extract_strided_slice %107 {offsets = [0, 0], sizes = [1, 256], strides = [1, 1]} : vector<1x352xf32> to vector<1x256xf32>
    %110 = vector.extract_strided_slice %107 {offsets = [0, 16], sizes = [1, 256], strides = [1, 1]} : vector<1x352xf32> to vector<1x256xf32>
    %111 = vector.extract_strided_slice %107 {offsets = [0, 32], sizes = [1, 256], strides = [1, 1]} : vector<1x352xf32> to vector<1x256xf32>
    %112 = vector.extract_strided_slice %107 {offsets = [0, 48], sizes = [1, 256], strides = [1, 1]} : vector<1x352xf32> to vector<1x256xf32>
    %113 = vector.extract_strided_slice %107 {offsets = [0, 64], sizes = [1, 256], strides = [1, 1]} : vector<1x352xf32> to vector<1x256xf32>
    %114 = vector.extract_strided_slice %107 {offsets = [0, 80], sizes = [1, 256], strides = [1, 1]} : vector<1x352xf32> to vector<1x256xf32>
    %115 = vector.extract_strided_slice %107 {offsets = [0, 96], sizes = [1, 256], strides = [1, 1]} : vector<1x352xf32> to vector<1x256xf32>
    %116 = vector.extract_strided_slice %108 {offsets = [0, 0], sizes = [1, 256], strides = [1, 1]} : vector<1x352xf32> to vector<1x256xf32>
    %117 = vector.extract_strided_slice %108 {offsets = [0, 16], sizes = [1, 256], strides = [1, 1]} : vector<1x352xf32> to vector<1x256xf32>
    %118 = vector.extract_strided_slice %108 {offsets = [0, 32], sizes = [1, 256], strides = [1, 1]} : vector<1x352xf32> to vector<1x256xf32>
    %119 = vector.extract_strided_slice %108 {offsets = [0, 48], sizes = [1, 256], strides = [1, 1]} : vector<1x352xf32> to vector<1x256xf32>
    %120 = vector.extract_strided_slice %108 {offsets = [0, 64], sizes = [1, 256], strides = [1, 1]} : vector<1x352xf32> to vector<1x256xf32>
    %121 = vector.extract_strided_slice %108 {offsets = [0, 80], sizes = [1, 256], strides = [1, 1]} : vector<1x352xf32> to vector<1x256xf32>
    %122 = vector.extract_strided_slice %108 {offsets = [0, 96], sizes = [1, 256], strides = [1, 1]} : vector<1x352xf32> to vector<1x256xf32>
    %123 = vector.broadcast %0 : f32 to vector<1x256xf32>
    %124 = arith.mulf %123, %109 : vector<1x256xf32>
    %125 = vector.broadcast %49 : f32 to vector<1x256xf32>
    %126 = arith.mulf %125, %116 : vector<1x256xf32>
    %127 = vector.broadcast %7 : f32 to vector<1x256xf32>
    %128 = arith.mulf %127, %110 : vector<1x256xf32>
    %129 = arith.addf %124, %128 : vector<1x256xf32>
    %130 = vector.broadcast %56 : f32 to vector<1x256xf32>
    %131 = arith.mulf %130, %117 : vector<1x256xf32>
    %132 = arith.addf %126, %131 : vector<1x256xf32>
    %133 = vector.broadcast %14 : f32 to vector<1x256xf32>
    %134 = arith.mulf %133, %111 : vector<1x256xf32>
    %135 = arith.addf %129, %134 : vector<1x256xf32>
    %136 = vector.broadcast %63 : f32 to vector<1x256xf32>
    %137 = arith.mulf %136, %118 : vector<1x256xf32>
    %138 = arith.addf %132, %137 : vector<1x256xf32>
    %139 = vector.broadcast %21 : f32 to vector<1x256xf32>
    %140 = arith.mulf %139, %112 : vector<1x256xf32>
    %141 = arith.addf %135, %140 : vector<1x256xf32>
    %142 = vector.broadcast %70 : f32 to vector<1x256xf32>
    %143 = arith.mulf %142, %119 : vector<1x256xf32>
    %144 = arith.addf %138, %143 : vector<1x256xf32>
    %145 = vector.broadcast %28 : f32 to vector<1x256xf32>
    %146 = arith.mulf %145, %113 : vector<1x256xf32>
    %147 = arith.addf %141, %146 : vector<1x256xf32>
    %148 = vector.broadcast %77 : f32 to vector<1x256xf32>
    %149 = arith.mulf %148, %120 : vector<1x256xf32>
    %150 = arith.addf %144, %149 : vector<1x256xf32>
    %151 = vector.broadcast %35 : f32 to vector<1x256xf32>
    %152 = arith.mulf %151, %114 : vector<1x256xf32>
    %153 = arith.addf %147, %152 : vector<1x256xf32>
    %154 = vector.broadcast %84 : f32 to vector<1x256xf32>
    %155 = arith.mulf %154, %121 : vector<1x256xf32>
    %156 = arith.addf %150, %155 : vector<1x256xf32>
    %157 = vector.broadcast %42 : f32 to vector<1x256xf32>
    %158 = arith.mulf %157, %115 : vector<1x256xf32>
    %159 = arith.addf %153, %158 : vector<1x256xf32>
    %160 = vector.broadcast %91 : f32 to vector<1x256xf32>
    %161 = arith.mulf %160, %122 : vector<1x256xf32>
    %162 = arith.addf %156, %161 : vector<1x256xf32>
    %163 = arith.addf %159, %162 : vector<1x256xf32>
    %164 = vector.broadcast %1 : f32 to vector<1x256xf32>
    %165 = arith.mulf %164, %109 : vector<1x256xf32>
    %166 = vector.broadcast %50 : f32 to vector<1x256xf32>
    %167 = arith.mulf %166, %116 : vector<1x256xf32>
    %168 = vector.broadcast %8 : f32 to vector<1x256xf32>
    %169 = arith.mulf %168, %110 : vector<1x256xf32>
    %170 = arith.addf %165, %169 : vector<1x256xf32>
    %171 = vector.broadcast %57 : f32 to vector<1x256xf32>
    %172 = arith.mulf %171, %117 : vector<1x256xf32>
    %173 = arith.addf %167, %172 : vector<1x256xf32>
    %174 = vector.broadcast %15 : f32 to vector<1x256xf32>
    %175 = arith.mulf %174, %111 : vector<1x256xf32>
    %176 = arith.addf %170, %175 : vector<1x256xf32>
    %177 = vector.broadcast %64 : f32 to vector<1x256xf32>
    %178 = arith.mulf %177, %118 : vector<1x256xf32>
    %179 = arith.addf %173, %178 : vector<1x256xf32>
    %180 = vector.broadcast %22 : f32 to vector<1x256xf32>
    %181 = arith.mulf %180, %112 : vector<1x256xf32>
    %182 = arith.addf %176, %181 : vector<1x256xf32>
    %183 = vector.broadcast %71 : f32 to vector<1x256xf32>
    %184 = arith.mulf %183, %119 : vector<1x256xf32>
    %185 = arith.addf %179, %184 : vector<1x256xf32>
    %186 = vector.broadcast %29 : f32 to vector<1x256xf32>
    %187 = arith.mulf %186, %113 : vector<1x256xf32>
    %188 = arith.addf %182, %187 : vector<1x256xf32>
    %189 = vector.broadcast %78 : f32 to vector<1x256xf32>
    %190 = arith.mulf %189, %120 : vector<1x256xf32>
    %191 = arith.addf %185, %190 : vector<1x256xf32>
    %192 = vector.broadcast %36 : f32 to vector<1x256xf32>
    %193 = arith.mulf %192, %114 : vector<1x256xf32>
    %194 = arith.addf %188, %193 : vector<1x256xf32>
    %195 = vector.broadcast %85 : f32 to vector<1x256xf32>
    %196 = arith.mulf %195, %121 : vector<1x256xf32>
    %197 = arith.addf %191, %196 : vector<1x256xf32>
    %198 = vector.broadcast %43 : f32 to vector<1x256xf32>
    %199 = arith.mulf %198, %115 : vector<1x256xf32>
    %200 = arith.addf %194, %199 : vector<1x256xf32>
    %201 = vector.broadcast %92 : f32 to vector<1x256xf32>
    %202 = arith.mulf %201, %122 : vector<1x256xf32>
    %203 = arith.addf %197, %202 : vector<1x256xf32>
    %204 = arith.addf %200, %203 : vector<1x256xf32>
    %205 = vector.broadcast %2 : f32 to vector<1x256xf32>
    %206 = arith.mulf %205, %109 : vector<1x256xf32>
    %207 = vector.broadcast %51 : f32 to vector<1x256xf32>
    %208 = arith.mulf %207, %116 : vector<1x256xf32>
    %209 = vector.broadcast %9 : f32 to vector<1x256xf32>
    %210 = arith.mulf %209, %110 : vector<1x256xf32>
    %211 = arith.addf %206, %210 : vector<1x256xf32>
    %212 = vector.broadcast %58 : f32 to vector<1x256xf32>
    %213 = arith.mulf %212, %117 : vector<1x256xf32>
    %214 = arith.addf %208, %213 : vector<1x256xf32>
    %215 = vector.broadcast %16 : f32 to vector<1x256xf32>
    %216 = arith.mulf %215, %111 : vector<1x256xf32>
    %217 = arith.addf %211, %216 : vector<1x256xf32>
    %218 = vector.broadcast %65 : f32 to vector<1x256xf32>
    %219 = arith.mulf %218, %118 : vector<1x256xf32>
    %220 = arith.addf %214, %219 : vector<1x256xf32>
    %221 = vector.broadcast %23 : f32 to vector<1x256xf32>
    %222 = arith.mulf %221, %112 : vector<1x256xf32>
    %223 = arith.addf %217, %222 : vector<1x256xf32>
    %224 = vector.broadcast %72 : f32 to vector<1x256xf32>
    %225 = arith.mulf %224, %119 : vector<1x256xf32>
    %226 = arith.addf %220, %225 : vector<1x256xf32>
    %227 = vector.broadcast %30 : f32 to vector<1x256xf32>
    %228 = arith.mulf %227, %113 : vector<1x256xf32>
    %229 = arith.addf %223, %228 : vector<1x256xf32>
    %230 = vector.broadcast %79 : f32 to vector<1x256xf32>
    %231 = arith.mulf %230, %120 : vector<1x256xf32>
    %232 = arith.addf %226, %231 : vector<1x256xf32>
    %233 = vector.broadcast %37 : f32 to vector<1x256xf32>
    %234 = arith.mulf %233, %114 : vector<1x256xf32>
    %235 = arith.addf %229, %234 : vector<1x256xf32>
    %236 = vector.broadcast %86 : f32 to vector<1x256xf32>
    %237 = arith.mulf %236, %121 : vector<1x256xf32>
    %238 = arith.addf %232, %237 : vector<1x256xf32>
    %239 = vector.broadcast %44 : f32 to vector<1x256xf32>
    %240 = arith.mulf %239, %115 : vector<1x256xf32>
    %241 = arith.addf %235, %240 : vector<1x256xf32>
    %242 = vector.broadcast %93 : f32 to vector<1x256xf32>
    %243 = arith.mulf %242, %122 : vector<1x256xf32>
    %244 = arith.addf %238, %243 : vector<1x256xf32>
    %245 = arith.addf %241, %244 : vector<1x256xf32>
    %246 = vector.broadcast %3 : f32 to vector<1x256xf32>
    %247 = arith.mulf %246, %109 : vector<1x256xf32>
    %248 = vector.broadcast %52 : f32 to vector<1x256xf32>
    %249 = arith.mulf %248, %116 : vector<1x256xf32>
    %250 = vector.broadcast %10 : f32 to vector<1x256xf32>
    %251 = arith.mulf %250, %110 : vector<1x256xf32>
    %252 = arith.addf %247, %251 : vector<1x256xf32>
    %253 = vector.broadcast %59 : f32 to vector<1x256xf32>
    %254 = arith.mulf %253, %117 : vector<1x256xf32>
    %255 = arith.addf %249, %254 : vector<1x256xf32>
    %256 = vector.broadcast %17 : f32 to vector<1x256xf32>
    %257 = arith.mulf %256, %111 : vector<1x256xf32>
    %258 = arith.addf %252, %257 : vector<1x256xf32>
    %259 = vector.broadcast %66 : f32 to vector<1x256xf32>
    %260 = arith.mulf %259, %118 : vector<1x256xf32>
    %261 = arith.addf %255, %260 : vector<1x256xf32>
    %262 = vector.broadcast %24 : f32 to vector<1x256xf32>
    %263 = arith.mulf %262, %112 : vector<1x256xf32>
    %264 = arith.addf %258, %263 : vector<1x256xf32>
    %265 = vector.broadcast %73 : f32 to vector<1x256xf32>
    %266 = arith.mulf %265, %119 : vector<1x256xf32>
    %267 = arith.addf %261, %266 : vector<1x256xf32>
    %268 = vector.broadcast %31 : f32 to vector<1x256xf32>
    %269 = arith.mulf %268, %113 : vector<1x256xf32>
    %270 = arith.addf %264, %269 : vector<1x256xf32>
    %271 = vector.broadcast %80 : f32 to vector<1x256xf32>
    %272 = arith.mulf %271, %120 : vector<1x256xf32>
    %273 = arith.addf %267, %272 : vector<1x256xf32>
    %274 = vector.broadcast %38 : f32 to vector<1x256xf32>
    %275 = arith.mulf %274, %114 : vector<1x256xf32>
    %276 = arith.addf %270, %275 : vector<1x256xf32>
    %277 = vector.broadcast %87 : f32 to vector<1x256xf32>
    %278 = arith.mulf %277, %121 : vector<1x256xf32>
    %279 = arith.addf %273, %278 : vector<1x256xf32>
    %280 = vector.broadcast %45 : f32 to vector<1x256xf32>
    %281 = arith.mulf %280, %115 : vector<1x256xf32>
    %282 = arith.addf %276, %281 : vector<1x256xf32>
    %283 = vector.broadcast %94 : f32 to vector<1x256xf32>
    %284 = arith.mulf %283, %122 : vector<1x256xf32>
    %285 = arith.addf %279, %284 : vector<1x256xf32>
    %286 = arith.addf %282, %285 : vector<1x256xf32>
    %287 = vector.broadcast %4 : f32 to vector<1x256xf32>
    %288 = arith.mulf %287, %109 : vector<1x256xf32>
    %289 = vector.broadcast %53 : f32 to vector<1x256xf32>
    %290 = arith.mulf %289, %116 : vector<1x256xf32>
    %291 = vector.broadcast %11 : f32 to vector<1x256xf32>
    %292 = arith.mulf %291, %110 : vector<1x256xf32>
    %293 = arith.addf %288, %292 : vector<1x256xf32>
    %294 = vector.broadcast %60 : f32 to vector<1x256xf32>
    %295 = arith.mulf %294, %117 : vector<1x256xf32>
    %296 = arith.addf %290, %295 : vector<1x256xf32>
    %297 = vector.broadcast %18 : f32 to vector<1x256xf32>
    %298 = arith.mulf %297, %111 : vector<1x256xf32>
    %299 = arith.addf %293, %298 : vector<1x256xf32>
    %300 = vector.broadcast %67 : f32 to vector<1x256xf32>
    %301 = arith.mulf %300, %118 : vector<1x256xf32>
    %302 = arith.addf %296, %301 : vector<1x256xf32>
    %303 = vector.broadcast %25 : f32 to vector<1x256xf32>
    %304 = arith.mulf %303, %112 : vector<1x256xf32>
    %305 = arith.addf %299, %304 : vector<1x256xf32>
    %306 = vector.broadcast %74 : f32 to vector<1x256xf32>
    %307 = arith.mulf %306, %119 : vector<1x256xf32>
    %308 = arith.addf %302, %307 : vector<1x256xf32>
    %309 = vector.broadcast %32 : f32 to vector<1x256xf32>
    %310 = arith.mulf %309, %113 : vector<1x256xf32>
    %311 = arith.addf %305, %310 : vector<1x256xf32>
    %312 = vector.broadcast %81 : f32 to vector<1x256xf32>
    %313 = arith.mulf %312, %120 : vector<1x256xf32>
    %314 = arith.addf %308, %313 : vector<1x256xf32>
    %315 = vector.broadcast %39 : f32 to vector<1x256xf32>
    %316 = arith.mulf %315, %114 : vector<1x256xf32>
    %317 = arith.addf %311, %316 : vector<1x256xf32>
    %318 = vector.broadcast %88 : f32 to vector<1x256xf32>
    %319 = arith.mulf %318, %121 : vector<1x256xf32>
    %320 = arith.addf %314, %319 : vector<1x256xf32>
    %321 = vector.broadcast %46 : f32 to vector<1x256xf32>
    %322 = arith.mulf %321, %115 : vector<1x256xf32>
    %323 = arith.addf %317, %322 : vector<1x256xf32>
    %324 = vector.broadcast %95 : f32 to vector<1x256xf32>
    %325 = arith.mulf %324, %122 : vector<1x256xf32>
    %326 = arith.addf %320, %325 : vector<1x256xf32>
    %327 = arith.addf %323, %326 : vector<1x256xf32>
    %328 = vector.broadcast %5 : f32 to vector<1x256xf32>
    %329 = arith.mulf %328, %109 : vector<1x256xf32>
    %330 = vector.broadcast %54 : f32 to vector<1x256xf32>
    %331 = arith.mulf %330, %116 : vector<1x256xf32>
    %332 = vector.broadcast %12 : f32 to vector<1x256xf32>
    %333 = arith.mulf %332, %110 : vector<1x256xf32>
    %334 = arith.addf %329, %333 : vector<1x256xf32>
    %335 = vector.broadcast %61 : f32 to vector<1x256xf32>
    %336 = arith.mulf %335, %117 : vector<1x256xf32>
    %337 = arith.addf %331, %336 : vector<1x256xf32>
    %338 = vector.broadcast %19 : f32 to vector<1x256xf32>
    %339 = arith.mulf %338, %111 : vector<1x256xf32>
    %340 = arith.addf %334, %339 : vector<1x256xf32>
    %341 = vector.broadcast %68 : f32 to vector<1x256xf32>
    %342 = arith.mulf %341, %118 : vector<1x256xf32>
    %343 = arith.addf %337, %342 : vector<1x256xf32>
    %344 = vector.broadcast %26 : f32 to vector<1x256xf32>
    %345 = arith.mulf %344, %112 : vector<1x256xf32>
    %346 = arith.addf %340, %345 : vector<1x256xf32>
    %347 = vector.broadcast %75 : f32 to vector<1x256xf32>
    %348 = arith.mulf %347, %119 : vector<1x256xf32>
    %349 = arith.addf %343, %348 : vector<1x256xf32>
    %350 = vector.broadcast %33 : f32 to vector<1x256xf32>
    %351 = arith.mulf %350, %113 : vector<1x256xf32>
    %352 = arith.addf %346, %351 : vector<1x256xf32>
    %353 = vector.broadcast %82 : f32 to vector<1x256xf32>
    %354 = arith.mulf %353, %120 : vector<1x256xf32>
    %355 = arith.addf %349, %354 : vector<1x256xf32>
    %356 = vector.broadcast %40 : f32 to vector<1x256xf32>
    %357 = arith.mulf %356, %114 : vector<1x256xf32>
    %358 = arith.addf %352, %357 : vector<1x256xf32>
    %359 = vector.broadcast %89 : f32 to vector<1x256xf32>
    %360 = arith.mulf %359, %121 : vector<1x256xf32>
    %361 = arith.addf %355, %360 : vector<1x256xf32>
    %362 = vector.broadcast %47 : f32 to vector<1x256xf32>
    %363 = arith.mulf %362, %115 : vector<1x256xf32>
    %364 = arith.addf %358, %363 : vector<1x256xf32>
    %365 = vector.broadcast %96 : f32 to vector<1x256xf32>
    %366 = arith.mulf %365, %122 : vector<1x256xf32>
    %367 = arith.addf %361, %366 : vector<1x256xf32>
    %368 = arith.addf %364, %367 : vector<1x256xf32>
    %369 = vector.broadcast %6 : f32 to vector<1x256xf32>
    %370 = arith.mulf %369, %109 : vector<1x256xf32>
    %371 = vector.broadcast %55 : f32 to vector<1x256xf32>
    %372 = arith.mulf %371, %116 : vector<1x256xf32>
    %373 = vector.broadcast %13 : f32 to vector<1x256xf32>
    %374 = arith.mulf %373, %110 : vector<1x256xf32>
    %375 = arith.addf %370, %374 : vector<1x256xf32>
    %376 = vector.broadcast %62 : f32 to vector<1x256xf32>
    %377 = arith.mulf %376, %117 : vector<1x256xf32>
    %378 = arith.addf %372, %377 : vector<1x256xf32>
    %379 = vector.broadcast %20 : f32 to vector<1x256xf32>
    %380 = arith.mulf %379, %111 : vector<1x256xf32>
    %381 = arith.addf %375, %380 : vector<1x256xf32>
    %382 = vector.broadcast %69 : f32 to vector<1x256xf32>
    %383 = arith.mulf %382, %118 : vector<1x256xf32>
    %384 = arith.addf %378, %383 : vector<1x256xf32>
    %385 = vector.broadcast %27 : f32 to vector<1x256xf32>
    %386 = arith.mulf %385, %112 : vector<1x256xf32>
    %387 = arith.addf %381, %386 : vector<1x256xf32>
    %388 = vector.broadcast %76 : f32 to vector<1x256xf32>
    %389 = arith.mulf %388, %119 : vector<1x256xf32>
    %390 = arith.addf %384, %389 : vector<1x256xf32>
    %391 = vector.broadcast %34 : f32 to vector<1x256xf32>
    %392 = arith.mulf %391, %113 : vector<1x256xf32>
    %393 = arith.addf %387, %392 : vector<1x256xf32>
    %394 = vector.broadcast %83 : f32 to vector<1x256xf32>
    %395 = arith.mulf %394, %120 : vector<1x256xf32>
    %396 = arith.addf %390, %395 : vector<1x256xf32>
    %397 = vector.broadcast %41 : f32 to vector<1x256xf32>
    %398 = arith.mulf %397, %114 : vector<1x256xf32>
    %399 = arith.addf %393, %398 : vector<1x256xf32>
    %400 = vector.broadcast %90 : f32 to vector<1x256xf32>
    %401 = arith.mulf %400, %121 : vector<1x256xf32>
    %402 = arith.addf %396, %401 : vector<1x256xf32>
    %403 = vector.broadcast %48 : f32 to vector<1x256xf32>
    %404 = arith.mulf %403, %115 : vector<1x256xf32>
    %405 = arith.addf %399, %404 : vector<1x256xf32>
    %406 = vector.broadcast %97 : f32 to vector<1x256xf32>
    %407 = arith.mulf %406, %122 : vector<1x256xf32>
    %408 = arith.addf %402, %407 : vector<1x256xf32>
    %409 = arith.addf %405, %408 : vector<1x256xf32>
    %cst_10 = arith.constant 0.000000e+00 : f32
    %410 = vector.broadcast %cst_10 : f32 to vector<1x3xf32>
    %411 = tpu.concatenate %410, %163, %410 in 1 : vector<1x3xf32>, vector<1x256xf32>, vector<1x3xf32> -> vector<1x262xf32>
    %412 = vector.extract_strided_slice %411 {offsets = [0, 0], sizes = [1, 256], strides = [1, 1]} : vector<1x262xf32> to vector<1x256xf32>
    %413 = vector.extract_strided_slice %100 {offsets = [0, 0], sizes = [1, 256], strides = [1, 1]} : vector<7x256xf32> to vector<1x256xf32>
    %414 = arith.mulf %412, %413 : vector<1x256xf32>
    %415 = tpu.concatenate %410, %204, %410 in 1 : vector<1x3xf32>, vector<1x256xf32>, vector<1x3xf32> -> vector<1x262xf32>
    %416 = vector.extract_strided_slice %415 {offsets = [0, 1], sizes = [1, 256], strides = [1, 1]} : vector<1x262xf32> to vector<1x256xf32>
    %417 = vector.extract_strided_slice %100 {offsets = [1, 0], sizes = [1, 256], strides = [1, 1]} : vector<7x256xf32> to vector<1x256xf32>
    %418 = arith.mulf %416, %417 : vector<1x256xf32>
    %419 = tpu.concatenate %410, %245, %410 in 1 : vector<1x3xf32>, vector<1x256xf32>, vector<1x3xf32> -> vector<1x262xf32>
    %420 = vector.extract_strided_slice %419 {offsets = [0, 2], sizes = [1, 256], strides = [1, 1]} : vector<1x262xf32> to vector<1x256xf32>
    %421 = vector.extract_strided_slice %100 {offsets = [2, 0], sizes = [1, 256], strides = [1, 1]} : vector<7x256xf32> to vector<1x256xf32>
    %422 = arith.mulf %420, %421 : vector<1x256xf32>
    %423 = tpu.concatenate %410, %327, %410 in 1 : vector<1x3xf32>, vector<1x256xf32>, vector<1x3xf32> -> vector<1x262xf32>
    %424 = vector.extract_strided_slice %423 {offsets = [0, 4], sizes = [1, 256], strides = [1, 1]} : vector<1x262xf32> to vector<1x256xf32>
    %425 = vector.extract_strided_slice %100 {offsets = [4, 0], sizes = [1, 256], strides = [1, 1]} : vector<7x256xf32> to vector<1x256xf32>
    %426 = arith.mulf %424, %425 : vector<1x256xf32>
    %427 = tpu.concatenate %410, %368, %410 in 1 : vector<1x3xf32>, vector<1x256xf32>, vector<1x3xf32> -> vector<1x262xf32>
    %428 = vector.extract_strided_slice %427 {offsets = [0, 5], sizes = [1, 256], strides = [1, 1]} : vector<1x262xf32> to vector<1x256xf32>
    %429 = vector.extract_strided_slice %100 {offsets = [5, 0], sizes = [1, 256], strides = [1, 1]} : vector<7x256xf32> to vector<1x256xf32>
    %430 = arith.mulf %428, %429 : vector<1x256xf32>
    %431 = tpu.concatenate %410, %409, %410 in 1 : vector<1x3xf32>, vector<1x256xf32>, vector<1x3xf32> -> vector<1x262xf32>
    %432 = vector.extract_strided_slice %431 {offsets = [0, 6], sizes = [1, 256], strides = [1, 1]} : vector<1x262xf32> to vector<1x256xf32>
    %433 = vector.extract_strided_slice %100 {offsets = [6, 0], sizes = [1, 256], strides = [1, 1]} : vector<7x256xf32> to vector<1x256xf32>
    %434 = arith.mulf %432, %433 : vector<1x256xf32>
    %435 = arith.addf %414, %418 : vector<1x256xf32>
    %436 = arith.addf %422, %286 : vector<1x256xf32>
    %437 = arith.addf %426, %430 : vector<1x256xf32>
    %438 = arith.addf %435, %436 : vector<1x256xf32>
    %439 = arith.addf %437, %434 : vector<1x256xf32>
    %440 = arith.addf %438, %439 : vector<1x256xf32>
    %441 = vector.broadcast %98 : f32 to vector<1x256xf32>
    %442 = arith.mulf %441, %440 : vector<1x256xf32>
    %443 = vector.broadcast %99 : f32 to vector<1x256xf32>
    %444 = arith.addf %442, %443 : vector<1x256xf32>
    %445 = arith.negf %444 : vector<1x256xf32>
    %446 = math.exp %445 : vector<1x256xf32>
    %cst_11 = arith.constant 1.000000e+00 : f32
    %447 = vector.broadcast %cst_11 : f32 to vector<1x256xf32>
    %448 = arith.addf %447, %446 : vector<1x256xf32>
    %449 = arith.divf %447, %448 : vector<1x256xf32>
    %450 = vector.shape_cast %449 : vector<1x256xf32> to vector<1x1x256xf32>
    %451 = vector.broadcast %450 : vector<1x1x256xf32> to vector<1x4x256xf32>
    %452 = arith.mulf %101, %451 : vector<1x4x256xf32>
    %c0_12 = arith.constant 0 : index
    %c0_13 = arith.constant 0 : index
    %c0_14 = arith.constant 0 : index
    %453 = vector.load %arg5[%c0_12, %c0_13, %c0_14] : memref<1x4x256xf32, #tpu.memory_space<vmem>>, vector<1x4x256xf32>
    tpu.vector_store %arg5[%c0_12, %c0_13, %c0_14], %452 {strides = array<i32>} : memref<1x4x256xf32, #tpu.memory_space<vmem>>, vector<1x4x256xf32>,
    return
  }
  func.func @transform_0(%arg0: i32) -> i32 {
    %c0_i32 = arith.constant 0 : i32
    %c0_i32_0 = arith.constant 0 : i32
    return %c0_i32 : i32
  }
  func.func @transform_1(%arg0: i32) -> i32 {
    %c0_i32 = arith.constant 0 : i32
    %c0_i32_0 = arith.constant 0 : i32
    return %c0_i32 : i32
  }
  func.func @transform_2(%arg0: i32) -> (i32, i32) {
    %c0_i32 = arith.constant 0 : i32
    %c0_i32_0 = arith.constant 0 : i32
    %c0_i32_1 = arith.constant 0 : i32
    return %c0_i32, %c0_i32_0 : i32, i32
  }
  func.func @transform_3(%arg0: i32) -> (i32, i32, i32) {
    %c0_i32 = arith.constant 0 : i32
    %c0_i32_0 = arith.constant 0 : i32
    %c0_i32_1 = arith.constant 0 : i32
    return %arg0, %c0_i32, %c0_i32_0 : i32, i32, i32
  }
  func.func @transform_4(%arg0: i32) -> (i32, i32, i32) {
    %c0_i32 = arith.constant 0 : i32
    %c0_i32_0 = arith.constant 0 : i32
    %c0_i32_1 = arith.constant 0 : i32
    return %arg0, %c0_i32, %c0_i32_0 : i32, i32, i32
  }
}

</mosaic_0001>

<bundles_post_ra>
// kernel: tpu_custom_call.1
= control target key start
LH: loop header
LB: loop body
LE: loop exit
PB: predicated region body
PF: predicated region fallthrough
CT: control target
= control target key end

     0   :  { %9 = vsyncpa [#allocation5], 0  ;;  %s4857_s0 = inlined_call_operand.hbm [shape: f32[98], index: 0, kind: input, shape index: {}]   ;;  %s4858_s1 = inlined_call_operand.vmem [shape: f32[2], index: 1, kind: input, shape index: {}]   ;;  %s4859_s2 = inlined_call_operand.hbm [shape: f32[7,256], index: 2, kind: input, shape index: {}]   ;;  %s4860_s3 = inlined_call_operand.hbm [shape: f32[2,4,256], index: 3, kind: input, shape index: {}]   ;;  %s4861_s4 = inlined_call_operand.hbm [shape: f32[2,4,256], index: 4, kind: output, shape index: {}]  }
   0x1   :  { %10 = vsyncpa [#allocation6], 0 }
   0x2   :  { %11 = vsyncpa [#allocation3], 0 }
   0x3   :  { %12 = vsyncpa [#allocation10], 0 }
   0x4   :  { %14 = vsyncpa [#allocation10 + $0x1], 0 }
   0x5   :  { %15 = vsyncpa [#allocation4], 0 }
   0x6   :  { %17 = vsyncpa [#allocation4 + $0x1], 0  ;;  %s2901_s15 = smov 0   ;;  %s2903_s16 = smov 0  }
   0x7   :  { %s2905_s17 = smov 0   ;;  %s2907_s18 = smov 0  }
   0x8 LB: > { %s2922_s19 = sadd.s32 4294967295, %s2854_s18   ;;  %s2464_s20 = sadd.s32 4294967294, %s2854_s18   ;;  %s2854_s18 = sphi %s2907_s18, %s5256_s18   ;;  %s2850_s17 = sphi %s2905_s17, %s5255_s17   ;;  %s2846_s16 = sphi %s2903_s16, %s5254_s16   ;;  %s2842_s15 = sphi %s2901_s15, %s5253_s15  }
   0x9   : > { %p106_p0 = scmp.ne.s32.totalorder %s2846_s16, %s2842_s15  ;;  %p4862_p1 = scmp.eq.s32.totalorder %s2922_s19, 0 }
   0xa   : > { %p136_p3 = scmp.eq.s32.totalorder %s2464_s20, 1  ;;  %p2465_p5 = scmp.ge.s32.totalorder %s2854_s18, 1 }
   0xb   : > { %p2931_p4 = por %p4862_p1, %p106_p0  ;;  %p143_p7 = scmp.lt.s32.totalorder %s2854_s18, 3 }
   0xc   : > { %p2936_p6 = por %p136_p3, %p106_p0  ;;  %s165_s26 = sshll.u32 %s4858_s1, 4  ;;  %s166_s26 = int_to_ptr.vmem [resolvable:$true] %s165_s26 }
   0xd   : > { %s4916_s21 = scalar_select %p2931_p4, 1, 0 }
   0xe   : > { %s4917_s22 = scalar_select %p2936_p6, 1, 0 }
   0xf   : > { %p2941_p8 = pnand %p2465_p5, %p143_p7  ;;  %s2856_s28 = smov [#allocation8]  }
  0x10   : > { %s176_s29 = sshll.u32 %s2856_s28, 4  ;;  %s2960_s30 = sadd.s32 1, %s2854_s18   ;;  %s2957_s29 = int_to_ptr.vmem [resolvable:$true] %s176_s29 }
  0x11   : > { %p2602_p10 = pneg %p2941_p8  ;;  %s2690_s7 = scalar_lea.hbm %s4857_s0, 16 }
  0x12   : > { %p2691_p12 = scmp.ne.s32.totalorder %s4857_s0, %s2690_s7  ;;  %p2697_p5 = scmp.lt.u32.totalorder %s2690_s7, %s4857_s0 }
  0x13   : > { %p2953_p11 = pnand %p2602_p10, %p4862_p1 }
  0x15   : > { %p2692_p13 = pneg %p2953_p11 }
  0x17   : > { %p2693_p0 = pnand %p2692_p13, %p2691_p12 }
  0x19   : > { %p2694_p3 = pneg %p2693_p0 }
  0x1b   : > { %p2699_p7 = pnand %p2697_p5, %p2694_p3 }
  0x1d   : > { %2702 = shalt.err (!%p2699_p7)
}
  0x1e   : > { %s2857_s12 = smov [#allocation2]   ;;  %s2703_s20 = scalar_lea.vmem %s166_s26, 16 }
  0x1f   : > { %2605 = dma.hbm_to_smem (!%p2953_p11), %s4857_s0, 16, %s2857_s12, [#allocation5]  }
  0x20   : > { %p2704_p10 = scmp.ne.s32.totalorder %s166_s26, %s2703_s20  ;;  %p2711_p9 = scmp.lt.s32.totalorder %s166_s26, %s166_s26 }
  0x21   : > { %p2712_p1 = scmp.lt.s32.totalorder %s2703_s20, %s2703_s20 }
  0x22   : > { %p2706_p12 = pnand %p2704_p10, %p2692_p13 }
  0x23   : > { %p2713_p2 = por %p2712_p1, %p2711_p9 }
  0x24   : > { %p2707_p0 = pneg %p2706_p12 }
  0x26   : > { %p2714_p6 = pnand %p2713_p2, %p2707_p0 }
  0x28   : > { %2717 = shalt.err (!%p2714_p6)
}
  0x29   : > { %s2858_s24 = smov [#allocation7]   ;;  %s2718_s5 = scalar_lea.hbm %s4859_s2, 256 }
  0x2a   : > { %2608 = dma.vmem_to_smem (!%p2953_p11), %s166_s26, 16, %s2858_s24, [#allocation6]  }
  0x2b   : > { %p2719_p3 = scmp.ne.s32.totalorder %s4859_s2, %s2718_s5  ;;  %p2725_p1 = scmp.lt.u32.totalorder %s2718_s5, %s4859_s2 }
  0x2d   : > { %p2721_p5 = pnand %p2719_p3, %p2692_p13 }
  0x2f   : > { %p2722_p7 = pneg %p2721_p5 }
  0x31   : > { %p2727_p2 = pnand %p2725_p1, %p2722_p7 }
  0x33   : > { %2730 = shalt.err (!%p2727_p2)
}
  0x34   : > { %s2731_s26 = scalar_lea.vmem %s2957_s29, 256  ;;  %p2739_p12 = scmp.lt.s32.totalorder %s2957_s29, %s2957_s29 }
  0x35   : > { %p2732_p6 = scmp.ne.s32.totalorder %s2957_s29, %s2731_s26  ;;  %p2740_p0 = scmp.lt.s32.totalorder %s2731_s26, %s2731_s26 }
  0x37   : > { %p2734_p9 = pnand %p2732_p6, %p2692_p13  ;;  %p2741_p3 = por %p2740_p0, %p2739_p12 }
  0x39   : > { %p2735_p10 = pneg %p2734_p9 }
  0x3b   : > { %p2742_p5 = pnand %p2741_p3, %p2735_p10 }
  0x3d   : > { %2745 = shalt.err (!%p2742_p5)
}
  0x3e   : > { %2611 = dma.hbm_to_vmem [thread:$0]  (!%p2953_p11), %s4859_s2, 256, %s2957_s29, [#allocation3]  }
  0x3f   : > { %s90_s12 = ssub.s32 %s2854_s18, %s2960_s30  ;;  %s93_s13 = sadd.s32 1, %s2850_s17 }
  0x40   : > { %p91_p13 = scmp.eq.s32.totalorder %s90_s12, 0  ;;  %p100_p7 = scmp.ne.s32.totalorder %s2850_s17, %s2846_s16 }
  0x41   : > { %p101_p1 = scmp.eq.s32.totalorder %s2854_s18, 0  ;;  %p2623_p2 = scmp.lt.s32.totalorder %s2854_s18, 2 }
  0x42   : > { %s3019_s27 = scalar_select %p91_p13, %s2850_s17, %s93_s13  }
  0x43   : > { %p102_p6 = por %p101_p1, %p100_p7  ;;  %p4920_p9 = scmp.eq.s32.totalorder %s2922_s19, 1 }
  0x44   : > { %s187_s20 = sand.u32 1, %s2850_s17   ;;  %s2584_s24 = sshll.u32 %s2854_s18, 7 }
  0x45   : > { %p3023_p10 = por %p4920_p9, %p100_p7  ;;  %s2470_s25 = sshll.u32 %s187_s20, 3 }
  0x46   : > { %s3032_s29 = scalar_lea.hbm %s4860_s3, %s2584_s24  ;;  %s191_s6 = scalar_lea.vmem [#allocation9], %s2470_s25 }
  0x47   : > { %s4921_s14 = scalar_select %p3023_p10, 1, 0 }
  0x48   : > { %s199_s7 = sshll.u32 %s191_s6, 4  ;;  %p3034_p11 = pnand %p2623_p2, %p102_p6  ;;  %s3038_s7 = int_to_ptr.vmem [resolvable:$true] %s199_s7 }
  0x49   : > { %s188_s9 = scalar_lea.sflag [#allocation10], %s187_s20  ;;  %s2746_s26 = scalar_lea.hbm %s3032_s29, 128 }
  0x4a   : > { %p2747_p12 = scmp.ne.s32.totalorder %s3032_s29, %s2746_s26  ;;  %p2748_p0 = pneg %p3034_p11 }
  0x4b   : > { %s2751_s12 = scalar_lea.hbm %s4860_s3, 256  ;;  %p2752_p13 = scmp.lt.u32.totalorder %s3032_s29, %s4860_s3 }
  0x4c   : > { %p2749_p3 = pnand %p2748_p0, %p2747_p12  ;;  %p2753_p7 = scmp.lt.u32.totalorder %s2751_s12, %s2746_s26 }
  0x4d   : > { %p2755_p2 = scmp.lt.u32.totalorder %s2746_s26, %s3032_s29 }
  0x4e   : > { %p2750_p5 = pneg %p2749_p3  ;;  %p2754_p1 = por %p2753_p7, %p2752_p13 }
  0x50   : > { %p2756_p6 = por %p2755_p2, %p2754_p1 }
  0x52   : > { %p2757_p9 = pnand %p2756_p6, %p2750_p5 }
  0x54   : > { %2760 = shalt.err (!%p2757_p9)
}
  0x55   : > { %s2761_s20 = scalar_lea.vmem %s3038_s7, 128  ;;  %s2859_s25 = smov [#allocation9]  }
  0x56   : > { %p2762_p12 = scmp.ne.s32.totalorder %s3038_s7, %s2761_s20  ;;  %s2766_s28 = sshll.u32 %s2859_s25, 4  ;;  %s2767_s28 = int_to_ptr.vmem [resolvable:$false] %s2766_s28 }
  0x57   : > { %s2768_s5 = scalar_lea.vmem %s2767_s28, 256  ;;  %p2769_p4 = scmp.lt.s32.totalorder %s3038_s7, %s2767_s28 }
  0x58   : > { %p2764_p3 = pnand %p2762_p12, %p2748_p0  ;;  %p2770_p13 = scmp.lt.s32.totalorder %s2768_s5, %s2761_s20 }
  0x5a   : > { %p2765_p10 = pneg %p2764_p3  ;;  %p2771_p7 = por %p2770_p13, %p2769_p4 }
  0x5c   : > { %p2772_p1 = pnand %p2771_p7, %p2765_p10 }
  0x5e   : > { %2775 = shalt.err (!%p2772_p1)
}
  0x5f   : > { %2615 = dma.hbm_to_vmem [thread:$0]  (!%p3034_p11), %s3032_s29, 128, %s3038_s7, %s188_s9  }
  0x60   : > { %208 = sbr.rel (%p2941_p8) target bundleno = 1214 (0x4be), region = 36 }
  0x67   : > { %p4923_p0 = scmp.eq.s32.totalorder %s2922_s19, 0 }
  0x69   : > { %2821 = dma.done.wait (%p4923_p0), [#allocation5], 16   ;;  %p4924_p5 = pmov %p4923_p0 }
  0x6a   : > { %p4925_p2 = pmov %p4923_p0 }
  0x6b   : > { %2823 = vsyncadd (%p4924_p5), [#allocation5], 4294967280 }
  0x6c   : > { %2825 = dma.done.wait (%p4925_p2), [#allocation6], 16   ;;  %p4926_p4 = pmov %p4923_p0 }
  0x6d   : > { %p4927_p10 = pmov %p4923_p0 }
  0x6e   : > { %2827 = vsyncadd (%p4926_p4), [#allocation6], 4294967280 }
  0x6f   : > { %2829 = dma.done.wait (%p4927_p10), [#allocation3], 256   ;;  %p4928_p11 = pmov %p4923_p0 }
  0x70   : > { %s3080_s23 = sand.u32 1, %s2846_s16   ;;  %p4929_p8 = scmp.ne.s32.totalorder %s4916_s21, 0 }
  0x71   : > { %2831 = vsyncadd (%p4928_p11), [#allocation3], 4294967040  ;;  %s2477_s29 = sshll.u32 %s3080_s23, 3  ;;  %s223_s6 = scalar_lea.sflag [#allocation10], %s3080_s23 }
  0x72   : > { %s3086_s7 = scalar_lea.vmem [#allocation9], %s2477_s29 }
  0x73   : > { %2833 = dma.done.wait (%p4929_p8), %s223_s6, 128  }
  0x74   : > { %2835 = vsyncadd (%p4929_p8), %s223_s6, 4294967168 }
  0x75   : > { %231 = sfence }
  0x76   : > { %v354_v0 = vld [vmem:[%s3086_s7] sm:$0xff]  ;;  %vm358_vm0 = vcmask 1043456   ;;  %s2860_s21 = smov 48   ;;  %s2485_s8 = sld [smem:[#allocation2 + $0x7]]  ;;  %vm395_vm1 = vcmask 392192   ;;  %vm433_vm2 = vcmask 916480  }
  0x77   : > { %v359_v1 = vsel %vm358_vm0, %v354_v0, -inf  ;;  %v373_v2 = vsel %vm358_vm0, %v354_v0, 0.0  ;;  %v356_v3 = vcombine.high %v354_v0, %v354_v0  ;;  %s2492_s9 = sld [smem:[#allocation2 + $0xe]]  ;;  %s2534_s26 = sld [smem:[#allocation2 + $0x38]]  ;;  %vm472_vm3 = vcmask 785408  }
  0x78   : > { %v360_v4 = vrot.slane %v359_v1, 4  ;;  %v374_v5 = vrot.slane %v373_v2, 4  ;;  %s2499_s10 = sld [smem:[#allocation2 + $0x15]]  ;;  %s2506_s11 = sld [smem:[#allocation2 + $0x1c]]  ;;  %vm511_vm4 = vcmask 654336   ;;  %vm550_vm5 = vcmask 523264  }
  0x79   : > { %v366_v6 = vsel %vm358_vm0, %v356_v3, -inf  ;;  %v380_v7 = vsel %vm358_vm0, %v356_v3, 0.0  ;;  %s2861_s12 = smov 112   ;;  %s2541_s13 = sld [smem:[#allocation2 + $0x3f]]  ;;  %vm627_vm6 = vcmask 261120   ;;  %vm2077_vm7 = vcmask 23552  }
  0x7a   : > { %v361_v8 = vmax.f32 %v359_v1, %v360_v4  ;;  %v375_v9 = vadd.f32 %v374_v5, %v373_v2  ;;  %v367_v10 = vrot.slane %v366_v6, 4  ;;  %v381_v11 = vrot.slane %v380_v7, 4  ;;  %s2513_s24 = sld [smem:[#allocation2 + $0x23]]  ;;  %s2862_s20 = smov 96  }
  0x7b   : > { %s2520_s25 = sld [smem:[#allocation2 + $0x2a]]  ;;  %s2863_s28 = smov 80   ;;  %vm2182_vm8 = vcmask 39936   ;;  %vm2208_vm9 = vcmask 48128   ;;  %vm2104_vm10 = vcmask 7168   ;;  %vm2130_vm11 = vcmask 15360  }
  0x7c   : > { %v362_v12 = vrot.slane %v361_v8, 2  ;;  %v376_v13 = vrot.slane %v375_v9, 2  ;;  %v368_v14 = vmax.f32 %v366_v6, %v367_v10  ;;  %v382_v15 = vadd.f32 %v381_v11, %v380_v7  ;;  %s2548_s5 = sld [smem:[#allocation2 + $0x46]]  ;;  %s2486_s6 = sld [smem:[#allocation2 + $0x8]] }
  0x7d   : > { %v3097_v32 = vstv %s2485_s8  ;;  %v3104_v36 = vstv %s2492_s9  ;;  %v3119_v41 = vstv %s2534_s26  ;;  %s2864_s8 = smov 64   ;;  %s2493_s9 = sld [smem:[#allocation2 + $0xf]]  ;;  %vm2156_vm12 = vcmask 31744  }
  0x7e   : > { %v363_v16 = vmax.f32 %v361_v8, %v362_v12  ;;  %v377_v17 = vadd.f32 %v376_v13, %v375_v9  ;;  %v369_v18 = vrot.slane %v368_v14, 2  ;;  %v383_v19 = vrot.slane %v382_v15, 2  ;;  %s2555_s26 = sld [smem:[#allocation2 + $0x4d]]  ;;  %p5250_p9 = scmp.ne.s32.totalorder %s4921_s14, 0 }
  0x7f   : > { %v3125_v44 = vstv %s2499_s10  ;;  %v3133_v47 = vstv %s2506_s11  ;;  %v3141_v50 = vstv %s2541_s13  ;;  %s2500_s10 = sld [smem:[#allocation2 + $0x16]]  ;;  %s2865_s11 = smov 32   ;;  %vm2225_vm13 = vcmask 1039360  }
  0x80   : > { %v364_v20 = vrot.slane %v363_v16, 1  ;;  %v378_v21 = vrot.slane %v377_v17, 1  ;;  %v370_v22 = vmax.f32 %v368_v14, %v369_v18  ;;  %v384_v23 = vadd.f32 %v383_v19, %v382_v15  ;;  %s2507_s13 = sld [smem:[#allocation2 + $0x1d]] }
  0x81   : > { %v3143_v51 = vstv %s2513_s24  ;;  %v3151_v54 = vstv %s2520_s25  ;;  %s2562_s24 = sld [smem:[#allocation2 + $0x54]]  ;;  %vm2271_vm14 = vcmask 1031168   ;;  %vm2304_vm15 = vcmask 1014784  }
  0x82   : > { %v365_v24 = vmax.f32 %v363_v16, %v364_v20  ;;  %v379_v25 = vadd.f32 %v378_v21, %v377_v17  ;;  %v371_v26 = vrot.slane %v370_v22, 1  ;;  %v385_v27 = vrot.slane %v384_v23, 1  ;;  %s2514_s25 = sld [smem:[#allocation2 + $0x24]] }
  0x83   : > { %v3159_v57 = vstv %s2548_s5  ;;  %v3161_v58 = vstv %s2486_s6  ;;  %v3169_v61 = vstv %s2493_s9  ;;  %s2569_s5 = sld [smem:[#allocation2 + $0x5b]]  ;;  %s2535_s6 = sld [smem:[#allocation2 + $0x39]] }
  0x84   : > { %391 = vrot.lane.b32.xlu0 %v365_v24, %s2860_s21  ;;  %v387_v28 = vmul.f32 0.25, %v379_v25  ;;  %v372_v29 = vmax.f32 %v370_v22, %v371_v26  ;;  %v386_v30 = vadd.f32 %v385_v27, %v384_v23  ;;  %v3177_v0 = vstv %s2555_s26  ;;  %s2542_s9 = sld [smem:[#allocation2 + $0x40]]  ;;  %s2549_s26 = sld [smem:[#allocation2 + $0x47]] }
  0x85   : > { %v3179_v1 = vstv %s2500_s10  ;;  %s2556_s10 = sld [smem:[#allocation2 + $0x4e]] }
  0x86   : > { %404 = vrot.lane.b32.xlu1 %v387_v28, %s2860_s21  ;;  %v388_v31 = vmul.f32 0.25, %v386_v30  ;;  %v775_v4 = vstv %s2507_s13  ;;  %s2563_s13 = sld [smem:[#allocation2 + $0x55]] }
  0x87   : > { %v3192_v7 = vstv %s2562_s24  ;;  %s2521_s24 = sld [smem:[#allocation2 + $0x2b]] }
  0x88   : > { %393 = vrot.lane.b32.xlu0 %v372_v29, %s2860_s21  ;;  %v813_v8 = vstv %s2514_s25  ;;  %s2570_s25 = sld [smem:[#allocation2 + $0x5c]] }
  0x89   : > { %v3209_v14 = vstv %s2569_s5  ;;  %v3223_v19 = vstv %s2535_s6  ;;  %s2487_s5 = sld [smem:[#allocation2 + $0x9]]  ;;  %s2536_s6 = sld [smem:[#allocation2 + $0x3a]] }
  0x8a   : > { %406 = vrot.lane.b32.xlu1 %v388_v31, %s2860_s21  ;;  %v3237_v24 = vstv %s2542_s9  ;;  %v3251_v29 = vstv %s2549_s26  ;;  %s2494_s9 = sld [smem:[#allocation2 + $0x10]]  ;;  %s2543_s26 = sld [smem:[#allocation2 + $0x41]] }
  0xf6   : > { %v392_v33 = vpop.permute.xlu0 %391 }
  0xf7   : > { %v3100_v34 = vsel %vm395_vm1, 0.0, %v392_v33 }
  0xf8   : > { %v421_v35 = vmul.f32 %v3097_v32, %v3100_v34  ;;  %v3106_v37 = vpop.permute.xlu1 %404  ;;  %v460_v43 = vmul.f32 %v3104_v36, %v3100_v34  ;;  %v499_v46 = vmul.f32 %v3125_v44, %v3100_v34  ;;  %v538_v49 = vmul.f32 %v3133_v47, %v3100_v34 }
  0xf9   : > { %v3113_v39 = vsel %vm395_vm1, 0.0, %v3106_v37  ;;  %v577_v53 = vmul.f32 %v3143_v51, %v3100_v34  ;;  %v615_v56 = vmul.f32 %v3151_v54, %v3100_v34  ;;  %v662_v60 = vmul.f32 %v3161_v58, %v3100_v34 }
  0xfa   : > { %v3108_v38 = vpop.permute.xlu0 %393  ;;  %427 = vrot.lane.b32.xlu0 %v421_v35, %s2861_s12  ;;  %v441_v45 = vmul.f32 %v3119_v41, %v3113_v39  ;;  %v480_v52 = vmul.f32 %v3141_v50, %v3113_v39  ;;  %v519_v59 = vmul.f32 %v3159_v57, %v3113_v39  ;;  %v700_v63 = vmul.f32 %v3169_v61, %v3100_v34 }
  0xfb   : > { %v3117_v40 = vsel %vm395_vm1, %v392_v33, %v3108_v38  ;;  %v558_v2 = vmul.f32 %v3177_v0, %v3113_v39  ;;  %v738_v3 = vmul.f32 %v3179_v1, %v3100_v34  ;;  %v776_v6 = vmul.f32 %v775_v4, %v3100_v34 }
  0xfc   : > { %v422_v42 = vmul.f32 %v3097_v32, %v3117_v40  ;;  %v461_v48 = vmul.f32 %v3104_v36, %v3117_v40  ;;  %v500_v55 = vmul.f32 %v3125_v44, %v3117_v40  ;;  %v539_v62 = vmul.f32 %v3133_v47, %v3117_v40 }
  0xfd   : > { %v578_v5 = vmul.f32 %v3143_v51, %v3117_v40  ;;  %v596_v9 = vmul.f32 %v3192_v7, %v3113_v39  ;;  %v814_v10 = vmul.f32 %v813_v8, %v3100_v34  ;;  %v3201_v11 = vsel %vm395_vm1, %v3108_v38, 0.0 }
  0xfe   : > { %429 = vrot.lane.b32.xlu1 %v422_v42, %s2861_s12  ;;  %466 = vrot.lane.b32.xlu0 %v460_v43, %s2862_s20  ;;  %v616_v12 = vmul.f32 %v3151_v54, %v3117_v40  ;;  %v423_v13 = vmul.f32 %v3097_v32, %v3201_v11  ;;  %v635_v15 = vmul.f32 %v3209_v14, %v3113_v39  ;;  %v3264_v35 = vstv %s2556_s10  ;;  %v407_v42 = vpop.permute.xlu1 %406  ;;  %s2501_s10 = sld [smem:[#allocation2 + $0x17]] }
  0xff   : > { %v462_v16 = vmul.f32 %v3104_v36, %v3201_v11  ;;  %v663_v17 = vmul.f32 %v3161_v58, %v3117_v40  ;;  %v501_v18 = vmul.f32 %v3125_v44, %v3201_v11  ;;  %v681_v20 = vmul.f32 %v3223_v19, %v3113_v39 }
 0x100   : > { %v540_v21 = vmul.f32 %v3133_v47, %v3201_v11  ;;  %v701_v22 = vmul.f32 %v3169_v61, %v3117_v40  ;;  %v579_v23 = vmul.f32 %v3143_v51, %v3201_v11  ;;  %v719_v25 = vmul.f32 %v3237_v24, %v3113_v39 }
 0x101   : > { %v617_v26 = vmul.f32 %v3151_v54, %v3201_v11  ;;  %v739_v27 = vmul.f32 %v3179_v1, %v3117_v40  ;;  %v664_v28 = vmul.f32 %v3161_v58, %v3201_v11  ;;  %v757_v30 = vmul.f32 %v3251_v29, %v3113_v39 }
 0x102   : > { %447 = vrot.lane.b32.xlu1 %v441_v45, %s2861_s12  ;;  %505 = vrot.lane.b32.xlu0 %v499_v46, %s2863_s28  ;;  %v702_v31 = vmul.f32 %v3169_v61, %v3201_v11  ;;  %v777_v32 = vmul.f32 %v775_v4, %v3117_v40  ;;  %v740_v33 = vmul.f32 %v3179_v1, %v3201_v11  ;;  %v832_v46 = vstv %s2563_s13  ;;  %s2550_s13 = sld [smem:[#allocation2 + $0x48]] }
 0x103   : > { %v795_v36 = vmul.f32 %v3264_v35, %v3113_v39  ;;  %v778_v38 = vmul.f32 %v775_v4, %v3201_v11  ;;  %v815_v43 = vmul.f32 %v813_v8, %v3117_v40  ;;  %v816_v44 = vmul.f32 %v813_v8, %v3201_v11 }
 0x104   : > { %v3277_v45 = vsel %vm395_vm1, %v3106_v37, %v407_v42  ;;  %v3282_v47 = vsel %vm395_vm1, %v407_v42, 0.0 }
 0x105   : > { %v443_v37 = vmul.f32 %v3119_v41, %v3282_v47  ;;  %v481_v51 = vmul.f32 %v3141_v50, %v3277_v45  ;;  %v559_v54 = vmul.f32 %v3177_v0, %v3277_v45  ;;  %v637_v58 = vmul.f32 %v3209_v14, %v3282_v47 }
 0x106   : > { %468 = vrot.lane.b32.xlu1 %v461_v48, %s2862_s20  ;;  %544 = vrot.lane.b32.xlu0 %v538_v49, %s2864_s8  ;;  %v833_v48 = vmul.f32 %v832_v46, %v3113_v39  ;;  %v442_v49 = vmul.f32 %v3119_v41, %v3277_v45  ;;  %v521_v41 = vmul.f32 %v3159_v57, %v3282_v47 }
 0x107   : > { %v683_v61 = vmul.f32 %v3223_v19, %v3282_v47  ;;  %v721_v1 = vmul.f32 %v3237_v24, %v3282_v47 }
 0x10a   : > { %486 = vrot.lane.b32.xlu1 %v480_v52, %s2862_s20  ;;  %583 = vrot.lane.b32.xlu0 %v577_v53, %s2860_s21  ;;  %v482_v52 = vmul.f32 %v3141_v50, %v3282_v47  ;;  %v520_v53 = vmul.f32 %v3159_v57, %v3277_v45  ;;  %v560_v50 = vmul.f32 %v3177_v0, %v3282_v47 }
 0x10b   : > { %v636_v57 = vmul.f32 %v3209_v14, %v3277_v45 }
 0x10e   : > { %507 = vrot.lane.b32.xlu1 %v500_v55, %s2863_s28  ;;  %621 = vrot.lane.b32.xlu0 %v615_v56, %s2865_s11  ;;  %v597_v55 = vmul.f32 %v3192_v7, %v3277_v45  ;;  %v598_v56 = vmul.f32 %v3192_v7, %v3282_v47 }
 0x112   : > { %525 = vrot.lane.b32.xlu1 %v519_v59, %s2863_s28  ;;  %668 = vrot.lane.b32.xlu0 %v662_v60, %s2861_s12  ;;  %v682_v59 = vmul.f32 %v3223_v19, %v3277_v45 }
 0x116   : > { %546 = vrot.lane.b32.xlu1 %v539_v62, %s2864_s8  ;;  %706 = vrot.lane.b32.xlu0 %v700_v63, %s2862_s20  ;;  %v720_v62 = vmul.f32 %v3237_v24, %v3277_v45 }
 0x11a   : > { %564 = vrot.lane.b32.xlu1 %v558_v2, %s2864_s8  ;;  %744 = vrot.lane.b32.xlu0 %v738_v3, %s2863_s28  ;;  %v758_v2 = vmul.f32 %v3251_v29, %v3277_v45 }
 0x11e   : > { %585 = vrot.lane.b32.xlu1 %v578_v5, %s2860_s21  ;;  %782 = vrot.lane.b32.xlu0 %v776_v6, %s2864_s8  ;;  %v759_v5 = vmul.f32 %v3251_v29, %v3282_v47  ;;  %v796_v6 = vmul.f32 %v3264_v35, %v3277_v45 }
 0x122   : > { %602 = vrot.lane.b32.xlu1 %v596_v9, %s2860_s21  ;;  %820 = vrot.lane.b32.xlu0 %v814_v10, %s2860_s21  ;;  %v797_v9 = vmul.f32 %v3264_v35, %v3282_v47  ;;  %v834_v10 = vmul.f32 %v832_v46, %v3277_v45 }
 0x126   : > { %623 = vrot.lane.b32.xlu1 %v616_v12, %s2865_s11  ;;  %431 = vrot.lane.b32.xlu0 %v423_v13, %s2861_s12  ;;  %v851_v12 = vstv %s2521_s24  ;;  %s2508_s24 = sld [smem:[#allocation2 + $0x1e]] }
 0x127   : > { %v853_v19 = vmul.f32 %v851_v12, %v3117_v40 }
 0x12a   : > { %641 = vrot.lane.b32.xlu1 %v635_v15, %s2865_s11  ;;  %470 = vrot.lane.b32.xlu0 %v462_v16, %s2862_s20  ;;  %v835_v15 = vmul.f32 %v832_v46, %v3282_v47  ;;  %v852_v16 = vmul.f32 %v851_v12, %v3100_v34  ;;  %v935_v46 = vstv %s2494_s9  ;;  %s2522_s9 = sld [smem:[#allocation2 + $0x2c]] }
 0x12e   : > { %670 = vrot.lane.b32.xlu1 %v663_v17, %s2861_s12  ;;  %509 = vrot.lane.b32.xlu0 %v501_v18, %s2863_s28 }
 0x132   : > { %687 = vrot.lane.b32.xlu1 %v681_v20, %s2861_s12  ;;  %548 = vrot.lane.b32.xlu0 %v540_v21, %s2864_s8  ;;  %v854_v20 = vmul.f32 %v851_v12, %v3201_v11  ;;  %v870_v21 = vstv %s2570_s25  ;;  %v992_v12 = vstv %s2550_s13  ;;  %s2557_s25 = sld [smem:[#allocation2 + $0x4f]]  ;;  %s2537_s13 = sld [smem:[#allocation2 + $0x3b]] }
 0x133   : > { %v871_v24 = vmul.f32 %v870_v21, %v3113_v39  ;;  %v873_v29 = vmul.f32 %v870_v21, %v3282_v47 }
 0x136   : > { %708 = vrot.lane.b32.xlu1 %v701_v22, %s2862_s20  ;;  %587 = vrot.lane.b32.xlu0 %v579_v23, %s2860_s21 }
 0x13a   : > { %725 = vrot.lane.b32.xlu1 %v719_v25, %s2862_s20  ;;  %625 = vrot.lane.b32.xlu0 %v617_v26, %s2865_s11  ;;  %v872_v25 = vmul.f32 %v870_v21, %v3277_v45  ;;  %v897_v26 = vstv %s2487_s5  ;;  %v1011_v21 = vstv %s2508_s24  ;;  %s2515_s5 = sld [smem:[#allocation2 + $0x25]]  ;;  %s2495_s24 = sld [smem:[#allocation2 + $0x11]] }
 0x13b   : > { %v900_v35 = vmul.f32 %v897_v26, %v3201_v11 }
 0x13e   : > { %746 = vrot.lane.b32.xlu1 %v739_v27, %s2863_s28  ;;  %672 = vrot.lane.b32.xlu0 %v664_v28, %s2861_s12 }
 0x142   : > { %763 = vrot.lane.b32.xlu1 %v757_v30, %s2863_s28  ;;  %710 = vrot.lane.b32.xlu0 %v702_v31, %s2862_s20  ;;  %v898_v30 = vmul.f32 %v897_v26, %v3100_v34 }
 0x146   : > { %784 = vrot.lane.b32.xlu1 %v777_v32, %s2864_s8  ;;  %748 = vrot.lane.b32.xlu0 %v740_v33, %s2863_s28  ;;  %v899_v33 = vmul.f32 %v897_v26, %v3117_v40  ;;  %v995_v26 = vmul.f32 %v992_v12, %v3282_v47 }
 0x14a   : > { %801 = vrot.lane.b32.xlu1 %v795_v36, %s2864_s8  ;;  %786 = vrot.lane.b32.xlu0 %v778_v38, %s2864_s8  ;;  %v916_v36 = vstv %s2536_s6  ;;  %s2564_s6 = sld [smem:[#allocation2 + $0x56]] }
 0x14e   : > { %822 = vrot.lane.b32.xlu1 %v815_v43, %s2860_s21  ;;  %824 = vrot.lane.b32.xlu0 %v816_v44, %s2860_s21  ;;  %v917_v43 = vmul.f32 %v916_v36, %v3113_v39  ;;  %v918_v44 = vmul.f32 %v916_v36, %v3277_v45 }
 0x152   : > { %839 = vrot.lane.b32.xlu1 %v833_v48, %s2860_s21  ;;  %449 = vrot.lane.b32.xlu0 %v442_v49, %s2861_s12 }
 0x156   : > { %451 = vrot.lane.b32.xlu1 %v443_v37, %s2861_s12  ;;  %488 = vrot.lane.b32.xlu0 %v481_v51, %s2862_s20  ;;  %v919_v37 = vmul.f32 %v916_v36, %v3282_v47  ;;  %v936_v51 = vmul.f32 %v935_v46, %v3100_v34  ;;  %v1014_v36 = vmul.f32 %v1011_v21, %v3201_v11 }
 0x15a   : > { %490 = vrot.lane.b32.xlu1 %v482_v52, %s2862_s20  ;;  %527 = vrot.lane.b32.xlu0 %v520_v53, %s2863_s28 }
 0x15e   : > { %529 = vrot.lane.b32.xlu1 %v521_v41, %s2863_s28  ;;  %566 = vrot.lane.b32.xlu0 %v559_v54, %s2864_s8  ;;  %v937_v41 = vmul.f32 %v935_v46, %v3117_v40  ;;  %v938_v54 = vmul.f32 %v935_v46, %v3201_v11 }
 0x162   : > { %568 = vrot.lane.b32.xlu1 %v560_v50, %s2864_s8  ;;  %604 = vrot.lane.b32.xlu0 %v597_v55, %s2860_s21  ;;  %v954_v50 = vstv %s2543_s26  ;;  %s2571_s26 = sld [smem:[#allocation2 + $0x5d]] }
 0x166   : > { %606 = vrot.lane.b32.xlu1 %v598_v56, %s2860_s21  ;;  %643 = vrot.lane.b32.xlu0 %v636_v57, %s2865_s11  ;;  %v955_v57 = vmul.f32 %v954_v50, %v3113_v39 }
 0x16a   : > { %645 = vrot.lane.b32.xlu1 %v637_v58, %s2865_s11  ;;  %689 = vrot.lane.b32.xlu0 %v682_v59, %s2861_s12  ;;  %v956_v58 = vmul.f32 %v954_v50, %v3277_v45  ;;  %v973_v59 = vstv %s2501_s10  ;;  %s2488_s10 = sld [smem:[#allocation2 + $0xa]] }
 0x16c   : > { %v3325_v60 = vpop.permute.xlu0 %427 }
 0x16d   : > { %4930 = vst [vmem:[#allocation17_spill] sm:$0xff] %v3325_v60 }
 0x16e   : > { %691 = vrot.lane.b32.xlu1 %v683_v61, %s2861_s12  ;;  %727 = vrot.lane.b32.xlu0 %v720_v62, %s2862_s20 }
 0x170   : > { %v3333_v63 = vpop.permute.xlu1 %429  ;;  %v3335_v0 = vpop.permute.xlu0 %466 }
 0x171   : > { %4931 = vst [vmem:[#allocation18_spill] sm:$0xff] %v3333_v63  ;;  %4932 = vst [vmem:[#allocation19_spill] sm:$0xff] %v3335_v0 }
 0x172   : > { %729 = vrot.lane.b32.xlu1 %v721_v1, %s2862_s20  ;;  %765 = vrot.lane.b32.xlu0 %v758_v2, %s2863_s28  ;;  %v957_v1 = vmul.f32 %v954_v50, %v3282_v47  ;;  %v974_v2 = vmul.f32 %v973_v59, %v3100_v34 }
 0x174   : > { %v3343_v3 = vpop.permute.xlu1 %447  ;;  %v3345_v4 = vpop.permute.xlu0 %505 }
 0x175   : > { %4933 = vst [vmem:[#allocation20_spill] sm:$0xff] %v3343_v3  ;;  %4934 = vst [vmem:[#allocation21_spill] sm:$0xff] %v3345_v4 }
 0x176   : > { %767 = vrot.lane.b32.xlu1 %v759_v5, %s2863_s28  ;;  %803 = vrot.lane.b32.xlu0 %v796_v6, %s2864_s8 }
 0x178   : > { %v3353_v7 = vpop.permute.xlu1 %468  ;;  %v3355_v8 = vpop.permute.xlu0 %544 }
 0x179   : > { %4935 = vst [vmem:[#allocation22_spill] sm:$0xff] %v3353_v7  ;;  %4936 = vst [vmem:[#allocation23_spill] sm:$0xff] %v3355_v8 }
 0x17a   : > { %805 = vrot.lane.b32.xlu1 %v797_v9, %s2864_s8  ;;  %841 = vrot.lane.b32.xlu0 %v834_v10, %s2860_s21  ;;  %v975_v9 = vmul.f32 %v973_v59, %v3117_v40  ;;  %v976_v10 = vmul.f32 %v973_v59, %v3201_v11 }
 0x17c   : > { %v3362_v13 = vpop.permute.xlu1 %486  ;;  %v3364_v14 = vpop.permute.xlu0 %583 }
 0x17d   : > { %4937 = vst [vmem:[#allocation24_spill] sm:$0xff] %v3362_v13  ;;  %4938 = vst [vmem:[#allocation25_spill] sm:$0xff] %v3364_v14 }
 0x17e   : > { %843 = vrot.lane.b32.xlu1 %v835_v15, %s2860_s21  ;;  %858 = vrot.lane.b32.xlu0 %v852_v16, %s2865_s11 }
 0x180   : > { %v3370_v17 = vpop.permute.xlu1 %507  ;;  %v3372_v18 = vpop.permute.xlu0 %621 }
 0x181   : > { %4939 = vst [vmem:[#allocation26_spill] sm:$0xff] %v3370_v17  ;;  %4940 = vst [vmem:[#allocation27_spill] sm:$0xff] %v3372_v18 }
 0x182   : > { %860 = vrot.lane.b32.xlu1 %v853_v19, %s2865_s11  ;;  %862 = vrot.lane.b32.xlu0 %v854_v20, %s2865_s11  ;;  %v993_v19 = vmul.f32 %v992_v12, %v3113_v39  ;;  %v994_v20 = vmul.f32 %v992_v12, %v3277_v45 }
 0x184   : > { %v3378_v22 = vpop.permute.xlu1 %525  ;;  %v3380_v23 = vpop.permute.xlu0 %668 }
 0x185   : > { %4941 = vst [vmem:[#allocation28_spill] sm:$0xff] %v3378_v22 }
 0x186   : > { %877 = vrot.lane.b32.xlu1 %v871_v24, %s2865_s11  ;;  %879 = vrot.lane.b32.xlu0 %v872_v25, %s2865_s11 }
 0x188   : > { %v3386_v27 = vpop.permute.xlu1 %546  ;;  %v3388_v28 = vpop.permute.xlu0 %706 }
 0x189   : > { %4942 = vst [vmem:[#allocation29_spill] sm:$0xff] %v3386_v27 }
 0x18a   : > { %881 = vrot.lane.b32.xlu1 %v873_v29, %s2865_s11  ;;  %904 = vrot.lane.b32.xlu0 %v898_v30, %s2861_s12  ;;  %v1012_v29 = vmul.f32 %v1011_v21, %v3100_v34 }
 0x18c   : > { %v3394_v31 = vpop.permute.xlu1 %564  ;;  %v3396_v32 = vpop.permute.xlu0 %744 }
 0x18d   : > { %4943 = vst [vmem:[#allocation30_spill] sm:$0xff] %v3394_v31 }
 0x18e   : > { %906 = vrot.lane.b32.xlu1 %v899_v33, %s2861_s12  ;;  %908 = vrot.lane.b32.xlu0 %v900_v35, %s2861_s12  ;;  %v1013_v35 = vmul.f32 %v1011_v21, %v3117_v40 }
 0x190   : > { %v3402_v38 = vpop.permute.xlu1 %585  ;;  %v3404_v42 = vpop.permute.xlu0 %782 }
 0x191   : > { %4944 = vst [vmem:[#allocation31_spill] sm:$0xff] %v3402_v38  ;;  %4945 = vst [vmem:[#allocation32_spill] sm:$0xff] %v3404_v42 }
 0x192   : > { %923 = vrot.lane.b32.xlu1 %v917_v43, %s2861_s12  ;;  %925 = vrot.lane.b32.xlu0 %v918_v44, %s2861_s12  ;;  %v1030_v43 = vstv %s2557_s25  ;;  %s2544_s25 = sld [smem:[#allocation2 + $0x42]] }
 0x194   : > { %v3410_v48 = vpop.permute.xlu1 %602  ;;  %v3412_v49 = vpop.permute.xlu0 %820 }
 0x195   : > { %4946 = vst [vmem:[#allocation33_spill] sm:$0xff] %v3410_v48  ;;  %4947 = vst [vmem:[#allocation34_spill] sm:$0xff] %v3412_v49 }
 0x196   : > { %927 = vrot.lane.b32.xlu1 %v919_v37, %s2861_s12  ;;  %942 = vrot.lane.b32.xlu0 %v936_v51, %s2862_s20  ;;  %v1031_v37 = vmul.f32 %v1030_v43, %v3113_v39  ;;  %v1032_v51 = vmul.f32 %v1030_v43, %v3277_v45 }
 0x198   : > { %v3418_v52 = vpop.permute.xlu1 %623  ;;  %v3420_v53 = vpop.permute.xlu0 %431 }
 0x199   : > { %4948 = vst [vmem:[#allocation35_spill] sm:$0xff] %v3418_v52  ;;  %4949 = vst [vmem:[#allocation36_spill] sm:$0xff] %v3420_v53  ;;  %v1171_v52 = vstv %s2495_s24  ;;  %s2523_s24 = sld [smem:[#allocation2 + $0x2d]] }
 0x19a   : > { %944 = vrot.lane.b32.xlu1 %v937_v41, %s2862_s20  ;;  %946 = vrot.lane.b32.xlu0 %v938_v54, %s2862_s20  ;;  %v1049_v41 = vstv %s2515_s5  ;;  %s2502_s5 = sld [smem:[#allocation2 + $0x18]] }
 0x19c   : > { %v3426_v55 = vpop.permute.xlu1 %641  ;;  %v3428_v56 = vpop.permute.xlu0 %470 }
 0x19d   : > { %4950 = vst [vmem:[#allocation37_spill] sm:$0xff] %v3426_v55  ;;  %4951 = vst [vmem:[#allocation38_spill] sm:$0xff] %v3428_v56  ;;  %v1152_v55 = vstv %s2537_s13  ;;  %s2565_s13 = sld [smem:[#allocation2 + $0x57]] }
 0x19e   : > { %961 = vrot.lane.b32.xlu1 %v955_v57, %s2862_s20  ;;  %963 = vrot.lane.b32.xlu0 %v956_v58, %s2862_s20  ;;  %v1033_v57 = vmul.f32 %v1030_v43, %v3282_v47  ;;  %v1050_v58 = vmul.f32 %v1049_v41, %v3100_v34 }
 0x19f   : > { %v1323_v17 = vstv %s2523_s24  ;;  %s2504_s24 = sld [smem:[#allocation2 + $0x1a]] }
 0x1a0   : > { %v3434_v61 = vpop.permute.xlu1 %670  ;;  %v3436_v62 = vpop.permute.xlu0 %509 }
 0x1a1   : > { %4952 = vst [vmem:[#allocation39_spill] sm:$0xff] %v3436_v62 }
 0x1a2   : > { %965 = vrot.lane.b32.xlu1 %v957_v1, %s2862_s20  ;;  %980 = vrot.lane.b32.xlu0 %v974_v2, %s2863_s28  ;;  %v1051_v2 = vmul.f32 %v1049_v41, %v3117_v40 }
 0x1a4   : > { %v3442_v5 = vpop.permute.xlu1 %687  ;;  %v3444_v6 = vpop.permute.xlu0 %548 }
 0x1a5   : > { %4953 = vst [vmem:[#allocation40_spill] sm:$0xff] %v3444_v6 }
 0x1a6   : > { %982 = vrot.lane.b32.xlu1 %v975_v9, %s2863_s28  ;;  %984 = vrot.lane.b32.xlu0 %v976_v10, %s2863_s28  ;;  %v1052_v9 = vmul.f32 %v1049_v41, %v3201_v11  ;;  %v1068_v10 = vstv %s2564_s6  ;;  %s2551_s6 = sld [smem:[#allocation2 + $0x49]] }
 0x1a7   : > { %v1070_v21 = vmul.f32 %v1068_v10, %v3277_v45 }
 0x1a8   : > { %v3450_v15 = vpop.permute.xlu1 %708  ;;  %v3452_v16 = vpop.permute.xlu0 %587 }
 0x1a9   : > { %4954 = vst [vmem:[#allocation41_spill] sm:$0xff] %v3452_v16  ;;  %v1209_v16 = vstv %s2502_s5  ;;  %s2490_s5 = sld [smem:[#allocation2 + $0xc]] }
 0x1aa   : > { %999 = vrot.lane.b32.xlu1 %v993_v19, %s2863_s28  ;;  %1001 = vrot.lane.b32.xlu0 %v994_v20, %s2863_s28  ;;  %v1069_v20 = vmul.f32 %v1068_v10, %v3113_v39 }
 0x1ac   : > { %v3458_v24 = vpop.permute.xlu1 %725  ;;  %v3460_v25 = vpop.permute.xlu0 %625  ;;  %v1228_v6 = vstv %s2551_s6  ;;  %s2539_s6 = sld [smem:[#allocation2 + $0x3d]] }
 0x1ad   : > { %4955 = vst [vmem:[#allocation42_spill] sm:$0xff] %v3460_v25 }
 0x1ae   : > { %1003 = vrot.lane.b32.xlu1 %v995_v26, %s2863_s28  ;;  %1018 = vrot.lane.b32.xlu0 %v1012_v29, %s2864_s8  ;;  %v1087_v26 = vstv %s2522_s9  ;;  %s2509_s9 = sld [smem:[#allocation2 + $0x1f]] }
 0x1af   : > { %v1088_v43 = vmul.f32 %v1087_v26, %v3100_v34  ;;  %v1089_v41 = vmul.f32 %v1087_v26, %v3117_v40  ;;  %v1605_v7 = vstv %s2490_s5  ;;  %s2498_s5 = sld [smem:[#allocation2 + $0x14]] }
 0x1b0   : > { %v3466_v30 = vpop.permute.xlu1 %746  ;;  %v3468_v33 = vpop.permute.xlu0 %672 }
 0x1b2   : > { %1020 = vrot.lane.b32.xlu1 %v1013_v35, %s2864_s8  ;;  %1022 = vrot.lane.b32.xlu0 %v1014_v36, %s2864_s8  ;;  %v1071_v36 = vmul.f32 %v1068_v10, %v3282_v47 }
 0x1b4   : > { %v3474_v44 = vpop.permute.xlu1 %763  ;;  %v3476_v46 = vpop.permute.xlu0 %710 }
 0x1b5   : > { %4956 = vst [vmem:[#allocation43_spill] sm:$0xff] %v3474_v44 }
 0x1b6   : > { %1037 = vrot.lane.b32.xlu1 %v1031_v37, %s2864_s8  ;;  %1039 = vrot.lane.b32.xlu0 %v1032_v51, %s2864_s8 }
 0x1b8   : > { %v3482_v54 = vpop.permute.xlu1 %784  ;;  %v3484_v50 = vpop.permute.xlu0 %748 }
 0x1b9   : > { %4957 = vst [vmem:[#allocation44_spill] sm:$0xff] %v3482_v54 }
 0x1ba   : > { %1041 = vrot.lane.b32.xlu1 %v1033_v57, %s2864_s8  ;;  %1056 = vrot.lane.b32.xlu0 %v1050_v58, %s2860_s21  ;;  %v1090_v57 = vmul.f32 %v1087_v26, %v3201_v11  ;;  %v1106_v58 = vstv %s2571_s26  ;;  %s2558_s26 = sld [smem:[#allocation2 + $0x50]] }
 0x1bb   : > { %v1107_v10 = vmul.f32 %v1106_v58, %v3113_v39 }
 0x1bc   : > { %v3490_v59 = vpop.permute.xlu1 %801  ;;  %v3492_v1 = vpop.permute.xlu0 %786 }
 0x1bd   : > { %4958 = vst [vmem:[#allocation45_spill] sm:$0xff] %v3490_v59  ;;  %4959 = vst [vmem:[#allocation46_spill] sm:$0xff] %v3492_v1 }
 0x1be   : > { %1058 = vrot.lane.b32.xlu1 %v1051_v2, %s2860_s21  ;;  %1060 = vrot.lane.b32.xlu0 %v1052_v9, %s2860_s21 }
 0x1c0   : > { %v3498_v12 = vpop.permute.xlu1 %822  ;;  %v3500_v19 = vpop.permute.xlu0 %824 }
 0x1c1   : > { %4960 = vst [vmem:[#allocation47_spill] sm:$0xff] %v3498_v12  ;;  %4961 = vst [vmem:[#allocation48_spill] sm:$0xff] %v3500_v19 }
 0x1c2   : > { %1075 = vrot.lane.b32.xlu1 %v1069_v20, %s2860_s21  ;;  %1077 = vrot.lane.b32.xlu0 %v1070_v21, %s2860_s21  ;;  %v1108_v20 = vmul.f32 %v1106_v58, %v3277_v45  ;;  %v1133_v21 = vstv %s2488_s10  ;;  %s2516_s10 = sld [smem:[#allocation2 + $0x26]] }
 0x1c4   : > { %v3506_v29 = vpop.permute.xlu1 %839  ;;  %v3508_v35 = vpop.permute.xlu0 %449 }
 0x1c5   : > { %4962 = vst [vmem:[#allocation49_spill] sm:$0xff] %v3506_v29  ;;  %4963 = vst [vmem:[#allocation50_spill] sm:$0xff] %v3508_v35 }
 0x1c6   : > { %1079 = vrot.lane.b32.xlu1 %v1071_v36, %s2860_s21  ;;  %1094 = vrot.lane.b32.xlu0 %v1088_v43, %s2865_s11  ;;  %v1109_v43 = vmul.f32 %v1106_v58, %v3282_v47 }
 0x1c8   : > { %v3514_v37 = vpop.permute.xlu1 %451  ;;  %v3516_v51 = vpop.permute.xlu0 %488  ;;  %v1285_v27 = vstv %s2516_s10  ;;  %s2491_s10 = sld [smem:[#allocation2 + $0xd]] }
 0x1c9   : > { %4964 = vst [vmem:[#allocation51_spill] sm:$0xff] %v3514_v37  ;;  %4965 = vst [vmem:[#allocation52_spill] sm:$0xff] %v3516_v51 }
 0x1ca   : > { %1096 = vrot.lane.b32.xlu1 %v1089_v41, %s2865_s11  ;;  %1098 = vrot.lane.b32.xlu0 %v1090_v57, %s2865_s11  ;;  %v1134_v41 = vmul.f32 %v1133_v21, %v3100_v34 }
 0x1cc   : > { %v3522_v2 = vpop.permute.xlu1 %490  ;;  %v3524_v9 = vpop.permute.xlu0 %527 }
 0x1cd   : > { %4966 = vst [vmem:[#allocation53_spill] sm:$0xff] %v3522_v2  ;;  %4967 = vst [vmem:[#allocation54_spill] sm:$0xff] %v3524_v9  ;;  %v1304_v2 = vstv %s2565_s13  ;;  %s2540_s13 = sld [smem:[#allocation2 + $0x3e]] }
 0x1ce   : > { %1113 = vrot.lane.b32.xlu1 %v1107_v10, %s2865_s11  ;;  %1115 = vrot.lane.b32.xlu0 %v1108_v20, %s2865_s11  ;;  %v1135_v10 = vmul.f32 %v1133_v21, %v3117_v40  ;;  %v1136_v20 = vmul.f32 %v1133_v21, %v3201_v11 }
 0x1d0   : > { %v3530_v26 = vpop.permute.xlu1 %529  ;;  %v3532_v36 = vpop.permute.xlu0 %566 }
 0x1d1   : > { %4968 = vst [vmem:[#allocation55_spill] sm:$0xff] %v3530_v26  ;;  %4969 = vst [vmem:[#allocation56_spill] sm:$0xff] %v3532_v36  ;;  %v1266_v26 = vstv %s2558_s26  ;;  %s2546_s26 = sld [smem:[#allocation2 + $0x44]] }
 0x1d2   : > { %1117 = vrot.lane.b32.xlu1 %v1109_v43, %s2865_s11  ;;  %1140 = vrot.lane.b32.xlu0 %v1134_v41, %s2861_s12  ;;  %v1153_v43 = vmul.f32 %v1152_v55, %v3113_v39  ;;  %v1154_v41 = vmul.f32 %v1152_v55, %v3277_v45 }
 0x1d4   : > { %v3538_v57 = vpop.permute.xlu1 %568  ;;  %v3540_v25 = vpop.permute.xlu0 %604 }
 0x1d5   : > { %4970 = vst [vmem:[#allocation57_spill] sm:$0xff] %v3538_v57  ;;  %4971 = vst [vmem:[#allocation58_spill] sm:$0xff] %v3540_v25  ;;  %v1247_v57 = vstv %s2509_s9  ;;  %s2497_s9 = sld [smem:[#allocation2 + $0x13]] }
 0x1d6   : > { %1142 = vrot.lane.b32.xlu1 %v1135_v10, %s2861_s12  ;;  %1144 = vrot.lane.b32.xlu0 %v1136_v20, %s2861_s12  ;;  %v1155_v10 = vmul.f32 %v1152_v55, %v3282_v47  ;;  %v1172_v20 = vmul.f32 %v1171_v52, %v3100_v34 }
 0x1d8   : > { %v3546_v58 = vpop.permute.xlu1 %606  ;;  %v3548_v18 = vpop.permute.xlu0 %643 }
 0x1d9   : > { %4972 = vst [vmem:[#allocation59_spill] sm:$0xff] %v3546_v58  ;;  %4973 = vst [vmem:[#allocation60_spill] sm:$0xff] %v3548_v18 }
 0x1da   : > { %1159 = vrot.lane.b32.xlu1 %v1153_v43, %s2861_s12  ;;  %1161 = vrot.lane.b32.xlu0 %v1154_v41, %s2861_s12  ;;  %v1173_v43 = vmul.f32 %v1171_v52, %v3117_v40  ;;  %v1174_v41 = vmul.f32 %v1171_v52, %v3201_v11 }
 0x1dc   : > { %v3554_v21 = vpop.permute.xlu1 %645  ;;  %v3556_v14 = vpop.permute.xlu0 %689 }
 0x1dd   : > { %4974 = vst [vmem:[#allocation61_spill] sm:$0xff] %v3554_v21  ;;  %v1190_v21 = vstv %s2544_s25  ;;  %s2572_s25 = sld [smem:[#allocation2 + $0x5e]] }
 0x1de   : > { %1163 = vrot.lane.b32.xlu1 %v1155_v10, %s2861_s12  ;;  %1178 = vrot.lane.b32.xlu0 %v1172_v20, %s2862_s20  ;;  %v1191_v10 = vmul.f32 %v1190_v21, %v3113_v39  ;;  %v1192_v20 = vmul.f32 %v1190_v21, %v3277_v45 }
 0x1e0   : > { %v3562_v18 = vpop.permute.xlu1 %691  ;;  %v3564_v48 = vpop.permute.xlu0 %727 }
 0x1e2   : > { %1180 = vrot.lane.b32.xlu1 %v1173_v43, %s2862_s20  ;;  %1182 = vrot.lane.b32.xlu0 %v1174_v41, %s2862_s20  ;;  %v1193_v43 = vmul.f32 %v1190_v21, %v3282_v47  ;;  %v1210_v41 = vmul.f32 %v1209_v16, %v3100_v34 }
 0x1e3   : > { %v1342_v37 = vstv %s2572_s25  ;;  %s2553_s25 = sld [smem:[#allocation2 + $0x4b]] }
 0x1e4   : > { %v3570_v55 = vpop.permute.xlu1 %729  ;;  %v3572_v38 = vpop.permute.xlu0 %765 }
 0x1e5   : > { %4975 = vst [vmem:[#allocation62_spill] sm:$0xff] %v3570_v55  ;;  %4976 = vst [vmem:[#allocation63_spill] sm:$0xff] %v3572_v38 }
 0x1e6   : > { %1197 = vrot.lane.b32.xlu1 %v1191_v10, %s2862_s20  ;;  %1199 = vrot.lane.b32.xlu0 %v1192_v20, %s2862_s20  ;;  %v1211_v10 = vmul.f32 %v1209_v16, %v3117_v40  ;;  %v1212_v20 = vmul.f32 %v1209_v16, %v3201_v11 }
 0x1e8   : > { %v3578_v52 = vpop.permute.xlu1 %767  ;;  %v3580_v25 = vpop.permute.xlu0 %803 }
 0x1e9   : > { %4977 = vst [vmem:[#allocation64_spill] sm:$0xff] %v3578_v52  ;;  %4978 = vst [vmem:[#allocation65_spill] sm:$0xff] %v3580_v25 }
 0x1ea   : > { %1201 = vrot.lane.b32.xlu1 %v1193_v43, %s2862_s20  ;;  %1216 = vrot.lane.b32.xlu0 %v1210_v41, %s2863_s28  ;;  %v1229_v43 = vmul.f32 %v1228_v6, %v3113_v39  ;;  %v1230_v41 = vmul.f32 %v1228_v6, %v3277_v45 }
 0x1ec   : > { %v3586_v58 = vpop.permute.xlu1 %805  ;;  %v3588_v31 = vpop.permute.xlu0 %841 }
 0x1ed   : > { %4979 = vst [vmem:[#allocation66_spill] sm:$0xff] %v3586_v58  ;;  %4980 = vst [vmem:[#allocation67_spill] sm:$0xff] %v3588_v31 }
 0x1ee   : > { %1218 = vrot.lane.b32.xlu1 %v1211_v10, %s2863_s28  ;;  %1220 = vrot.lane.b32.xlu0 %v1212_v20, %s2863_s28  ;;  %v1231_v10 = vmul.f32 %v1228_v6, %v3282_v47  ;;  %v1248_v20 = vmul.f32 %v1247_v57, %v3100_v34 }
 0x1f0   : > { %v3594_v21 = vpop.permute.xlu1 %843  ;;  %v3596_v36 = vpop.permute.xlu0 %858 }
 0x1f1   : > { %4981 = vst [vmem:[#allocation68_spill] sm:$0xff] %v3594_v21  ;;  %4982 = vst [vmem:[#allocation69_spill] sm:$0xff] %v3596_v36 }
 0x1f2   : > { %1235 = vrot.lane.b32.xlu1 %v1229_v43, %s2863_s28  ;;  %1237 = vrot.lane.b32.xlu0 %v1230_v41, %s2863_s28  ;;  %v1249_v43 = vmul.f32 %v1247_v57, %v3117_v40  ;;  %v1250_v41 = vmul.f32 %v1247_v57, %v3201_v11 }
 0x1f4   : > { %v3602_v16 = vpop.permute.xlu1 %860  ;;  %v3604_v22 = vpop.permute.xlu0 %862 }
 0x1f5   : > { %4983 = vst [vmem:[#allocation70_spill] sm:$0xff] %v3602_v16  ;;  %4984 = vst [vmem:[#allocation71_spill] sm:$0xff] %v3604_v22 }
 0x1f6   : > { %1239 = vrot.lane.b32.xlu1 %v1231_v10, %s2863_s28  ;;  %1254 = vrot.lane.b32.xlu0 %v1248_v20, %s2864_s8  ;;  %v1267_v10 = vmul.f32 %v1266_v26, %v3113_v39  ;;  %v1268_v20 = vmul.f32 %v1266_v26, %v3277_v45 }
 0x1f8   : > { %v3610_v62 = vpop.permute.xlu1 %877  ;;  %v3612_v9 = vpop.permute.xlu0 %879 }
 0x1f9   : > { %4985 = vst [vmem:[#allocation72_spill] sm:$0xff] %v3610_v62  ;;  %4986 = vst [vmem:[#allocation73_spill] sm:$0xff] %v3612_v9 }
 0x1fa   : > { %1256 = vrot.lane.b32.xlu1 %v1249_v43, %s2864_s8  ;;  %1258 = vrot.lane.b32.xlu0 %v1250_v41, %s2864_s8  ;;  %v1269_v43 = vmul.f32 %v1266_v26, %v3282_v47  ;;  %v1286_v41 = vmul.f32 %v1285_v27, %v3100_v34 }
 0x1fc   : > { %v3618_v6 = vpop.permute.xlu1 %881  ;;  %v3620_v8 = vpop.permute.xlu0 %904 }
 0x1fd   : > { %4987 = vst [vmem:[#allocation74_spill] sm:$0xff] %v3618_v6  ;;  %4988 = vst [vmem:[#allocation75_spill] sm:$0xff] %v3620_v8 }
 0x1fe   : > { %1273 = vrot.lane.b32.xlu1 %v1267_v10, %s2864_s8  ;;  %1275 = vrot.lane.b32.xlu0 %v1268_v20, %s2864_s8  ;;  %v1287_v10 = vmul.f32 %v1285_v27, %v3117_v40  ;;  %v1288_v20 = vmul.f32 %v1285_v27, %v3201_v11 }
 0x200   : > { %v3626_v57 = vpop.permute.xlu1 %906  ;;  %v3628_v13 = vpop.permute.xlu0 %908 }
 0x201   : > { %4989 = vst [vmem:[#allocation76_spill] sm:$0xff] %v3626_v57  ;;  %4990 = vst [vmem:[#allocation77_spill] sm:$0xff] %v3628_v13 }
 0x202   : > { %1277 = vrot.lane.b32.xlu1 %v1269_v43, %s2864_s8  ;;  %1292 = vrot.lane.b32.xlu0 %v1286_v41, %s2860_s21  ;;  %v1305_v43 = vmul.f32 %v1304_v2, %v3113_v39  ;;  %v1306_v41 = vmul.f32 %v1304_v2, %v3277_v45 }
 0x204   : > { %v3634_v56 = vpop.permute.xlu1 %923  ;;  %v3636_v51 = vpop.permute.xlu0 %925 }
 0x205   : > { %4991 = vst [vmem:[#allocation78_spill] sm:$0xff] %v3634_v56  ;;  %4992 = vst [vmem:[#allocation79_spill] sm:$0xff] %v3636_v51 }
 0x206   : > { %1294 = vrot.lane.b32.xlu1 %v1287_v10, %s2860_s21  ;;  %1296 = vrot.lane.b32.xlu0 %v1288_v20, %s2860_s21  ;;  %v1307_v10 = vmul.f32 %v1304_v2, %v3282_v47  ;;  %v1324_v20 = vmul.f32 %v1323_v17, %v3100_v34 }
 0x208   : > { %v3642_v26 = vpop.permute.xlu1 %927  ;;  %v3644_v4 = vpop.permute.xlu0 %942 }
 0x209   : > { %4993 = vst [vmem:[#allocation80_spill] sm:$0xff] %v3642_v26  ;;  %4994 = vst [vmem:[#allocation81_spill] sm:$0xff] %v3644_v4 }
 0x20a   : > { %1311 = vrot.lane.b32.xlu1 %v1305_v43, %s2860_s21  ;;  %1313 = vrot.lane.b32.xlu0 %v1306_v41, %s2860_s21  ;;  %v1325_v43 = vmul.f32 %v1323_v17, %v3117_v40  ;;  %v1326_v41 = vmul.f32 %v1323_v17, %v3201_v11 }
 0x20c   : > { %v3650_v27 = vpop.permute.xlu1 %944  ;;  %v3652_v3 = vpop.permute.xlu0 %946 }
 0x20d   : > { %4995 = vst [vmem:[#allocation82_spill] sm:$0xff] %v3650_v27  ;;  %4996 = vst [vmem:[#allocation83_spill] sm:$0xff] %v3652_v3 }
 0x20e   : > { %1315 = vrot.lane.b32.xlu1 %v1307_v10, %s2860_s21  ;;  %1330 = vrot.lane.b32.xlu0 %v1324_v20, %s2865_s11  ;;  %v1343_v10 = vmul.f32 %v1342_v37, %v3113_v39  ;;  %v1344_v20 = vmul.f32 %v1342_v37, %v3277_v45 }
 0x210   : > { %v3658_v53 = vpop.permute.xlu1 %961  ;;  %v3660_v35 = vpop.permute.xlu0 %963 }
 0x211   : > { %4997 = vst [vmem:[#allocation84_spill] sm:$0xff] %v3658_v53  ;;  %4998 = vst [vmem:[#allocation85_spill] sm:$0xff] %v3660_v35 }
 0x212   : > { %1332 = vrot.lane.b32.xlu1 %v1325_v43, %s2865_s11  ;;  %1334 = vrot.lane.b32.xlu0 %v1326_v41, %s2865_s11  ;;  %v1345_v43 = vmul.f32 %v1342_v37, %v3282_v47  ;;  %v1606_v41 = vmul.f32 %v1605_v7, %v3100_v34 }
 0x214   : > { %v3666_v2 = vpop.permute.xlu1 %965  ;;  %v3668_v0 = vpop.permute.xlu0 %980 }
 0x215   : > { %4999 = vst [vmem:[#allocation86_spill] sm:$0xff] %v3666_v2  ;;  %5000 = vst [vmem:[#allocation87_spill] sm:$0xff] %v3668_v0  ;;  %v1643_v2 = vstv %s2497_s9  ;;  %s2511_s9 = sld [smem:[#allocation2 + $0x21]] }
 0x216   : > { %1349 = vrot.lane.b32.xlu1 %v1343_v10, %s2865_s11  ;;  %1351 = vrot.lane.b32.xlu0 %v1344_v20, %s2865_s11  ;;  %v1607_v10 = vmul.f32 %v1605_v7, %v3117_v40  ;;  %v1608_v20 = vmul.f32 %v1605_v7, %v3201_v11 }
 0x218   : > { %v3674_v17 = vpop.permute.xlu1 %982  ;;  %v3676_v60 = vpop.permute.xlu0 %984 }
 0x219   : > { %5001 = vst [vmem:[#allocation88_spill] sm:$0xff] %v3674_v17  ;;  %5002 = vst [vmem:[#allocation89_spill] sm:$0xff] %v3676_v60  ;;  %v1624_v17 = vstv %s2539_s6  ;;  %s2547_s6 = sld [smem:[#allocation2 + $0x45]] }
 0x21a   : > { %1353 = vrot.lane.b32.xlu1 %v1345_v43, %s2865_s11  ;;  %1612 = vrot.lane.b32.xlu0 %v1606_v41, %s2861_s12  ;;  %v1625_v43 = vmul.f32 %v1624_v17, %v3113_v39  ;;  %v1626_v41 = vmul.f32 %v1624_v17, %v3277_v45 }
 0x21c   : > { %v3682_v63 = vpop.permute.xlu1 %999  ;;  %v3684_v0 = vpop.permute.xlu0 %1001 }
 0x21d   : > { %5003 = vst [vmem:[#allocation90_spill] sm:$0xff] %v3682_v63  ;;  %5004 = vst [vmem:[#allocation91_spill] sm:$0xff] %v3684_v0 }
 0x21e   : > { %1614 = vrot.lane.b32.xlu1 %v1607_v10, %s2861_s12  ;;  %1616 = vrot.lane.b32.xlu0 %v1608_v20, %s2861_s12  ;;  %v1627_v10 = vmul.f32 %v1624_v17, %v3282_v47  ;;  %v1644_v20 = vmul.f32 %v1643_v2, %v3100_v34 }
 0x220   : > { %v3690_v37 = vpop.permute.xlu1 %1003  ;;  %v3692_v60 = vpop.permute.xlu0 %1018 }
 0x221   : > { %5005 = vst [vmem:[#allocation92_spill] sm:$0xff] %v3690_v37  ;;  %5006 = vst [vmem:[#allocation93_spill] sm:$0xff] %v3692_v60 }
 0x222   : > { %1631 = vrot.lane.b32.xlu1 %v1625_v43, %s2861_s12  ;;  %1633 = vrot.lane.b32.xlu0 %v1626_v41, %s2861_s12  ;;  %v1645_v43 = vmul.f32 %v1643_v2, %v3117_v40  ;;  %v1646_v41 = vmul.f32 %v1643_v2, %v3201_v11 }
 0x224   : > { %v3698_v7 = vpop.permute.xlu1 %1020  ;;  %v3700_v3 = vpop.permute.xlu0 %1022 }
 0x225   : > { %5007 = vst [vmem:[#allocation94_spill] sm:$0xff] %v3698_v7  ;;  %5008 = vst [vmem:[#allocation95_spill] sm:$0xff] %v3700_v3  ;;  %v1662_v7 = vstv %s2546_s26  ;;  %s2560_s26 = sld [smem:[#allocation2 + $0x52]] }
 0x226   : > { %1635 = vrot.lane.b32.xlu1 %v1627_v10, %s2861_s12  ;;  %1650 = vrot.lane.b32.xlu0 %v1644_v20, %s2862_s20  ;;  %v1663_v10 = vmul.f32 %v1662_v7, %v3113_v39  ;;  %v1664_v20 = vmul.f32 %v1662_v7, %v3277_v45 }
 0x228   : > { %v3706_v60 = vpop.permute.xlu1 %1037  ;;  %v3708_v37 = vpop.permute.xlu0 %1039 }
 0x229   : > { %5009 = vst [vmem:[#allocation96_spill] sm:$0xff] %v3706_v60  ;;  %5010 = vst [vmem:[#allocation97_spill] sm:$0xff] %v3708_v37  ;;  %v1841_v60 = vstv %s2491_s10  ;;  %s2505_s10 = sld [smem:[#allocation2 + $0x1b]] }
 0x22a   : > { %1652 = vrot.lane.b32.xlu1 %v1645_v43, %s2862_s20  ;;  %1654 = vrot.lane.b32.xlu0 %v1646_v41, %s2862_s20  ;;  %v1665_v43 = vmul.f32 %v1662_v7, %v3282_v47  ;;  %v1842_v41 = vmul.f32 %v1841_v60, %v3100_v34 }
 0x22c   : > { %v3714_v17 = vpop.permute.xlu1 %1041  ;;  %v3716_v3 = vpop.permute.xlu0 %1056 }
 0x22d   : > { %5011 = vst [vmem:[#allocation98_spill] sm:$0xff] %v3714_v17  ;;  %5012 = vst [vmem:[#allocation99_spill] sm:$0xff] %v3716_v3 }
 0x22e   : > { %1669 = vrot.lane.b32.xlu1 %v1663_v10, %s2862_s20  ;;  %1671 = vrot.lane.b32.xlu0 %v1664_v20, %s2862_s20  ;;  %v1843_v10 = vmul.f32 %v1841_v60, %v3117_v40  ;;  %v1844_v20 = vmul.f32 %v1841_v60, %v3201_v11 }
 0x230   : > { %v3722_v2 = vpop.permute.xlu1 %1058  ;;  %v3724_v37 = vpop.permute.xlu0 %1060 }
 0x231   : > { %5013 = vst [vmem:[#allocation100_spill] sm:$0xff] %v3722_v2  ;;  %5014 = vst [vmem:[#allocation101_spill] sm:$0xff] %v3724_v37  ;;  %v1860_v2 = vstv %s2540_s13  ;;  %s2554_s13 = sld [smem:[#allocation2 + $0x4c]] }
 0x232   : > { %1673 = vrot.lane.b32.xlu1 %v1665_v43, %s2862_s20  ;;  %1848 = vrot.lane.b32.xlu0 %v1842_v41, %s2861_s12  ;;  %v1861_v43 = vmul.f32 %v1860_v2, %v3113_v39  ;;  %v1862_v41 = vmul.f32 %v1860_v2, %v3277_v45 }
 0x234   : > { %v3730_v3 = vpop.permute.xlu1 %1075  ;;  %v3732_v17 = vpop.permute.xlu0 %1077 }
 0x235   : > { %5015 = vst [vmem:[#allocation102_spill] sm:$0xff] %v3730_v3  ;;  %5016 = vst [vmem:[#allocation103_spill] sm:$0xff] %v3732_v17  ;;  %v1681_v3 = vstv %s2504_s24  ;;  %s2518_s24 = sld [smem:[#allocation2 + $0x28]] }
 0x236   : > { %1850 = vrot.lane.b32.xlu1 %v1843_v10, %s2861_s12  ;;  %1852 = vrot.lane.b32.xlu0 %v1844_v20, %s2861_s12  ;;  %v1863_v10 = vmul.f32 %v1860_v2, %v3282_v47  ;;  %v1682_v20 = vmul.f32 %v1681_v3, %v3100_v34 }
 0x238   : > { %v3738_v7 = vpop.permute.xlu1 %1079  ;;  %v3740_v37 = vpop.permute.xlu0 %1094 }
 0x239   : > { %5017 = vst [vmem:[#allocation104_spill] sm:$0xff] %v3738_v7  ;;  %5018 = vst [vmem:[#allocation105_spill] sm:$0xff] %v3740_v37 }
 0x23a   : > { %1867 = vrot.lane.b32.xlu1 %v1861_v43, %s2861_s12  ;;  %1869 = vrot.lane.b32.xlu0 %v1862_v41, %s2861_s12  ;;  %v1683_v43 = vmul.f32 %v1681_v3, %v3117_v40  ;;  %v1684_v41 = vmul.f32 %v1681_v3, %v3201_v11 }
 0x23c   : > { %v3746_v60 = vpop.permute.xlu1 %1096  ;;  %v3748_v17 = vpop.permute.xlu0 %1098 }
 0x23d   : > { %5019 = vst [vmem:[#allocation106_spill] sm:$0xff] %v3746_v60  ;;  %5020 = vst [vmem:[#allocation107_spill] sm:$0xff] %v3748_v17  ;;  %v1700_v60 = vstv %s2553_s25  ;;  %s2567_s25 = sld [smem:[#allocation2 + $0x59]] }
 0x23e   : > { %1871 = vrot.lane.b32.xlu1 %v1863_v10, %s2861_s12  ;;  %1688 = vrot.lane.b32.xlu0 %v1682_v20, %s2863_s28  ;;  %v1701_v10 = vmul.f32 %v1700_v60, %v3113_v39  ;;  %v1702_v20 = vmul.f32 %v1700_v60, %v3277_v45 }
 0x240   : > { %v3754_v37 = vpop.permute.xlu1 %1113  ;;  %v3756_v7 = vpop.permute.xlu0 %1115 }
 0x241   : > { %5021 = vst [vmem:[#allocation108_spill] sm:$0xff] %v3754_v37  ;;  %5022 = vst [vmem:[#allocation109_spill] sm:$0xff] %v3756_v7  ;;  %v1879_v37 = vstv %s2498_s5  ;;  %s2512_s5 = sld [smem:[#allocation2 + $0x22]] }
 0x242   : > { %1690 = vrot.lane.b32.xlu1 %v1683_v43, %s2863_s28  ;;  %1692 = vrot.lane.b32.xlu0 %v1684_v41, %s2863_s28  ;;  %v1703_v43 = vmul.f32 %v1700_v60, %v3282_v47  ;;  %v1880_v41 = vmul.f32 %v1879_v37, %v3100_v34 }
 0x244   : > { %v3762_v2 = vpop.permute.xlu1 %1117  ;;  %v3764_v17 = vpop.permute.xlu0 %1140 }
 0x245   : > { %5023 = vst [vmem:[#allocation110_spill] sm:$0xff] %v3762_v2  ;;  %5024 = vst [vmem:[#allocation111_spill] sm:$0xff] %v3764_v17 }
 0x246   : > { %1707 = vrot.lane.b32.xlu1 %v1701_v10, %s2863_s28  ;;  %1709 = vrot.lane.b32.xlu0 %v1702_v20, %s2863_s28  ;;  %v1881_v10 = vmul.f32 %v1879_v37, %v3117_v40  ;;  %v1882_v20 = vmul.f32 %v1879_v37, %v3201_v11 }
 0x248   : > { %v3770_v3 = vpop.permute.xlu1 %1142  ;;  %v3772_v7 = vpop.permute.xlu0 %1144 }
 0x249   : > { %5025 = vst [vmem:[#allocation112_spill] sm:$0xff] %v3770_v3  ;;  %5026 = vst [vmem:[#allocation113_spill] sm:$0xff] %v3772_v7  ;;  %v1898_v3 = vstv %s2547_s6  ;;  %s2561_s6 = sld [smem:[#allocation2 + $0x53]] }
 0x24a   : > { %1711 = vrot.lane.b32.xlu1 %v1703_v43, %s2863_s28  ;;  %1886 = vrot.lane.b32.xlu0 %v1880_v41, %s2862_s20  ;;  %v1899_v43 = vmul.f32 %v1898_v3, %v3113_v39  ;;  %v1900_v41 = vmul.f32 %v1898_v3, %v3277_v45 }
 0x24c   : > { %v3778_v17 = vpop.permute.xlu1 %1159  ;;  %v3780_v2 = vpop.permute.xlu0 %1161 }
 0x24d   : > { %5027 = vst [vmem:[#allocation114_spill] sm:$0xff] %v3778_v17  ;;  %5028 = vst [vmem:[#allocation115_spill] sm:$0xff] %v3780_v2  ;;  %v1719_v17 = vstv %s2511_s9  ;;  %s2525_s9 = sld [smem:[#allocation2 + $0x2f]] }
 0x24e   : > { %1888 = vrot.lane.b32.xlu1 %v1881_v10, %s2862_s20  ;;  %1890 = vrot.lane.b32.xlu0 %v1882_v20, %s2862_s20  ;;  %v1901_v10 = vmul.f32 %v1898_v3, %v3282_v47  ;;  %v1720_v20 = vmul.f32 %v1719_v17, %v3100_v34 }
 0x250   : > { %v3786_v60 = vpop.permute.xlu1 %1163  ;;  %v3788_v7 = vpop.permute.xlu0 %1178 }
 0x251   : > { %5029 = vst [vmem:[#allocation116_spill] sm:$0xff] %v3786_v60  ;;  %5030 = vst [vmem:[#allocation117_spill] sm:$0xff] %v3788_v7 }
 0x252   : > { %1905 = vrot.lane.b32.xlu1 %v1899_v43, %s2862_s20  ;;  %1907 = vrot.lane.b32.xlu0 %v1900_v41, %s2862_s20  ;;  %v1721_v43 = vmul.f32 %v1719_v17, %v3117_v40  ;;  %v1722_v41 = vmul.f32 %v1719_v17, %v3201_v11 }
 0x254   : > { %v3794_v37 = vpop.permute.xlu1 %1180  ;;  %v3796_v2 = vpop.permute.xlu0 %1182 }
 0x255   : > { %5031 = vst [vmem:[#allocation118_spill] sm:$0xff] %v3794_v37  ;;  %5032 = vst [vmem:[#allocation119_spill] sm:$0xff] %v3796_v2  ;;  %v1738_v37 = vstv %s2560_s26  ;;  %s2574_s26 = sld [smem:[#allocation2 + $0x60]] }
 0x256   : > { %1909 = vrot.lane.b32.xlu1 %v1901_v10, %s2862_s20  ;;  %1726 = vrot.lane.b32.xlu0 %v1720_v20, %s2864_s8  ;;  %v1739_v10 = vmul.f32 %v1738_v37, %v3113_v39  ;;  %v1740_v20 = vmul.f32 %v1738_v37, %v3277_v45 }
 0x258   : > { %v3802_v7 = vpop.permute.xlu1 %1197  ;;  %v3804_v60 = vpop.permute.xlu0 %1199 }
 0x259   : > { %5033 = vst [vmem:[#allocation120_spill] sm:$0xff] %v3802_v7  ;;  %5034 = vst [vmem:[#allocation121_spill] sm:$0xff] %v3804_v60  ;;  %v1917_v7 = vstv %s2505_s10  ;;  %s2519_s10 = sld [smem:[#allocation2 + $0x29]] }
 0x25a   : > { %1728 = vrot.lane.b32.xlu1 %v1721_v43, %s2864_s8  ;;  %1730 = vrot.lane.b32.xlu0 %v1722_v41, %s2864_s8  ;;  %v1741_v43 = vmul.f32 %v1738_v37, %v3282_v47  ;;  %v1918_v41 = vmul.f32 %v1917_v7, %v3100_v34 }
 0x25c   : > { %v3810_v3 = vpop.permute.xlu1 %1201  ;;  %v3812_v2 = vpop.permute.xlu0 %1216 }
 0x25d   : > { %5035 = vst [vmem:[#allocation122_spill] sm:$0xff] %v3810_v3  ;;  %5036 = vst [vmem:[#allocation123_spill] sm:$0xff] %v3812_v2 }
 0x25e   : > { %1745 = vrot.lane.b32.xlu1 %v1739_v10, %s2864_s8  ;;  %1747 = vrot.lane.b32.xlu0 %v1740_v20, %s2864_s8  ;;  %v1919_v10 = vmul.f32 %v1917_v7, %v3117_v40  ;;  %v1920_v20 = vmul.f32 %v1917_v7, %v3201_v11 }
 0x260   : > { %v3818_v17 = vpop.permute.xlu1 %1218  ;;  %v3820_v60 = vpop.permute.xlu0 %1220 }
 0x261   : > { %5037 = vst [vmem:[#allocation124_spill] sm:$0xff] %v3818_v17  ;;  %5038 = vst [vmem:[#allocation125_spill] sm:$0xff] %v3820_v60  ;;  %v1936_v17 = vstv %s2554_s13  ;;  %s2568_s13 = sld [smem:[#allocation2 + $0x5a]] }
 0x262   : > { %1749 = vrot.lane.b32.xlu1 %v1741_v43, %s2864_s8  ;;  %1924 = vrot.lane.b32.xlu0 %v1918_v41, %s2863_s28  ;;  %v1937_v43 = vmul.f32 %v1936_v17, %v3113_v39  ;;  %v1938_v41 = vmul.f32 %v1936_v17, %v3277_v45 }
 0x264   : > { %v3826_v2 = vpop.permute.xlu1 %1235  ;;  %v3828_v3 = vpop.permute.xlu0 %1237 }
 0x265   : > { %5039 = vst [vmem:[#allocation126_spill] sm:$0xff] %v3826_v2  ;;  %5040 = vst [vmem:[#allocation127_spill] sm:$0xff] %v3828_v3  ;;  %v1757_v2 = vstv %s2518_s24  ;;  %s2526_s24 = sld [smem:[#allocation2 + $0x30]] }
 0x266   : > { %1926 = vrot.lane.b32.xlu1 %v1919_v10, %s2863_s28  ;;  %1928 = vrot.lane.b32.xlu0 %v1920_v20, %s2863_s28  ;;  %v1939_v10 = vmul.f32 %v1936_v17, %v3282_v47  ;;  %v1758_v20 = vmul.f32 %v1757_v2, %v3100_v34 }
 0x267   : > { %v2012_v0 = vstv %s2568_s13  ;;  %s2510_s13 = sld [smem:[#allocation2 + $0x20]] }
 0x268   : > { %v3834_v37 = vpop.permute.xlu1 %1239  ;;  %v3836_v60 = vpop.permute.xlu0 %1254 }
 0x269   : > { %5041 = vst [vmem:[#allocation128_spill] sm:$0xff] %v3834_v37  ;;  %5042 = vst [vmem:[#allocation129_spill] sm:$0xff] %v3836_v60 }
 0x26a   : > { %1943 = vrot.lane.b32.xlu1 %v1937_v43, %s2863_s28  ;;  %1945 = vrot.lane.b32.xlu0 %v1938_v41, %s2863_s28  ;;  %v1759_v43 = vmul.f32 %v1757_v2, %v3117_v40  ;;  %v1760_v41 = vmul.f32 %v1757_v2, %v3201_v11 }
 0x26b   : > { %v2031_v27 = vstv %s2526_s24  ;;  %s2517_s24 = sld [smem:[#allocation2 + $0x27]] }
 0x26c   : > { %v3842_v7 = vpop.permute.xlu1 %1256  ;;  %v3844_v3 = vpop.permute.xlu0 %1258 }
 0x26d   : > { %5043 = vst [vmem:[#allocation130_spill] sm:$0xff] %v3842_v7  ;;  %5044 = vst [vmem:[#allocation131_spill] sm:$0xff] %v3844_v3  ;;  %v1776_v7 = vstv %s2567_s25  ;;  %s2575_s25 = sld [smem:[#allocation2 + $0x61]] }
 0x26e   : > { %1947 = vrot.lane.b32.xlu1 %v1939_v10, %s2863_s28  ;;  %1764 = vrot.lane.b32.xlu0 %v1758_v20, %s2860_s21  ;;  %v1777_v10 = vmul.f32 %v1776_v7, %v3113_v39  ;;  %v1778_v20 = vmul.f32 %v1776_v7, %v3277_v45 }
 0x270   : > { %v3850_v60 = vpop.permute.xlu1 %1273  ;;  %v3852_v37 = vpop.permute.xlu0 %1275 }
 0x271   : > { %5045 = vst [vmem:[#allocation132_spill] sm:$0xff] %v3850_v60  ;;  %5046 = vst [vmem:[#allocation133_spill] sm:$0xff] %v3852_v37  ;;  %v1955_v60 = vstv %s2512_s5  ;;  %s2489_s5 = sld [smem:[#allocation2 + $0xb]]  ;;  %v1521_v58 = vstv %s2517_s24  ;;  %s2868_s24 = smov 6  }
 0x272   : > { %1766 = vrot.lane.b32.xlu1 %v1759_v43, %s2860_s21  ;;  %1768 = vrot.lane.b32.xlu0 %v1760_v41, %s2860_s21  ;;  %v1779_v43 = vmul.f32 %v1776_v7, %v3282_v47  ;;  %v1956_v41 = vmul.f32 %v1955_v60, %v3100_v34 }
 0x273   : > { %v2050_v35 = vstv %s2575_s25  ;;  %s2524_s25 = sld [smem:[#allocation2 + $0x2e]] }
 0x274   : > { %v3858_v17 = vpop.permute.xlu1 %1277  ;;  %v3860_v3 = vpop.permute.xlu0 %1292 }
 0x275   : > { %5047 = vst [vmem:[#allocation134_spill] sm:$0xff] %v3858_v17  ;;  %5048 = vst [vmem:[#allocation135_spill] sm:$0xff] %v3860_v3 }
 0x276   : > { %1783 = vrot.lane.b32.xlu1 %v1777_v10, %s2860_s21  ;;  %1785 = vrot.lane.b32.xlu0 %v1778_v20, %s2860_s21  ;;  %v1957_v10 = vmul.f32 %v1955_v60, %v3117_v40  ;;  %v1958_v20 = vmul.f32 %v1955_v60, %v3201_v11 }
 0x277   : > { %v1369_v8 = vstv %s2489_s5  ;;  %s4090_s5 = sld [smem:[#allocation2 + $0x1]] }
 0x278   : > { %v3866_v2 = vpop.permute.xlu1 %1294  ;;  %v3868_v37 = vpop.permute.xlu0 %1296 }
 0x279   : > { %5049 = vst [vmem:[#allocation136_spill] sm:$0xff] %v3866_v2  ;;  %5050 = vst [vmem:[#allocation137_spill] sm:$0xff] %v3868_v37  ;;  %v1974_v2 = vstv %s2561_s6  ;;  %s2538_s6 = sld [smem:[#allocation2 + $0x3c]] }
 0x27a   : > { %1787 = vrot.lane.b32.xlu1 %v1779_v43, %s2860_s21  ;;  %1962 = vrot.lane.b32.xlu0 %v1956_v41, %s2864_s8  ;;  %v1975_v43 = vmul.f32 %v1974_v2, %v3113_v39  ;;  %v1976_v41 = vmul.f32 %v1974_v2, %v3277_v45 }
 0x27c   : > { %v3874_v3 = vpop.permute.xlu1 %1311  ;;  %v3876_v17 = vpop.permute.xlu0 %1313 }
 0x27d   : > { %5051 = vst [vmem:[#allocation138_spill] sm:$0xff] %v3874_v3  ;;  %5052 = vst [vmem:[#allocation139_spill] sm:$0xff] %v3876_v17  ;;  %v1795_v3 = vstv %s2525_s9  ;;  %s2496_s9 = sld [smem:[#allocation2 + $0x12]]  ;;  %v655_v25 = vstv %s4090_s5  ;;  %s2530_s5 = sld [smem:[#allocation2 + $0x34]] }
 0x27e   : > { %1964 = vrot.lane.b32.xlu1 %v1957_v10, %s2864_s8  ;;  %1966 = vrot.lane.b32.xlu0 %v1958_v20, %s2864_s8  ;;  %v1977_v10 = vmul.f32 %v1974_v2, %v3282_v47  ;;  %v1796_v20 = vmul.f32 %v1795_v3, %v3100_v34 }
 0x27f   : > { %v1388_v62 = vstv %s2538_s6  ;;  %s4092_s6 = sld [smem:[#allocation2 + $0x2]] }
 0x280   : > { %v3882_v7 = vpop.permute.xlu1 %1315  ;;  %v3884_v37 = vpop.permute.xlu0 %1330 }
 0x281   : > { %5053 = vst [vmem:[#allocation140_spill] sm:$0xff] %v3882_v7  ;;  %5054 = vst [vmem:[#allocation141_spill] sm:$0xff] %v3884_v37 }
 0x282   : > { %1981 = vrot.lane.b32.xlu1 %v1975_v43, %s2864_s8  ;;  %1983 = vrot.lane.b32.xlu0 %v1976_v41, %s2864_s8  ;;  %v1797_v43 = vmul.f32 %v1795_v3, %v3117_v40  ;;  %v1798_v41 = vmul.f32 %v1795_v3, %v3201_v11 }
 0x283   : > { %v1407_v22 = vstv %s2496_s9  ;;  %s4100_s9 = sld [smem:[#allocation2 + $0x32]] }
 0x284   : > { %v3890_v60 = vpop.permute.xlu1 %1332  ;;  %v3892_v17 = vpop.permute.xlu0 %1334 }
 0x285   : > { %5055 = vst [vmem:[#allocation142_spill] sm:$0xff] %v3890_v60  ;;  %5056 = vst [vmem:[#allocation143_spill] sm:$0xff] %v3892_v17  ;;  %v1814_v60 = vstv %s2574_s26  ;;  %s2545_s26 = sld [smem:[#allocation2 + $0x43]]  ;;  %v891_v1 = vstv %s4092_s6  ;;  %s2482_s6 = sld [smem:[#allocation2 + $0x4]] }
 0x286   : > { %1985 = vrot.lane.b32.xlu1 %v1977_v10, %s2864_s8  ;;  %1802 = vrot.lane.b32.xlu0 %v1796_v20, %s2865_s11  ;;  %v1815_v10 = vmul.f32 %v1814_v60, %v3113_v39  ;;  %v1816_v20 = vmul.f32 %v1814_v60, %v3277_v45 }
 0x288   : > { %v3898_v37 = vpop.permute.xlu1 %1349  ;;  %v3900_v7 = vpop.permute.xlu0 %1351 }
 0x289   : > { %5057 = vst [vmem:[#allocation144_spill] sm:$0xff] %v3898_v37  ;;  %5058 = vst [vmem:[#allocation145_spill] sm:$0xff] %v3900_v7  ;;  %v1993_v37 = vstv %s2519_s10  ;;  %s2503_s10 = sld [smem:[#allocation2 + $0x19]]  ;;  %v658_v52 = vstv %s4100_s9  ;;  %s4526_s9 = sld [smem:[#allocation2 + $0x35]] }
 0x28a   : > { %1804 = vrot.lane.b32.xlu1 %v1797_v43, %s2865_s11  ;;  %1806 = vrot.lane.b32.xlu0 %v1798_v41, %s2865_s11  ;;  %v1817_v43 = vmul.f32 %v1814_v60, %v3282_v47  ;;  %v1994_v41 = vmul.f32 %v1993_v37, %v3100_v34 }
 0x28b   : > { %v1426_v16 = vstv %s2545_s26  ;;  %s4102_s26 = sld [smem:[#allocation2 + $0x33]] }
 0x28c   : > { %v3906_v2 = vpop.permute.xlu1 %1353  ;;  %v3908_v17 = vpop.permute.xlu0 %1612 }
 0x28d   : > { %5059 = vst [vmem:[#allocation146_spill] sm:$0xff] %v3906_v2 }
 0x28e   : > { %1821 = vrot.lane.b32.xlu1 %v1815_v10, %s2865_s11  ;;  %1823 = vrot.lane.b32.xlu0 %v1816_v20, %s2865_s11  ;;  %v1995_v10 = vmul.f32 %v1993_v37, %v3117_v40  ;;  %v1996_v20 = vmul.f32 %v1993_v37, %v3201_v11 }
 0x290   : > { %v3914_v3 = vpop.permute.xlu1 %1614  ;;  %v3916_v7 = vpop.permute.xlu0 %1616 }
 0x292   : > { %1825 = vrot.lane.b32.xlu1 %v1817_v43, %s2865_s11  ;;  %2000 = vrot.lane.b32.xlu0 %v1994_v41, %s2860_s21  ;;  %v2013_v43 = vmul.f32 %v2012_v0, %v3113_v39  ;;  %v2014_v41 = vmul.f32 %v2012_v0, %v3277_v45 }
 0x294   : > { %v3922_v2 = vpop.permute.xlu1 %1631  ;;  %v3924_v63 = vpop.permute.xlu0 %1633 }
 0x295   : > { %v1637_v54 = vsel %vm433_vm2, %v3922_v2, %v3924_v63 }
 0x296   : > { %2002 = vrot.lane.b32.xlu1 %v1995_v10, %s2860_s21  ;;  %2004 = vrot.lane.b32.xlu0 %v1996_v20, %s2860_s21  ;;  %v2015_v10 = vmul.f32 %v2012_v0, %v3282_v47  ;;  %v2032_v20 = vmul.f32 %v2031_v27, %v3100_v34 }
 0x298   : > { %v3930_v60 = vpop.permute.xlu1 %1635  ;;  %v3932_v4 = vpop.permute.xlu0 %1650 }
 0x29a   : > { %2019 = vrot.lane.b32.xlu1 %v2013_v43, %s2860_s21  ;;  %2021 = vrot.lane.b32.xlu0 %v2014_v41, %s2860_s21  ;;  %v2033_v43 = vmul.f32 %v2031_v27, %v3117_v40  ;;  %v2034_v41 = vmul.f32 %v2031_v27, %v3201_v11 }
 0x29c   : > { %v3938_v37 = vpop.permute.xlu1 %1652  ;;  %v3940_v26 = vpop.permute.xlu0 %1654 }
 0x29d   : > { %v1656_v2 = vsel %vm472_vm3, %v3932_v4, %v3938_v37  ;;  %v1638_v4 = vsel %vm433_vm2, %v3924_v63, %v3930_v60 }
 0x29e   : > { %2023 = vrot.lane.b32.xlu1 %v2015_v10, %s2860_s21  ;;  %2038 = vrot.lane.b32.xlu0 %v2032_v20, %s2865_s11  ;;  %v2051_v10 = vmul.f32 %v2050_v35, %v3113_v39  ;;  %v2052_v20 = vmul.f32 %v2050_v35, %v3277_v45 }
 0x2a0   : > { %v3946_v6 = vpop.permute.xlu1 %1669  ;;  %v3948_v53 = vpop.permute.xlu0 %1671 }
 0x2a2   : > { %2040 = vrot.lane.b32.xlu1 %v2033_v43, %s2865_s11  ;;  %2042 = vrot.lane.b32.xlu0 %v2034_v41, %s2865_s11  ;;  %v2053_v43 = vmul.f32 %v2050_v35, %v3282_v47  ;;  %v1370_v41 = vmul.f32 %v1369_v8, %v3100_v34 }
 0x2a4   : > { %v3954_v0 = vpop.permute.xlu1 %1673  ;;  %v3956_v13 = vpop.permute.xlu0 %1848 }
 0x2a5   : > { %5060 = vst [vmem:[#allocation147_spill] sm:$0xff] %v3956_v13  ;;  %v1676_v63 = vsel %vm472_vm3, %v3948_v53, %v3954_v0 }
 0x2a6   : > { %2057 = vrot.lane.b32.xlu1 %v2051_v10, %s2865_s11  ;;  %2059 = vrot.lane.b32.xlu0 %v2052_v20, %s2865_s11  ;;  %v1371_v10 = vmul.f32 %v1369_v8, %v3117_v40  ;;  %v1372_v20 = vmul.f32 %v1369_v8, %v3201_v11 }
 0x2a8   : > { %v3962_v27 = vpop.permute.xlu1 %1850  ;;  %v3964_v57 = vpop.permute.xlu0 %1852 }
 0x2a9   : > { %5061 = vst [vmem:[#allocation148_spill] sm:$0xff] %v3962_v27  ;;  %5062 = vst [vmem:[#allocation149_spill] sm:$0xff] %v3964_v57 }
 0x2aa   : > { %2061 = vrot.lane.b32.xlu1 %v2053_v43, %s2865_s11  ;;  %1376 = vrot.lane.b32.xlu0 %v1370_v41, %s2861_s12  ;;  %v1389_v43 = vmul.f32 %v1388_v62, %v3113_v39  ;;  %v1390_v41 = vmul.f32 %v1388_v62, %v3277_v45 }
 0x2ac   : > { %v3970_v56 = vpop.permute.xlu1 %1867  ;;  %v3972_v51 = vpop.permute.xlu0 %1869 }
 0x2ad   : > { %5063 = vst [vmem:[#allocation150_spill] sm:$0xff] %v3970_v56  ;;  %5064 = vst [vmem:[#allocation151_spill] sm:$0xff] %v3972_v51  ;;  %v1445_v56 = vstv %s2503_s10  ;;  %s4106_s10 = sld [smem:[#allocation2 + $0x6]] }
 0x2ae   : > { %1378 = vrot.lane.b32.xlu1 %v1371_v10, %s2861_s12  ;;  %1380 = vrot.lane.b32.xlu0 %v1372_v20, %s2861_s12  ;;  %v1391_v10 = vmul.f32 %v1388_v62, %v3282_v47  ;;  %v1408_v20 = vmul.f32 %v1407_v22, %v3100_v34 }
 0x2b0   : > { %v3978_v35 = vpop.permute.xlu1 %1871  ;;  %v3980_v9 = vpop.permute.xlu0 %1688 }
 0x2b1   : > { %5065 = vst [vmem:[#allocation152_spill] sm:$0xff] %v3978_v35 }
 0x2b2   : > { %1395 = vrot.lane.b32.xlu1 %v1389_v43, %s2861_s12  ;;  %1397 = vrot.lane.b32.xlu0 %v1390_v41, %s2861_s12  ;;  %v1409_v43 = vmul.f32 %v1407_v22, %v3117_v40  ;;  %v1410_v41 = vmul.f32 %v1407_v22, %v3201_v11 }
 0x2b4   : > { %v3986_v8 = vpop.permute.xlu1 %1690  ;;  %v3988_v57 = vpop.permute.xlu0 %1692 }
 0x2b6   : > { %1399 = vrot.lane.b32.xlu1 %v1391_v10, %s2861_s12  ;;  %1414 = vrot.lane.b32.xlu0 %v1408_v20, %s2862_s20  ;;  %v1427_v10 = vmul.f32 %v1426_v16, %v3113_v39  ;;  %v1428_v20 = vmul.f32 %v1426_v16, %v3277_v45  ;;  %s2552_s12 = sld [smem:[#allocation2 + $0x4a]] }
 0x2b8   : > { %v3994_v35 = vpop.permute.xlu1 %1707  ;;  %v3996_v36 = vpop.permute.xlu0 %1709 }
 0x2ba   : > { %1416 = vrot.lane.b32.xlu1 %v1409_v43, %s2862_s20  ;;  %1418 = vrot.lane.b32.xlu0 %v1410_v41, %s2862_s20  ;;  %v1429_v43 = vmul.f32 %v1426_v16, %v3282_v47  ;;  %v1446_v41 = vmul.f32 %v1445_v56, %v3100_v34 }
 0x2bc   : > { %v4002_v62 = vpop.permute.xlu1 %1711  ;;  %v4004_v21 = vpop.permute.xlu0 %1886 }
 0x2bd   : > { %5066 = vst [vmem:[#allocation153_spill] sm:$0xff] %v4004_v21 }
 0x2be   : > { %1433 = vrot.lane.b32.xlu1 %v1427_v10, %s2862_s20  ;;  %1435 = vrot.lane.b32.xlu0 %v1428_v20, %s2862_s20  ;;  %v1447_v10 = vmul.f32 %v1445_v56, %v3117_v40  ;;  %v1448_v20 = vmul.f32 %v1445_v56, %v3201_v11 }
 0x2c0   : > { %v4010_v22 = vpop.permute.xlu1 %1888  ;;  %v4012_v51 = vpop.permute.xlu0 %1890 }
 0x2c1   : > { %5067 = vst [vmem:[#allocation154_spill] sm:$0xff] %v4010_v22  ;;  %5068 = vst [vmem:[#allocation155_spill] sm:$0xff] %v4012_v51  ;;  %v1464_v22 = vstv %s2552_s12  ;;  %s4110_s12 = sld [smem:[#allocation2 + $0x36]] }
 0x2c2   : > { %1437 = vrot.lane.b32.xlu1 %v1429_v43, %s2862_s20  ;;  %1452 = vrot.lane.b32.xlu0 %v1446_v41, %s2863_s28  ;;  %v1465_v43 = vmul.f32 %v1464_v22, %v3113_v39  ;;  %v1466_v41 = vmul.f32 %v1464_v22, %v3277_v45  ;;  %s2559_s20 = sld [smem:[#allocation2 + $0x51]] }
 0x2c4   : > { %v4018_v21 = vpop.permute.xlu1 %1905  ;;  %v4020_v13 = vpop.permute.xlu0 %1907 }
 0x2c5   : > { %5069 = vst [vmem:[#allocation156_spill] sm:$0xff] %v4018_v21  ;;  %5070 = vst [vmem:[#allocation157_spill] sm:$0xff] %v4020_v13  ;;  %v1483_v21 = vstv %s2510_s13  ;;  %s4112_s13 = sld [smem:[#allocation2 + $0x37]] }
 0x2c6   : > { %1454 = vrot.lane.b32.xlu1 %v1447_v10, %s2863_s28  ;;  %1456 = vrot.lane.b32.xlu0 %v1448_v20, %s2863_s28  ;;  %v1467_v10 = vmul.f32 %v1464_v22, %v3282_v47  ;;  %v1484_v20 = vmul.f32 %v1483_v21, %v3100_v34 }
 0x2c7   : > { %v1602_v44 = vstv %s4110_s12  ;;  %s2527_s12 = sld [smem:[#allocation2 + $0x31]] }
 0x2c8   : > { %v4026_v16 = vpop.permute.xlu1 %1909  ;;  %v4028_v51 = vpop.permute.xlu0 %1726  ;;  %v1502_v29 = vstv %s2559_s20  ;;  %s2867_s20 = smov 5  }
 0x2c9   : > { %5071 = vst [vmem:[#allocation158_spill] sm:$0xff] %v4026_v16 }
 0x2ca   : > { %1471 = vrot.lane.b32.xlu1 %v1465_v43, %s2863_s28  ;;  %1473 = vrot.lane.b32.xlu0 %v1466_v41, %s2863_s28  ;;  %v1485_v43 = vmul.f32 %v1483_v21, %v3117_v40  ;;  %v1486_v41 = vmul.f32 %v1483_v21, %v3201_v11 }
 0x2cc   : > { %v4034_v56 = vpop.permute.xlu1 %1728  ;;  %v4036_v13 = vpop.permute.xlu0 %1730 }
 0x2ce   : > { %1475 = vrot.lane.b32.xlu1 %v1467_v10, %s2863_s28  ;;  %1490 = vrot.lane.b32.xlu0 %v1484_v20, %s2864_s8  ;;  %v1503_v10 = vmul.f32 %v1502_v29, %v3113_v39  ;;  %v1504_v20 = vmul.f32 %v1502_v29, %v3277_v45  ;;  %s2566_s28 = sld [smem:[#allocation2 + $0x58]] }
 0x2d0   : > { %v4042_v16 = vpop.permute.xlu1 %1745  ;;  %v4044_v27 = vpop.permute.xlu0 %1747 }
 0x2d2   : > { %1492 = vrot.lane.b32.xlu1 %v1485_v43, %s2864_s8  ;;  %1494 = vrot.lane.b32.xlu0 %v1486_v41, %s2864_s8  ;;  %v1505_v43 = vmul.f32 %v1502_v29, %v3282_v47  ;;  %v1522_v41 = vmul.f32 %v1521_v58, %v3100_v34 }
 0x2d4   : > { %v4050_v22 = vpop.permute.xlu1 %1749  ;;  %v4052_v31 = vpop.permute.xlu0 %1924 }
 0x2d5   : > { %5072 = vst [vmem:[#allocation159_spill] sm:$0xff] %v4052_v31 }
 0x2d6   : > { %1509 = vrot.lane.b32.xlu1 %v1503_v10, %s2864_s8  ;;  %1511 = vrot.lane.b32.xlu0 %v1504_v20, %s2864_s8  ;;  %v1523_v10 = vmul.f32 %v1521_v58, %v3117_v40  ;;  %v1524_v20 = vmul.f32 %v1521_v58, %v3201_v11 }
 0x2d8   : > { %v4058_v21 = vpop.permute.xlu1 %1926  ;;  %v4060_v19 = vpop.permute.xlu0 %1928 }
 0x2d9   : > { %5073 = vst [vmem:[#allocation160_spill] sm:$0xff] %v4058_v21  ;;  %5074 = vst [vmem:[#allocation161_spill] sm:$0xff] %v4060_v19  ;;  %v1540_v21 = vstv %s2566_s28  ;;  %s2869_s28 = smov 1  }
 0x2da   : > { %1513 = vrot.lane.b32.xlu1 %v1505_v43, %s2864_s8  ;;  %1528 = vrot.lane.b32.xlu0 %v1522_v41, %s2860_s21  ;;  %v1541_v43 = vmul.f32 %v1540_v21, %v3113_v39  ;;  %v1542_v41 = vmul.f32 %v1540_v21, %v3277_v45  ;;  %s2573_s8 = sld [smem:[#allocation2 + $0x5f]] }
 0x2dc   : > { %v4066_v31 = vpop.permute.xlu1 %1943  ;;  %v4068_v49 = vpop.permute.xlu0 %1945 }
 0x2dd   : > { %5075 = vst [vmem:[#allocation162_spill] sm:$0xff] %v4066_v31  ;;  %5076 = vst [vmem:[#allocation163_spill] sm:$0xff] %v4068_v49  ;;  %v1559_v31 = vstv %s2524_s25  ;;  %s2870_s25 = smov 2  }
 0x2de   : > { %1530 = vrot.lane.b32.xlu1 %v1523_v10, %s2860_s21  ;;  %1532 = vrot.lane.b32.xlu0 %v1524_v20, %s2860_s21  ;;  %v1543_v10 = vmul.f32 %v1540_v21, %v3282_v47  ;;  %v1560_v20 = vmul.f32 %v1559_v31, %v3100_v34  ;;  %v1562_v12 = vmul.f32 %v1559_v31, %v3201_v11 }
 0x2e0   : > { %v4074_v29 = vpop.permute.xlu1 %1947  ;;  %v4076_v19 = vpop.permute.xlu0 %1764  ;;  %v1578_v21 = vstv %s2573_s8  ;;  %s2481_s8 = sld [smem:[#allocation2 + $0x3]] }
 0x2e1   : > { %5077 = vst [vmem:[#allocation164_spill] sm:$0xff] %v4074_v29  ;;  %v1581_v59 = vmul.f32 %v1578_v21, %v3282_v47 }
 0x2e2   : > { %1547 = vrot.lane.b32.xlu1 %v1541_v43, %s2860_s21  ;;  %1549 = vrot.lane.b32.xlu0 %v1542_v41, %s2860_s21  ;;  %v1561_v41 = vmul.f32 %v1559_v31, %v3117_v40 }
 0x2e4   : > { %v4082_v58 = vpop.permute.xlu1 %1766  ;;  %v4084_v49 = vpop.permute.xlu0 %1768 }
 0x2e6   : > { %1551 = vrot.lane.b32.xlu1 %v1543_v10, %s2860_s21  ;;  %1566 = vrot.lane.b32.xlu0 %v1560_v20, %s2865_s11  ;;  %s4104_s21 = sld [smem:[#allocation2 + $0x5]]  ;;  %v1579_v10 = vmul.f32 %v1578_v21, %v3113_v39  ;;  %v1580_v20 = vmul.f32 %v1578_v21, %v3277_v45 }
 0x2e8   : > { %v4094_v29 = vpop.permute.xlu1 %1783  ;;  %v4096_v43 = vpop.permute.xlu0 %1785 }
 0x2ea   : > { %1568 = vrot.lane.b32.xlu1 %v1561_v41, %s2865_s11  ;;  %1570 = vrot.lane.b32.xlu0 %v1562_v12, %s2865_s11 }
 0x2ec   : > { %v4114_v11 = vpop.permute.xlu1 %1787  ;;  %v4116_v31 = vpop.permute.xlu0 %1962  ;;  %v1599_v42 = vstv %s4104_s21  ;;  %s2872_s21 = smov 127  }
 0x2ed   : > { %5078 = vst [vmem:[#allocation165_spill] sm:$0xff] %v4116_v31  ;;  %v894_v31 = vstv %s4102_s26  ;;  %v1601_v38 = vmul.f32 %v1599_v42, %v3117_v40  ;;  %s2871_s26 = smov 4  }
 0x2ee   : > { %1585 = vrot.lane.b32.xlu1 %v1579_v10, %s2865_s11  ;;  %1587 = vrot.lane.b32.xlu0 %v1580_v20, %s2865_s11  ;;  %v656_v20 = vmul.f32 %v655_v25, %v3100_v34  ;;  %v1618_v10 = vsel %vm433_vm2, %v3908_v17, %v3914_v3  ;;  %v4168_v17 = vmul.f32 %v894_v31, %v3113_v39 }
 0x2f0   : > { %v4122_v12 = vpop.permute.xlu1 %1964  ;;  %v4124_v41 = vpop.permute.xlu0 %1966  ;;  %5087 = vst [vmem:[#allocation174_spill] sm:$0xff] %v4168_v17  ;;  %v1619_v17 = vsel %vm433_vm2, %v3914_v3, %v3916_v7  ;;  %v1657_v7 = vsel %vm472_vm3, %v3938_v37, %v3940_v26  ;;  %v1751_v3 = vsel %vm550_vm5, %v4042_v16, %v4044_v27  ;;  %v1695_v26 = vsel %vm511_vm4, %v3986_v8, %v3988_v57 }
 0x2f1   : > { %5079 = vst [vmem:[#allocation166_spill] sm:$0xff] %v4122_v12  ;;  %5080 = vst [vmem:[#allocation167_spill] sm:$0xff] %v4124_v41  ;;  %v4138_v41 = vmul.f32 %v655_v25, %v3117_v40  ;;  %v4145_v12 = vmul.f32 %v658_v52, %v3113_v39  ;;  %v4157_v25 = vmul.f32 %v891_v1, %v3100_v34 }
 0x2f2   : > { %1589 = vrot.lane.b32.xlu1 %v1581_v59, %s2865_s11  ;;  %v4148_v59 = vmul.f32 %v658_v52, %v3277_v45  ;;  %v1603_v52 = vmul.f32 %v1602_v44, %v3113_v39  ;;  %v1623_v60 = vadd.f32 %v1619_v17, %v1601_v38  ;;  %v1789_v38 = vsel %vm395_vm1, %v4094_v29, %v4096_v43  ;;  %s2866_s11 = smov 3  }
 0x2f3   : > { %5083 = vst [vmem:[#allocation170_spill] sm:$0xff] %v4145_v12  ;;  %5085 = vst [vmem:[#allocation172_spill] sm:$0xff] %v4157_v25  ;;  %v712_v57 = vsel %vm472_vm3, %v3388_v28, %v3450_v15  ;;  %v675_v28 = vsel %vm433_vm2, %v3434_v61, %v3468_v33 }
 0x2f4   : > { %v4140_v47 = vpop.permute.xlu1 %1981  ;;  %v4142_v21 = vpop.permute.xlu0 %1983  ;;  %5084 = vst [vmem:[#allocation171_spill] sm:$0xff] %v4148_v59  ;;  %v674_v59 = vsel %vm433_vm2, %v3380_v23, %v3434_v61  ;;  %v1641_v55 = vadd.f32 %v1637_v54, %v1603_v52  ;;  %v1661_v37 = vadd.f32 %v1657_v7, %v1623_v60  ;;  %v5088_v61 = vstv %s4106_s10  ;;  %s252_s10 = sld [smem:[#allocation2]] }
 0x2f5   : > { %5081 = vst [vmem:[#allocation168_spill] sm:$0xff] %v4140_v47  ;;  %5082 = vst [vmem:[#allocation169_spill] sm:$0xff] %v4142_v21  ;;  %v4160_v47 = vmul.f32 %v891_v1, %v3117_v40  ;;  %v1600_v21 = vmul.f32 %v1599_v42, %v3100_v34  ;;  %v1675_v1 = vsel %vm472_vm3, %v3946_v6, %v3948_v53 }
 0x2f6   : > { %v1694_v6 = vsel %vm511_vm4, %v3980_v9, %v3986_v8  ;;  %v1713_v42 = vsel %vm511_vm4, %v3994_v35, %v3996_v36  ;;  %v678_v54 = vadd.f32 %v674_v59, %v656_v20  ;;  %v1732_v9 = vsel %vm550_vm5, %v4028_v51, %v4034_v56 }
 0x2f7   : > { %5086 = vst [vmem:[#allocation173_spill] sm:$0xff] %v4160_v47  ;;  %v4177_v47 = vmul.f32 %v894_v31, %v3277_v45  ;;  %v1622_v25 = vadd.f32 %v1618_v10, %v1600_v21  ;;  %v1604_v31 = vmul.f32 %v1602_v44, %v3277_v45  ;;  %v1679_v21 = vadd.f32 %v1675_v1, %v1641_v55 }
 0x2f8   : > { %v4180_v12 = vpop.permute.xlu1 %1985  ;;  %v1803_v23 = vpop.permute.xlu0 %1802  ;;  %v1714_v53 = vsel %vm511_vm4, %v3996_v36, %v4002_v62  ;;  %v1770_v51 = vsel %vm395_vm1, %v4076_v19, %v4082_v58  ;;  %v1733_v36 = vsel %vm550_vm5, %v4034_v56, %v4036_v13  ;;  %v1752_v19 = vsel %vm550_vm5, %v4044_v27, %v4050_v22 }
 0x2f9   : > { %v1660_v10 = vadd.f32 %v1656_v2, %v1622_v25  ;;  %v1642_v44 = vadd.f32 %v1638_v4, %v1604_v31  ;;  %v1717_v55 = vadd.f32 %v1713_v42, %v1679_v21  ;;  %v1699_v62 = vadd.f32 %v1695_v26, %v1661_v37 }
 0x2fa   : > { %v1771_v13 = vsel %vm395_vm1, %v4082_v58, %v4084_v49  ;;  %v1790_v27 = vsel %vm395_vm1, %v4096_v43, %v4114_v11  ;;  %v716_v42 = vadd.f32 %v712_v57, %v678_v54  ;;  %v750_v31 = vsel %vm511_vm4, %v3396_v32, %v3466_v30  ;;  %v4248_v58 = vld [vmem:[#allocation8] sm:$0x7f]  ;;  %v5096_v57 = vld [vmem:[#allocation46_spill] sm:$0xff] }
 0x2fb   : > { %v1698_v35 = vadd.f32 %v1694_v6, %v1660_v10  ;;  %v1680_v0 = vadd.f32 %v1676_v63, %v1642_v44  ;;  %v1755_v25 = vadd.f32 %v1751_v3, %v1717_v55  ;;  %v1737_v22 = vadd.f32 %v1733_v36, %v1699_v62 }
 0x2fc   : > { %v1805_v20 = vpop.permute.xlu1 %1804  ;;  %v1807_v59 = vpop.permute.xlu0 %1806  ;;  %v4245_v33 = vmul.f32 %v5088_v61, %v3100_v34  ;;  %v693_v43 = vsel %vm433_vm2, %v3442_v5, %v3556_v14  ;;  %v679_v32 = vadd.f32 %v675_v28, %v4138_v41  ;;  %v713_v63 = vsel %vm472_vm3, %v3450_v15, %v3476_v46  ;;  %v5089_v46 = vld [vmem:[#allocation170_spill] sm:$0xff] }
 0x2fd   : > { %v1736_v16 = vadd.f32 %v1732_v9, %v1698_v35  ;;  %v1808_v8 = vsel %vm627_vm6, %v1803_v23, %v1805_v20  ;;  %v1718_v29 = vadd.f32 %v1714_v53, %v1680_v0  ;;  %v1793_v17 = vadd.f32 %v1789_v38, %v1755_v25  ;;  %v5092_v53 = vld [vmem:[#allocation63_spill] sm:$0xff] }
 0x2fe   : > { %v1809_v49 = vsel %vm627_vm6, %v1805_v20, %v1807_v59  ;;  %v1775_v11 = vadd.f32 %v1771_v13, %v1737_v22  ;;  %v694_v9 = vsel %vm433_vm2, %v3556_v14, %v3562_v18  ;;  %v731_v5 = vsel %vm472_vm3, %v3458_v24, %v3564_v48  ;;  %v4275_v20 = vld [vmem:[#allocation8 + $0x8] sm:$0x7f]  ;;  %v5091_v59 = vld [vmem:[#allocation62_spill] sm:$0xff]  ;;  %v5101_v13 = vld [vmem:[#allocation47_spill] sm:$0xff] }
 0x2ff   : > { %v1774_v52 = vadd.f32 %v1770_v51, %v1736_v16  ;;  %v1756_v23 = vadd.f32 %v1752_v19, %v1718_v29  ;;  %v2176_v41 = vrot.slane %v4248_v58, 5  ;;  %v754_v35 = vadd.f32 %v750_v31, %v716_v42  ;;  %v5093_v51 = vld [vmem:[#allocation43_spill] sm:$0xff]  ;;  %v5095_v16 = vld [vmem:[#allocation32_spill] sm:$0xff] }
 0x300   : > { %v1822_v2 = vpop.permute.xlu1 %1821  ;;  %v1824_v1 = vpop.permute.xlu0 %1823  ;;  %v1813_v60 = vadd.f32 %v1809_v49, %v1775_v11  ;;  %v751_v15 = vsel %vm511_vm4, %v3466_v30, %v3484_v50  ;;  %v697_v14 = vadd.f32 %v693_v43, %v5089_v46  ;;  %v5090_v18 = vmov %v5088_v61  ;;  %v5094_v50 = vld [vmem:[#allocation44_spill] sm:$0xff]  ;;  %v5097_v19 = vld [vmem:[#allocation171_spill] sm:$0xff]  ;;  %v5104_v61 = vld [vmem:[#allocation66_spill] sm:$0xff] }
 0x301   : > { %v1827_v56 = vsel %vm627_vm6, %v1822_v2, %v1824_v1  ;;  %v1812_v4 = vadd.f32 %v1808_v8, %v1774_v52  ;;  %v1794_v10 = vadd.f32 %v1790_v27, %v1756_v23  ;;  %v1837_v55 = vmul.f32 %v5090_v18, %v3117_v40  ;;  %v5098_v29 = vld [vmem:[#allocation64_spill] sm:$0xff]  ;;  %v5100_v2 = vld [vmem:[#allocation45_spill] sm:$0xff]  ;;  %v5102_v27 = vld [vmem:[#allocation34_spill] sm:$0xff] }
 0x302   : > { %v1831_v6 = vadd.f32 %v1827_v56, %v1793_v17  ;;  %v717_v24 = vadd.f32 %v713_v63, %v679_v32  ;;  %v732_v26 = vsel %vm472_vm3, %v3564_v48, %v5091_v59  ;;  %v769_v38 = vsel %vm511_vm4, %v5093_v51, %v5092_v53  ;;  %v5099_v17 = vld [vmem:[#allocation65_spill] sm:$0xff]  ;;  %v5103_v22 = vld [vmem:[#allocation48_spill] sm:$0xff]  ;;  %v5105_v43 = vld [vmem:[#allocation67_spill] sm:$0xff] }
 0x303   : > { %v788_v25 = vsel %vm550_vm5, %v5095_v16, %v5094_v50  ;;  %v789_v36 = vsel %vm550_vm5, %v5094_v50, %v5096_v57  ;;  %v698_v8 = vadd.f32 %v694_v9, %v5097_v19  ;;  %v735_v48 = vadd.f32 %v731_v5, %v697_v14  ;;  %v5106_v11 = vld [vmem:[#allocation49_spill] sm:$0xff]  ;;  %v5107_v9 = vld [vmem:[#allocation148_spill] sm:$0xff] }
 0x304   : > { %v1833_v21 = vadd.f32 %v1831_v6, %v1812_v4  ;;  %v1826_v54 = vpop.permute.xlu1 %1825  ;;  %v4253_v7 = vpop.permute.xlu0 %2000  ;;  %v755_v62 = vadd.f32 %v751_v15, %v717_v24  ;;  %v770_v52 = vsel %vm511_vm4, %v5092_v53, %v5098_v29  ;;  %v2177_v28 = vrot.slane %v4275_v20, 5  ;;  %v5113_v53 = vld [vmem:[#allocation154_spill] sm:$0xff]  ;;  %v5114_v51 = vld [vmem:[#allocation153_spill] sm:$0xff]  ;;  %v5116_v50 = vld [vmem:[#allocation156_spill] sm:$0xff] }
 0x305   : > { %v1828_v3 = vsel %vm627_vm6, %v1824_v1, %v1826_v54  ;;  %v807_v1 = vsel %vm550_vm5, %v5100_v2, %v5099_v17  ;;  %v826_v56 = vsel %vm395_vm1, %v5102_v27, %v5101_v13  ;;  %v827_v23 = vsel %vm395_vm1, %v5101_v13, %v5103_v22  ;;  %v5119_v19 = vld [vmem:[#allocation69_spill] sm:$0xff]  ;;  %v5122_v13 = vld [vmem:[#allocation160_spill] sm:$0xff]  ;;  %v5123_v27 = vld [vmem:[#allocation159_spill] sm:$0xff] }
 0x306   : > { %v1832_v44 = vadd.f32 %v1828_v3, %v1794_v10  ;;  %2166 = vrot.lane.b32.xlu0 %v1833_v21, %s2866_s11  ;;  %v736_v4 = vadd.f32 %v732_v26, %v698_v8  ;;  %v773_v6 = vadd.f32 %v769_v38, %v735_v48  ;;  %v792_v42 = vadd.f32 %v788_v25, %v754_v35  ;;  %v5108_v3 = vld [vmem:[#allocation147_spill] sm:$0xff]  ;;  %v5117_v25 = vld [vmem:[#allocation68_spill] sm:$0xff] }
 0x307   : > { %v793_v31 = vadd.f32 %v789_v36, %v755_v62  ;;  %v808_v49 = vsel %vm550_vm5, %v5099_v17, %v5104_v61  ;;  %v845_v10 = vsel %vm395_vm1, %v5106_v11, %v5105_v43  ;;  %v1854_v5 = vsel %vm433_vm2, %v5108_v3, %v5107_v9  ;;  %v5118_v36 = vld [vmem:[#allocation70_spill] sm:$0xff]  ;;  %v5120_v17 = vld [vmem:[#allocation149_spill] sm:$0xff]  ;;  %v5124_v22 = vld [vmem:[#allocation163_spill] sm:$0xff] }
 0x308   : > { %v1834_v37 = vadd.f32 %v1832_v44, %v1813_v60  ;;  %v4283_v0 = vpop.permute.xlu1 %2002  ;;  %v4285_v30 = vpop.permute.xlu0 %2004  ;;  %v774_v32 = vadd.f32 %v770_v52, %v736_v4  ;;  %v811_v63 = vadd.f32 %v807_v1, %v773_v6  ;;  %v5109_v60 = vld [vmem:[#allocation151_spill] sm:$0xff]  ;;  %v5110_v44 = vld [vmem:[#allocation150_spill] sm:$0xff]  ;;  %v830_v35 = vadd.f32 %v826_v56, %v792_v42  ;;  %v5121_v1 = vld [vmem:[#allocation152_spill] sm:$0xff] }
 0x309   : > { %v831_v15 = vadd.f32 %v827_v23, %v793_v31  ;;  %v5111_v46 = vstv %s4112_s13  ;;  %v1892_v38 = vsel %vm472_vm3, %v5114_v51, %v5113_v53  ;;  %v846_v57 = vsel %vm395_vm1, %v5105_v43, %v5117_v25  ;;  %v5125_v23 = vld [vmem:[#allocation162_spill] sm:$0xff]  ;;  %v5127_v42 = vld [vmem:[#allocation73_spill] sm:$0xff]  ;;  %v5128_v31 = vld [vmem:[#allocation72_spill] sm:$0xff]  ;;  %s2873_s13 = smov 126  }
 0x30a   : > { %2168 = vrot.lane.b32.xlu1 %v1834_v37, %s2866_s11  ;;  %2178 = vrot.lane.b32.xlu0 %v2176_v41, %s2867_s20  ;;  %v1873_v41 = vsel %vm433_vm2, %v5110_v44, %v5109_v60  ;;  %v1839_v14 = vmul.f32 %v5111_v46, %v3113_v39  ;;  %v5112_v18 = vmov %v5111_v46  ;;  %v812_v59 = vadd.f32 %v808_v49, %v774_v32  ;;  %v5115_v37 = vld [vmem:[#allocation157_spill] sm:$0xff]  ;;  %v5129_v11 = vld [vmem:[#allocation155_spill] sm:$0xff]  ;;  %v5130_v32 = vld [vmem:[#allocation158_spill] sm:$0xff] }
 0x30b   : > { %v1840_v24 = vmul.f32 %v5112_v18, %v3277_v45  ;;  %v849_v26 = vadd.f32 %v845_v10, %v811_v63  ;;  %v1911_v16 = vsel %vm472_vm3, %v5116_v50, %v5115_v37  ;;  %v864_v8 = vsel %vm627_vm6, %v5119_v19, %v5118_v36  ;;  %v5132_v3 = vld [vmem:[#allocation165_spill] sm:$0xff]  ;;  %v5134_v44 = vld [vmem:[#allocation168_spill] sm:$0xff] }
 0x30c   : > { %v2020_v21 = vpop.permute.xlu1 %2019  ;;  %v2022_v54 = vpop.permute.xlu0 %2021  ;;  %v1858_v48 = vadd.f32 %v1854_v5, %v4245_v33  ;;  %v1877_v62 = vadd.f32 %v1873_v41, %v1839_v14  ;;  %v1855_v2 = vsel %vm433_vm2, %v5107_v9, %v5120_v17  ;;  %v1930_v56 = vsel %vm511_vm4, %v5123_v27, %v5122_v13  ;;  %v5126_v33 = vld [vmem:[#allocation71_spill] sm:$0xff]  ;;  %v5131_v9 = vld [vmem:[#allocation166_spill] sm:$0xff]  ;;  %v5136_v25 = vld [vmem:[#allocation164_spill] sm:$0xff] }
 0x30d   : > { %v1949_v4 = vsel %vm511_vm4, %v5125_v23, %v5124_v22  ;;  %v865_v6 = vsel %vm627_vm6, %v5118_v36, %v5126_v33  ;;  %v883_v61 = vsel %vm627_vm6, %v5128_v31, %v5127_v42  ;;  %v1893_v10 = vsel %vm472_vm3, %v5113_v53, %v5129_v11 }
 0x30e   : > { %2180 = vrot.lane.b32.xlu1 %v2177_v28, %s2867_s20  ;;  %v1874_v28 = vsel %vm433_vm2, %v5109_v60, %v5121_v1  ;;  %v1896_v49 = vadd.f32 %v1892_v38, %v1858_v48  ;;  %v1915_v43 = vadd.f32 %v1911_v16, %v1877_v62  ;;  %v1912_v63 = vsel %vm472_vm3, %v5115_v37, %v5130_v32  ;;  %v5133_v60 = vld [vmem:[#allocation169_spill] sm:$0xff]  ;;  %v5139_v32 = vld [vmem:[#allocation78_spill] sm:$0xff]  ;;  %s350_s20 = sld [smem:[#allocation7]] }
 0x30f   : > { %v1968_v5 = vsel %vm550_vm5, %v5132_v3, %v5131_v9  ;;  %v1987_v41 = vsel %vm550_vm5, %v5134_v44, %v5133_v60  ;;  %v1859_v46 = vadd.f32 %v1855_v2, %v1837_v55  ;;  %v1878_v14 = vadd.f32 %v1874_v28, %v1840_v24  ;;  %v5135_v16 = vld [vmem:[#allocation161_spill] sm:$0xff]  ;;  %v5137_v2 = vld [vmem:[#allocation167_spill] sm:$0xff] }
 0x310   : > { %v2024_v29 = vpop.permute.xlu1 %2023  ;;  %v2039_v52 = vpop.permute.xlu0 %2038  ;;  %v1934_v18 = vadd.f32 %v1930_v56, %v1896_v49  ;;  %v1953_v51 = vadd.f32 %v1949_v4, %v1915_v43  ;;  %v1931_v53 = vsel %vm511_vm4, %v5122_v13, %v5135_v16  ;;  %v1950_v37 = vsel %vm511_vm4, %v5124_v22, %v5136_v25  ;;  %v5142_v44 = vld [vmem:[#allocation77_spill] sm:$0xff] }
 0x311   : > { %v2006_v36 = vsel %vm395_vm1, %v4253_v7, %v4283_v0  ;;  %v2025_v19 = vsel %vm395_vm1, %v2020_v21, %v2022_v54  ;;  %v1897_v55 = vadd.f32 %v1893_v10, %v1859_v46  ;;  %v1916_v24 = vadd.f32 %v1912_v63, %v1878_v14  ;;  %v5138_v10 = vld [vmem:[#allocation79_spill] sm:$0xff]  ;;  %v5145_v46 = vld [vmem:[#allocation174_spill] sm:$0xff] }
 0x312   : > { %v1972_v48 = vadd.f32 %v1968_v5, %v1934_v18  ;;  %v1991_v62 = vadd.f32 %v1987_v41, %v1953_v51  ;;  %v887_v17 = vadd.f32 %v883_v61, %v849_v26  ;;  %v1969_v1 = vsel %vm550_vm5, %v5131_v9, %v5137_v2  ;;  %v5141_v5 = vld [vmem:[#allocation75_spill] sm:$0xff]  ;;  %v5153_v2 = vld [vmem:[#allocation173_spill] sm:$0xff] }
 0x313   : > { %v1988_v28 = vsel %vm550_vm5, %v5133_v60, %v4180_v12  ;;  %v1935_v27 = vadd.f32 %v1931_v53, %v1897_v55  ;;  %v1954_v56 = vadd.f32 %v1950_v37, %v1916_v24  ;;  %v868_v4 = vadd.f32 %v864_v8, %v830_v35  ;;  %v5147_v53 = vld [vmem:[#allocation80_spill] sm:$0xff]  ;;  %v5148_v37 = vld [vmem:[#allocation82_spill] sm:$0xff]  ;;  %v5150_v55 = vld [vmem:[#allocation91_spill] sm:$0xff] }
 0x314   : > { %v2041_v38 = vpop.permute.xlu1 %2040  ;;  %v2043_v50 = vpop.permute.xlu0 %2042  ;;  %v2010_v7 = vadd.f32 %v2006_v36, %v1972_v48  ;;  %v2029_v22 = vadd.f32 %v2025_v19, %v1991_v62  ;;  %v2007_v26 = vsel %vm395_vm1, %v4283_v0, %v4285_v30  ;;  %v2026_v33 = vsel %vm395_vm1, %v2022_v54, %v2024_v29  ;;  %v5140_v29 = vld [vmem:[#allocation76_spill] sm:$0xff]  ;;  %v5149_v36 = vld [vmem:[#allocation81_spill] sm:$0xff]  ;;  %v5151_v24 = vld [vmem:[#allocation90_spill] sm:$0xff] }
 0x315   : > { %v2044_v13 = vsel %vm627_vm6, %v2039_v52, %v2041_v38  ;;  %v1973_v61 = vadd.f32 %v1969_v1, %v1935_v27  ;;  %v1992_v49 = vadd.f32 %v1988_v28, %v1954_v56  ;;  %v850_v52 = vadd.f32 %v846_v57, %v812_v59  ;;  %v5143_v59 = vld [vmem:[#allocation85_spill] sm:$0xff]  ;;  %v5144_v57 = vld [vmem:[#allocation84_spill] sm:$0xff]  ;;  %v5154_v56 = vld [vmem:[#allocation83_spill] sm:$0xff] }
 0x316   : > { %v2048_v12 = vadd.f32 %v2044_v13, %v2010_v7  ;;  %v869_v11 = vadd.f32 %v865_v6, %v831_v15  ;;  %v929_v63 = vsel %vm433_vm2, %v5139_v32, %v5138_v10  ;;  %v2045_v35 = vsel %vm627_vm6, %v2041_v38, %v2043_v50  ;;  %v5146_v50 = vld [vmem:[#allocation74_spill] sm:$0xff]  ;;  %v5152_v62 = vld [vmem:[#allocation172_spill] sm:$0xff] }
 0x317   : > { %v889_v8 = vadd.f32 %v887_v17, %v868_v4  ;;  %v2011_v9 = vadd.f32 %v2007_v26, %v1973_v61  ;;  %v2030_v3 = vadd.f32 %v2026_v33, %v1992_v49  ;;  %v910_v60 = vsel %vm433_vm2, %v5141_v5, %v5140_v29  ;;  %v5157_v4 = vld [vmem:[#allocation87_spill] sm:$0xff]  ;;  %v5158_v33 = vld [vmem:[#allocation97_spill] sm:$0xff] }
 0x318   : > { %v2058_v21 = vpop.permute.xlu1 %2057  ;;  %v2060_v23 = vpop.permute.xlu0 %2059  ;;  %v911_v15 = vsel %vm433_vm2, %v5140_v29, %v5142_v44  ;;  %v967_v6 = vsel %vm472_vm3, %v5144_v57, %v5143_v59  ;;  %v933_v14 = vadd.f32 %v929_v63, %v5145_v46  ;;  %v2202_v38 = vrot.slane %v4248_v58, 6  ;;  %v5160_v63 = vld [vmem:[#allocation92_spill] sm:$0xff]  ;;  %v5164_v29 = vld [vmem:[#allocation102_spill] sm:$0xff] }
 0x319   : > { %v2063_v31 = vsel %vm627_vm6, %v2058_v21, %v2060_v23  ;;  %v2049_v18 = vadd.f32 %v2045_v35, %v2011_v9  ;;  %v884_v16 = vsel %vm627_vm6, %v5127_v42, %v5146_v50  ;;  %v930_v25 = vsel %vm433_vm2, %v5138_v10, %v5147_v53  ;;  %v5161_v9 = vld [vmem:[#allocation94_spill] sm:$0xff]  ;;  %v5170_v50 = vld [vmem:[#allocation108_spill] sm:$0xff] }
 0x31a   : > { %v2067_v43 = vadd.f32 %v2063_v31, %v2029_v22  ;;  %v948_v19 = vsel %vm472_vm3, %v5149_v36, %v5148_v37  ;;  %v1005_v48 = vsel %vm511_vm4, %v5151_v24, %v5150_v55  ;;  %v914_v17 = vadd.f32 %v910_v60, %v5152_v62  ;;  %v5155_v22 = vld [vmem:[#allocation86_spill] sm:$0xff]  ;;  %v5159_v31 = vld [vmem:[#allocation96_spill] sm:$0xff] }
 0x31b   : > { %v915_v1 = vadd.f32 %v911_v15, %v5153_v2  ;;  %v971_v28 = vadd.f32 %v967_v6, %v933_v14  ;;  %v949_v7 = vsel %vm472_vm3, %v5148_v37, %v5154_v56  ;;  %v968_v21 = vsel %vm472_vm3, %v5143_v59, %v5155_v22  ;;  %v5167_v14 = vld [vmem:[#allocation100_spill] sm:$0xff]  ;;  %v5174_v2 = vld [vmem:[#allocation105_spill] sm:$0xff] }
 0x31c   : > { %v2069_v0 = vadd.f32 %v2067_v43, %v2048_v12  ;;  %v2062_v30 = vpop.permute.xlu1 %2061  ;;  %v4395_v54 = vpop.permute.xlu0 %1376  ;;  %v1043_v61 = vsel %vm550_vm5, %v5159_v31, %v5158_v33  ;;  %v934_v49 = vadd.f32 %v930_v25, %v4177_v47  ;;  %v952_v12 = vadd.f32 %v948_v19, %v914_v17  ;;  %v5173_v17 = vld [vmem:[#allocation106_spill] sm:$0xff] }
 0x31d   : > { %v2064_v41 = vsel %vm627_vm6, %v2060_v23, %v2062_v30  ;;  %v5156_v23 = vld [vmem:[#allocation88_spill] sm:$0xff]  ;;  %v1009_v43 = vadd.f32 %v1005_v48, %v971_v28  ;;  %v2203_v10 = vrot.slane %v4275_v20, 6  ;;  %v888_v32 = vadd.f32 %v884_v16, %v850_v52  ;;  %v5163_v30 = vld [vmem:[#allocation103_spill] sm:$0xff]  ;;  %v5165_v52 = vld [vmem:[#allocation89_spill] sm:$0xff] }
 0x31e   : > { %v2068_v51 = vadd.f32 %v2064_v41, %v2030_v3  ;;  %2192 = vrot.lane.b32.xlu0 %v2069_v0, %s2866_s11  ;;  %v986_v26 = vsel %vm511_vm4, %v5157_v4, %v5156_v23  ;;  %v1006_v35 = vsel %vm511_vm4, %v5150_v55, %v5160_v63  ;;  %v5162_v3 = vld [vmem:[#allocation93_spill] sm:$0xff]  ;;  %v1081_v47 = vsel %vm395_vm1, %v5164_v29, %v5163_v30  ;;  %v5166_v41 = vld [vmem:[#allocation98_spill] sm:$0xff]  ;;  %v5171_v55 = vld [vmem:[#allocation95_spill] sm:$0xff] }
 0x31f   : > { %v1024_v0 = vsel %vm550_vm5, %v5162_v3, %v5161_v9  ;;  %v953_v5 = vadd.f32 %v949_v7, %v915_v1  ;;  %v972_v60 = vadd.f32 %v968_v21, %v934_v49  ;;  %v990_v44 = vadd.f32 %v986_v26, %v952_v12  ;;  %v5172_v48 = vld [vmem:[#allocation104_spill] sm:$0xff]  ;;  %v5177_v49 = vld [vmem:[#allocation107_spill] sm:$0xff] }
 0x320   : > { %v2070_v13 = vadd.f32 %v2068_v51, %v2049_v18  ;;  %v4424_v27 = vpop.permute.xlu1 %1378  ;;  %v4426_v42 = vpop.permute.xlu0 %1380  ;;  %v1047_v15 = vadd.f32 %v1043_v61, %v1009_v43  ;;  %v987_v6 = vsel %vm511_vm4, %v5156_v23, %v5165_v52  ;;  %v1044_v46 = vsel %vm550_vm5, %v5158_v33, %v5166_v41  ;;  %v5168_v18 = vld [vmem:[#allocation99_spill] sm:$0xff]  ;;  %v5176_v23 = vld [vmem:[#allocation110_spill] sm:$0xff] }
 0x321   : > { %v1062_v51 = vsel %vm395_vm1, %v5168_v18, %v5167_v14  ;;  %v1010_v53 = vadd.f32 %v1006_v35, %v972_v60  ;;  %v1028_v25 = vadd.f32 %v1024_v0, %v990_v44  ;;  %v2098_v36 = vrot.slane %v4248_v58, 1 }
 0x322   : > { %2194 = vrot.lane.b32.xlu1 %v2070_v13, %s2866_s11  ;;  %2204 = vrot.lane.b32.xlu0 %v2202_v38, %s2868_s24  ;;  %v5169_v38 = vld [vmem:[#allocation109_spill] sm:$0xff]  ;;  %v1085_v37 = vadd.f32 %v1081_v47, %v1047_v15  ;;  %v890_v19 = vadd.f32 %v888_v32, %v869_v11  ;;  %v1025_v24 = vsel %vm550_vm5, %v5161_v9, %v5171_v55  ;;  %v2099_v61 = vrot.slane %v4275_v20, 1 }
 0x323   : > { %v1119_v16 = vsel %vm627_vm6, %v5170_v50, %v5169_v38  ;;  %v1082_v62 = vsel %vm395_vm1, %v5163_v30, %v5172_v48  ;;  %v1100_v1 = vsel %vm627_vm6, %v5174_v2, %v5173_v17  ;;  %v991_v28 = vadd.f32 %v987_v6, %v953_v5  ;;  %v5175_v11 = vld [vmem:[#allocation101_spill] sm:$0xff] }
 0x324   : > { %v4452_v59 = vpop.permute.xlu1 %1395  ;;  %v4454_v57 = vpop.permute.xlu0 %1397  ;;  %v1048_v13 = vadd.f32 %v1044_v46, %v1010_v53  ;;  %v1066_v56 = vadd.f32 %v1062_v51, %v1028_v25  ;;  %v1123_v7 = vadd.f32 %v1119_v16, %v1085_v37  ;;  %v1063_v21 = vsel %vm395_vm1, %v5167_v14, %v5175_v11 }
 0x325   : > { %v1120_v4 = vsel %vm627_vm6, %v5169_v38, %v5176_v23  ;;  %v1029_v26 = vadd.f32 %v1025_v24, %v991_v28  ;;  %v1101_v12 = vsel %vm627_vm6, %v5173_v17, %v5177_v49  ;;  %v2124_v3 = vrot.slane %v4248_v58, 2  ;;  %v5179_v17 = vld [vmem:[#allocation111_spill] sm:$0xff]  ;;  %v5183_v23 = vld [vmem:[#allocation116_spill] sm:$0xff] }
 0x326   : > { %2206 = vrot.lane.b32.xlu1 %v2203_v10, %s2868_s24  ;;  %2086 = vrot.lane.b32.xlu0 %v889_v8, %s2866_s11  ;;  %v1086_v33 = vadd.f32 %v1082_v62, %v1048_v13  ;;  %v1104_v31 = vadd.f32 %v1100_v1, %v1066_v56  ;;  %v2125_v47 = vrot.slane %v4275_v20, 2  ;;  %v1127_v53 = vstv %s2481_s8  ;;  %v5178_v62 = vld [vmem:[#allocation112_spill] sm:$0xff]  ;;  %v5180_v1 = vld [vmem:[#allocation113_spill] sm:$0xff]  ;;  %v5181_v56 = vld [vmem:[#allocation115_spill] sm:$0xff]  ;;  %s2576_s24 = sld [smem:[#allocation7 + $0x1]] }
 0x327   : > { %v1067_v43 = vadd.f32 %v1063_v21, %v1029_v26  ;;  %v1130_v25 = vstv %s2530_s5  ;;  %v1363_v37 = vstv %s2482_s6  ;;  %v1366_v55 = vstv %s4526_s9 }
 0x328   : > { %v4479_v8 = vpop.permute.xlu1 %1399  ;;  %v4481_v22 = vpop.permute.xlu0 %1414  ;;  %v1125_v10 = vadd.f32 %v1123_v7, %v1104_v31  ;;  %v1124_v32 = vadd.f32 %v1120_v4, %v1086_v33  ;;  %v1146_v2 = vsel %vm433_vm2, %v5179_v17, %v5178_v62  ;;  %v1147_v28 = vsel %vm433_vm2, %v5178_v62, %v5180_v1  ;;  %v5182_v7 = vld [vmem:[#allocation114_spill] sm:$0xff] }
 0x329   : > { %v1105_v9 = vadd.f32 %v1101_v12, %v1067_v43  ;;  %v1131_v13 = vmul.f32 %v1130_v25, %v3113_v39  ;;  %v1165_v11 = vsel %vm433_vm2, %v5182_v7, %v5181_v56  ;;  %v1132_v21 = vmul.f32 %v1130_v25, %v3277_v45  ;;  %v5184_v31 = vld [vmem:[#allocation118_spill] sm:$0xff]  ;;  %v5186_v12 = vld [vmem:[#allocation119_spill] sm:$0xff] }
 0x32a   : > { %2088 = vrot.lane.b32.xlu1 %v890_v19, %s2866_s11  ;;  %2100 = vrot.lane.b32.xlu0 %v2098_v36, %s2869_s28  ;;  %v1128_v36 = vmul.f32 %v1127_v53, %v3100_v34  ;;  %v1129_v19 = vmul.f32 %v1127_v53, %v3117_v40  ;;  %v1166_v4 = vsel %vm433_vm2, %v5181_v56, %v5183_v23  ;;  %v5189_v25 = vld [vmem:[#allocation122_spill] sm:$0xff]  ;;  %v5190_v56 = vld [vmem:[#allocation124_spill] sm:$0xff]  ;;  %v5191_v7 = vld [vmem:[#allocation123_spill] sm:$0xff] }
 0x32b   : > { %v1126_v0 = vadd.f32 %v1124_v32, %v1105_v9  ;;  %v1364_v26 = vmul.f32 %v1363_v37, %v3100_v34  ;;  %v1365_v33 = vmul.f32 %v1363_v37, %v3117_v40  ;;  %v1185_v43 = vsel %vm472_vm3, %v5184_v31, %v5186_v12  ;;  %v5188_v32 = vld [vmem:[#allocation120_spill] sm:$0xff] }
 0x32c   : > { %v4494_v63 = vpop.permute.xlu1 %1416  ;;  %v4496_v35 = vpop.permute.xlu0 %1418  ;;  %v1169_v53 = vadd.f32 %v1165_v11, %v1131_v13  ;;  %v1170_v1 = vadd.f32 %v1166_v4, %v1132_v21  ;;  %v1222_v23 = vsel %vm511_vm4, %v5191_v7, %v5190_v56  ;;  %v1368_v13 = vmul.f32 %v1366_v55, %v3277_v45  ;;  %v5192_v21 = vld [vmem:[#allocation127_spill] sm:$0xff]  ;;  %v5193_v4 = vld [vmem:[#allocation126_spill] sm:$0xff] }
 0x32d   : > { %v1420_v12 = vsel %vm472_vm3, %v4481_v22, %v4494_v63  ;;  %v1402_v22 = vsel %vm433_vm2, %v4454_v57, %v4479_v8 }
 0x32e   : > { %2102 = vrot.lane.b32.xlu1 %v2099_v61, %s2869_s28  ;;  %2114 = vrot.lane.b32.xlu0 %v1125_v10, %s2866_s11  ;;  %v5185_v61 = vld [vmem:[#allocation117_spill] sm:$0xff]  ;;  %s2585_s28 = sshll.u32 %s2922_s19, 7  ;;  %s2875_s19 = smov [#allocation11]  }
 0x32f   : > { %v1184_v49 = vsel %vm472_vm3, %v5185_v61, %v5184_v31  ;;  %v5187_v10 = vld [vmem:[#allocation121_spill] sm:$0xff]  ;;  %v1382_v31 = vsel %vm433_vm2, %v4395_v54, %v4424_v27  ;;  %v1241_v61 = vsel %vm511_vm4, %v5193_v4, %v5192_v21  ;;  %s4813_s9 = scalar_lea.hbm %s4861_s4, %s2585_s28 }
 0x330   : > { %v4500_v30 = vpop.permute.xlu1 %1433  ;;  %v4502_v29 = vpop.permute.xlu0 %1435  ;;  %v1203_v9 = vsel %vm472_vm3, %v5188_v32, %v5187_v10  ;;  %v1204_v37 = vsel %vm472_vm3, %v5187_v10, %v5189_v25 }
 0x331   : > { %v1208_v11 = vadd.f32 %v1204_v37, %v1170_v1  ;;  %v1439_v54 = vsel %vm472_vm3, %v4500_v30, %v4502_v29 }
 0x332   : > { %2116 = vrot.lane.b32.xlu1 %v1126_v0, %s2866_s11  ;;  %2126 = vrot.lane.b32.xlu0 %v2124_v3, %s2870_s25  ;;  %v1367_v3 = vmul.f32 %v1366_v55, %v3113_v39  ;;  %v1150_v0 = vadd.f32 %v1146_v2, %v1128_v36  ;;  %v1401_v36 = vsel %vm433_vm2, %v4452_v59, %v4454_v57 }
 0x333   : > { %v1386_v55 = vadd.f32 %v1382_v31, %v1364_v26  ;;  %v5195_v26 = vld [vmem:[#allocation128_spill] sm:$0xff] }
 0x334   : > { %v4507_v5 = vpop.permute.xlu1 %1437  ;;  %v4509_v60 = vpop.permute.xlu0 %1452  ;;  %v1405_v10 = vadd.f32 %v1401_v36, %v1367_v3  ;;  %v1242_v3 = vsel %vm511_vm4, %v5192_v21, %v5195_v26  ;;  %v5196_v36 = vld [vmem:[#allocation130_spill] sm:$0xff] }
 0x335   : > { %v1424_v25 = vadd.f32 %v1420_v12, %v1386_v55  ;;  %v5199_v12 = vld [vmem:[#allocation132_spill] sm:$0xff] }
 0x336   : > { %2128 = vrot.lane.b32.xlu1 %v2125_v47, %s2870_s25  ;;  %v1151_v47 = vadd.f32 %v1147_v28, %v1129_v19  ;;  %v1188_v19 = vadd.f32 %v1184_v49, %v1150_v0  ;;  %v1207_v28 = vadd.f32 %v1203_v9, %v1169_v53  ;;  %v5194_v49 = vld [vmem:[#allocation125_spill] sm:$0xff]  ;;  %v1383_v0 = vsel %vm433_vm2, %v4424_v27, %v4426_v42 }
 0x337   : > { %v1443_v37 = vadd.f32 %v1439_v54, %v1405_v10  ;;  %v1421_v27 = vsel %vm472_vm3, %v4494_v63, %v4496_v35  ;;  %v1440_v42 = vsel %vm472_vm3, %v4502_v29, %v4507_v5 }
 0x338   : > { %v4512_v44 = vpop.permute.xlu1 %1454  ;;  %v4514_v15 = vpop.permute.xlu0 %1456  ;;  %v4579_v2 = vadd.f32 %v1185_v43, %v1151_v47  ;;  %v1226_v59 = vadd.f32 %v1222_v23, %v1188_v19  ;;  %v4594_v43 = vsel %vm511_vm4, %v5190_v56, %v5194_v49  ;;  %v1245_v53 = vadd.f32 %v1241_v61, %v1207_v28  ;;  %v5197_v19 = vld [vmem:[#allocation129_spill] sm:$0xff] }
 0x339   : > { %v1458_v30 = vsel %vm511_vm4, %v4509_v60, %v4512_v44  ;;  %v1387_v60 = vadd.f32 %v1383_v0, %v1365_v33  ;;  %v1459_v63 = vsel %vm511_vm4, %v4512_v44, %v4514_v15  ;;  %v1260_v28 = vsel %vm550_vm5, %v5197_v19, %v5196_v36  ;;  %v5198_v61 = vld [vmem:[#allocation133_spill] sm:$0xff] }
 0x33a   : > { %v1462_v1 = vadd.f32 %v1458_v30, %v1424_v25  ;;  %v1279_v54 = vsel %vm550_vm5, %v5199_v12, %v5198_v61  ;;  %v1264_v0 = vadd.f32 %v1260_v28, %v1226_v59  ;;  %v5201_v30 = vld [vmem:[#allocation138_spill] sm:$0xff]  ;;  %v5205_v59 = vld [vmem:[#allocation145_spill] sm:$0xff] }
 0x33b   : > { %v1283_v25 = vadd.f32 %v1279_v54, %v1245_v53 }
 0x33c   : > { %v1472_v52 = vpop.permute.xlu1 %1471  ;;  %v4516_v6 = vpop.permute.xlu0 %1473 }
 0x33d   : > { %v1477_v47 = vsel %vm511_vm4, %v1472_v52, %v4516_v6  ;;  %v1406_v52 = vadd.f32 %v1402_v22, %v1368_v13  ;;  %v5200_v22 = vld [vmem:[#allocation139_spill] sm:$0xff] }
 0x33e   : > { %v1481_v56 = vadd.f32 %v1477_v47, %v1443_v37  ;;  %v1317_v47 = vsel %vm395_vm1, %v5201_v30, %v5200_v22  ;;  %v5214_v30 = vld [vmem:[#allocation18_spill] sm:$0xff] }
 0x340   : > { %v4518_v41 = vpop.permute.xlu1 %1475  ;;  %v4520_v46 = vpop.permute.xlu0 %1490 }
 0x341   : > { %v1478_v35 = vsel %vm511_vm4, %v4516_v6, %v4518_v41 }
 0x344   : > { %v4522_v14 = vpop.permute.xlu1 %1492  ;;  %v4524_v18 = vpop.permute.xlu0 %1494 }
 0x345   : > { %v1496_v57 = vsel %vm550_vm5, %v4520_v46, %v4522_v14  ;;  %v1425_v46 = vadd.f32 %v1421_v27, %v1387_v60  ;;  %v1497_v44 = vsel %vm550_vm5, %v4522_v14, %v4524_v18 }
 0x346   : > { %v1500_v33 = vadd.f32 %v1496_v57, %v1462_v1  ;;  %v5204_v57 = vld [vmem:[#allocation135_spill] sm:$0xff] }
 0x347   : > { %v1463_v41 = vadd.f32 %v1459_v63, %v1425_v46  ;;  %v5210_v46 = vld [vmem:[#allocation141_spill] sm:$0xff] }
 0x348   : > { %v1510_v51 = vpop.permute.xlu1 %1509  ;;  %v4528_v38 = vpop.permute.xlu0 %1511 }
 0x349   : > { %v1515_v8 = vsel %vm550_vm5, %v1510_v51, %v4528_v38  ;;  %v1444_v51 = vadd.f32 %v1440_v42, %v1406_v52  ;;  %v5203_v42 = vld [vmem:[#allocation136_spill] sm:$0xff]  ;;  %v1321_v52 = vadd.f32 %v1317_v47, %v1283_v25  ;;  %v5215_v47 = vld [vmem:[#allocation17_spill] sm:$0xff]  ;;  %v417_v25 = vstv %s2527_s12 }
 0x34a   : > { %v1519_v31 = vadd.f32 %v1515_v8, %v1481_v56  ;;  %v2150_v56 = vrot.slane %v4248_v58, 4  ;;  %v5211_v58 = vld [vmem:[#allocation137_spill] sm:$0xff] }
 0x34c   : > { %v4530_v50 = vpop.permute.xlu1 %1513  ;;  %v4532_v16 = vpop.permute.xlu0 %1528 }
 0x34d   : > { %v1516_v15 = vsel %vm550_vm5, %v4528_v38, %v4530_v50  ;;  %v1501_v50 = vadd.f32 %v1497_v44, %v1463_v41  ;;  %v2151_v41 = vrot.slane %v4275_v20, 4 }
 0x350   : > { %v4537_v24 = vpop.permute.xlu1 %1530  ;;  %v4539_v48 = vpop.permute.xlu0 %1532 }
 0x351   : > { %v1534_v29 = vsel %vm395_vm1, %v4532_v16, %v4537_v24  ;;  %v1482_v16 = vadd.f32 %v1478_v35, %v1444_v51  ;;  %v1535_v14 = vsel %vm395_vm1, %v4537_v24, %v4539_v48  ;;  %v5208_v35 = vld [vmem:[#allocation140_spill] sm:$0xff] }
 0x352   : > { %v1539_v37 = vadd.f32 %v1535_v14, %v1501_v50 }
 0x353   : > { %v1520_v49 = vadd.f32 %v1516_v15, %v1482_v16  ;;  %v5213_v16 = vld [vmem:[#allocation143_spill] sm:$0xff] }
 0x354   : > { %v1548_v62 = vpop.permute.xlu1 %1547  ;;  %v1550_v17 = vpop.permute.xlu0 %1549 }
 0x355   : > { %v1553_v5 = vsel %vm395_vm1, %v1548_v62, %v1550_v17  ;;  %v1538_v62 = vadd.f32 %v1534_v29, %v1500_v33  ;;  %v1318_v29 = vsel %vm395_vm1, %v5200_v22, %v5208_v35  ;;  %v414_v22 = vstv %s252_s10 }
 0x356   : > { %v1557_v13 = vadd.f32 %v1553_v5, %v1519_v31  ;;  %v5209_v5 = vld [vmem:[#allocation142_spill] sm:$0xff] }
 0x357   : > { %v1336_v51 = vsel %vm627_vm6, %v5210_v46, %v5209_v5 }
 0x358   : > { %v1552_v32 = vpop.permute.xlu1 %1551  ;;  %v1567_v9 = vpop.permute.xlu0 %1566 }
 0x359   : > { %v1554_v18 = vsel %vm395_vm1, %v1550_v17, %v1552_v32  ;;  %v5202_v17 = vld [vmem:[#allocation134_spill] sm:$0xff] }
 0x35a   : > { %v1558_v27 = vadd.f32 %v1554_v18, %v1520_v49  ;;  %v1280_v32 = vsel %vm550_vm5, %v5198_v61, %v5202_v17  ;;  %v5218_v17 = vld [vmem:[#allocation51_spill] sm:$0xff] }
 0x35c   : > { %v1569_v7 = vpop.permute.xlu1 %1568  ;;  %v1571_v23 = vpop.permute.xlu0 %1570 }
 0x35d   : > { %v1572_v6 = vsel %vm627_vm6, %v1567_v9, %v1569_v7  ;;  %v1246_v9 = vadd.f32 %v1242_v3, %v1208_v11  ;;  %v1573_v26 = vsel %vm627_vm6, %v1569_v7, %v1571_v23  ;;  %v1298_v11 = vsel %vm395_vm1, %v5204_v57, %v5203_v42  ;;  %v5206_v3 = vld [vmem:[#allocation144_spill] sm:$0xff]  ;;  %v5207_v23 = vld [vmem:[#allocation131_spill] sm:$0xff] }
 0x35e   : > { %v1576_v55 = vadd.f32 %v1572_v6, %v1538_v62  ;;  %v1355_v8 = vsel %vm627_vm6, %v5206_v3, %v5205_v59  ;;  %v1577_v53 = vadd.f32 %v1573_v26, %v1539_v37  ;;  %v1227_v7 = vadd.f32 %v4594_v43, %v4579_v2  ;;  %v5212_v43 = vld [vmem:[#allocation146_spill] sm:$0xff]  ;;  %v5221_v3 = vld [vmem:[#allocation20_spill] sm:$0xff] }
 0x35f   : > { %v1261_v63 = vsel %vm550_vm5, %v5196_v36, %v5207_v23  ;;  %v1284_v33 = vadd.f32 %v1280_v32, %v1246_v9  ;;  %v1302_v31 = vadd.f32 %v1298_v11, %v1264_v0  ;;  %v1359_v19 = vadd.f32 %v1355_v8, %v1321_v52  ;;  %v5219_v32 = vld [vmem:[#allocation50_spill] sm:$0xff]  ;;  %v5220_v11 = vld [vmem:[#allocation36_spill] sm:$0xff]  ;;  %v5223_v52 = vld [vmem:[#allocation21_spill] sm:$0xff] }
 0x360   : > { %v1586_v21 = vpop.permute.xlu1 %1585  ;;  %v1588_v4 = vpop.permute.xlu0 %1587  ;;  %v1299_v2 = vsel %vm395_vm1, %v5203_v42, %v5211_v58  ;;  %v1356_v36 = vsel %vm627_vm6, %v5205_v59, %v5212_v43  ;;  %v1265_v44 = vadd.f32 %v1261_v63, %v1227_v7  ;;  %v1337_v62 = vsel %vm627_vm6, %v5209_v5, %v5213_v16  ;;  %v5224_v7 = vld [vmem:[#allocation53_spill] sm:$0xff]  ;;  %v5225_v23 = vld [vmem:[#allocation52_spill] sm:$0xff]  ;;  %v5231_v58 = vld [vmem:[#allocation54_spill] sm:$0xff] }
 0x361   : > { %v1591_v38 = vsel %vm627_vm6, %v1586_v21, %v1588_v4  ;;  %v1322_v15 = vadd.f32 %v1318_v29, %v1284_v33  ;;  %v1340_v6 = vadd.f32 %v1336_v51, %v1302_v31  ;;  %v434_v26 = vsel %vm433_vm2, %v5215_v47, %v5214_v30  ;;  %v5226_v29 = vld [vmem:[#allocation38_spill] sm:$0xff]  ;;  %v5228_v33 = vld [vmem:[#allocation29_spill] sm:$0xff]  ;;  %v5229_v31 = vld [vmem:[#allocation23_spill] sm:$0xff] }
 0x362   : > { %v1595_v10 = vadd.f32 %v1591_v38, %v1557_v13  ;;  %v1303_v13 = vadd.f32 %v1299_v2, %v1265_v44  ;;  %v415_v37 = vmul.f32 %v414_v22, %v3100_v34  ;;  %v454_v42 = vsel %vm433_vm2, %v5219_v32, %v5218_v17  ;;  %v5222_v34 = vld [vmem:[#allocation26_spill] sm:$0xff]  ;;  %v5232_v44 = vld [vmem:[#allocation39_spill] sm:$0xff]  ;;  %v5240_v47 = vld [vmem:[#allocation41_spill] sm:$0xff] }
 0x363   : > { %v1361_v21 = vadd.f32 %v1359_v19, %v1340_v6  ;;  %v435_v59 = vsel %vm433_vm2, %v5214_v30, %v5220_v11  ;;  %v453_v8 = vsel %vm433_vm2, %v5221_v3, %v5219_v32  ;;  %v493_v63 = vsel %vm472_vm3, %v5225_v23, %v5224_v7  ;;  %v5249_v7 = vld [vmem:[#allocation42_spill] sm:$0xff] }
 0x364   : > { %v1597_v24 = vadd.f32 %v1595_v10, %v1576_v55  ;;  %v1590_v48 = vpop.permute.xlu1 %1589  ;;  %v1341_v61 = vadd.f32 %v1337_v62, %v1303_v13  ;;  %v438_v57 = vadd.f32 %v434_v26, %v415_v37  ;;  %v5241_v26 = vld [vmem:[#allocation31_spill] sm:$0xff] }
 0x365   : > { %v1592_v60 = vsel %vm627_vm6, %v1588_v4, %v1590_v48  ;;  %v1360_v4 = vadd.f32 %v1356_v36, %v1322_v15  ;;  %v513_v15 = vsel %vm511_vm4, %v5222_v34, %v5232_v44 }
 0x366   : > { %v1596_v1 = vadd.f32 %v1592_v60, %v1558_v27  ;;  %2140 = vrot.lane.b32.xlu0 %v1597_v24, %s2866_s11  ;;  %v5216_v27 = vld [vmem:[#allocation22_spill] sm:$0xff]  ;;  %v5217_v24 = vld [vmem:[#allocation19_spill] sm:$0xff]  ;;  %v419_v60 = vmul.f32 %v417_v25, %v3277_v45  ;;  %v5227_v45 = vld [vmem:[#allocation24_spill] sm:$0xff] }
 0x367   : > { %v1362_v12 = vadd.f32 %v1360_v4, %v1341_v61  ;;  %v473_v48 = vsel %vm472_vm3, %v5217_v24, %v5216_v27  ;;  %v474_v5 = vsel %vm472_vm3, %v5216_v27, %v5226_v29  ;;  %v492_v51 = vsel %vm472_vm3, %v5227_v45, %v5225_v23  ;;  %v5235_v4 = vld [vmem:[#allocation56_spill] sm:$0xff]  ;;  %v5242_v27 = vld [vmem:[#allocation33_spill] sm:$0xff] }
 0x368   : > { %v1598_v28 = vadd.f32 %v1596_v1, %v1577_v53  ;;  %v512_v53 = vsel %vm511_vm4, %v5223_v52, %v5222_v34  ;;  %v416_v1 = vmul.f32 %v414_v22, %v3117_v40  ;;  %v477_v35 = vadd.f32 %v473_v48, %v438_v57  ;;  %v5244_v57 = vld [vmem:[#allocation60_spill] sm:$0xff] }
 0x369   : > { %v458_v46 = vadd.f32 %v454_v42, %v419_v60  ;;  %v551_v40 = vsel %vm550_vm5, %v5229_v31, %v5228_v33  ;;  %v5243_v42 = vld [vmem:[#allocation61_spill] sm:$0xff]  ;;  %v5247_v60 = vld [vmem:[#allocation27_spill] sm:$0xff] }
 0x36a   : > { %2142 = vrot.lane.b32.xlu1 %v1598_v28, %s2866_s11  ;;  %2152 = vrot.lane.b32.xlu0 %v2150_v56, %s2871_s26  ;;  %v418_v56 = vmul.f32 %v417_v25, %v3113_v39  ;;  %v439_v19 = vadd.f32 %v435_v59, %v416_v1  ;;  %v5230_v28 = vld [vmem:[#allocation55_spill] sm:$0xff]  ;;  %v516_v36 = vadd.f32 %v512_v53, %v477_v35  ;;  %v5245_v59 = vld [vmem:[#allocation25_spill] sm:$0xff] }
 0x36b   : > { %v532_v2 = vsel %vm511_vm4, %v5231_v58, %v5230_v28  ;;  %v497_v6 = vadd.f32 %v493_v63, %v458_v46  ;;  %v590_v25 = vsel %vm395_vm1, %v5241_v26, %v5240_v47  ;;  %v648_v11 = vsel %vm627_vm6, %v5244_v57, %v5243_v42  ;;  %v5248_v53 = vld [vmem:[#allocation37_spill] sm:$0xff] }
 0x36c   : > { %v457_v39 = vadd.f32 %v453_v8, %v418_v56  ;;  %v478_v62 = vadd.f32 %v474_v5, %v439_v19  ;;  %v589_v3 = vsel %vm395_vm1, %v5245_v59, %v5241_v26  ;;  %v5246_v8 = vld [vmem:[#allocation35_spill] sm:$0xff]  ;;  %v647_v1 = vsel %vm627_vm6, %v5248_v53, %v5244_v57 }
 0x36d   : > { %v628_v34 = vsel %vm627_vm6, %v5247_v60, %v5246_v8  ;;  %v629_v23 = vsel %vm627_vm6, %v5246_v8, %v5249_v7 }
 0x36e   : > { %2154 = vrot.lane.b32.xlu1 %v2151_v41, %s2871_s26  ;;  %2234 = vrot.lane.b32.xlu0 %v1361_v21, %s2870_s25  ;;  %v5233_v41 = vld [vmem:[#allocation28_spill] sm:$0xff]  ;;  %v496_v13 = vadd.f32 %v492_v51, %v457_v39  ;;  %v5234_v21 = vld [vmem:[#allocation57_spill] sm:$0xff]  ;;  %s2344_s26 = scalar_lea.sflag [#allocation4], %s3080_s23 }
 0x36f   : > { %v531_v16 = vsel %vm511_vm4, %v5233_v41, %v5231_v58  ;;  %v571_v61 = vsel %vm550_vm5, %v5235_v4, %v5234_v21 }
 0x372   : > { %2236 = vrot.lane.b32.xlu1 %v1362_v12, %s2870_s25  ;;  %v555_v12 = vadd.f32 %v551_v40, %v516_v36  ;;  %s251_s25 = scalar_lea.vmem [#allocation11], %s2477_s29  ;;  %s2780_s29 = sshll.u32 %s2875_s19, 4  ;;  %s2781_s29 = int_to_ptr.vmem [resolvable:$false] %s2780_s29 }
 0x373   : > { %s2358_s8 = sshll.u32 %s251_s25, 4  ;;  %s4815_s8 = int_to_ptr.vmem [resolvable:$true] %s2358_s8 }
 0x374   : > { %v593_v31 = vadd.f32 %v589_v3, %v555_v12  ;;  %p2783_p13 = scmp.lt.s32.totalorder %s4815_s8, %s2781_s29 }
 0x376   : > { %v632_v28 = vadd.f32 %v628_v34, %v593_v31 }
 0x378   : > { %v2167_v54 = vpop.permute.xlu0 %2166 }
 0x379   : > { %v2174_v14 = vsel %vm2077_vm7, 0.0, %v2167_v54 }
 0x37c   : > { %v2169_v18 = vpop.permute.xlu1 %2168  ;;  %v2179_v20 = vpop.permute.xlu0 %2178 }
 0x37d   : > { %v2187_v38 = vmul.f32 %v2179_v20, %v2174_v14  ;;  %v2175_v50 = vsel %vm2077_vm7, %v2169_v18, 0.0  ;;  %v2170_v55 = vsel %vm2077_vm7, %v2167_v54, %v2169_v18  ;;  %v5236_v54 = vld [vmem:[#allocation40_spill] sm:$0xff]  ;;  %v536_v18 = vadd.f32 %v532_v2, %v497_v6 }
 0x37e   : > { %v552_v14 = vsel %vm550_vm5, %v5228_v33, %v5236_v54 }
 0x37f   : > { %2248 = vrot.lane.b32.xlu0 %v2187_v38, %s2872_s21  ;;  %v575_v37 = vadd.f32 %v571_v61, %v536_v18 }
 0x380   : > { %v2181_v49 = vpop.permute.xlu1 %2180 }
 0x381   : > { %v2183_v10 = vsel %vm2182_vm8, %v2179_v20, %v2181_v49  ;;  %v2189_v9 = vmul.f32 %v2181_v49, %v2175_v50  ;;  %v5237_v20 = vld [vmem:[#allocation30_spill] sm:$0xff]  ;;  %v517_v50 = vadd.f32 %v513_v15, %v478_v62  ;;  %v535_v49 = vadd.f32 %v531_v16, %v496_v13 }
 0x382   : > { %v2188_v0 = vmul.f32 %v2183_v10, %v2170_v55  ;;  %v570_v38 = vsel %vm550_vm5, %v5237_v20, %v5235_v4  ;;  %v5238_v55 = vld [vmem:[#allocation59_spill] sm:$0xff]  ;;  %v5239_v10 = vld [vmem:[#allocation58_spill] sm:$0xff] }
 0x383   : > { %2252 = vrot.lane.b32.xlu0 %v2189_v9, %s2872_s21  ;;  %v609_v9 = vsel %vm395_vm1, %v5239_v10, %v5238_v55  ;;  %v608_v24 = vsel %vm395_vm1, %v5242_v27, %v5239_v10  ;;  %v556_v17 = vadd.f32 %v552_v14, %v517_v50  ;;  %v574_v32 = vadd.f32 %v570_v38, %v535_v49 }
 0x384   : > { %2250 = vrot.lane.b32.xlu1 %v2188_v0, %s2872_s21  ;;  %v613_v52 = vadd.f32 %v609_v9, %v575_v37 }
 0x385   : > { %v594_v56 = vadd.f32 %v590_v25, %v556_v17  ;;  %v612_v63 = vadd.f32 %v608_v24, %v574_v32 }
 0x386   : > { %v652_v5 = vadd.f32 %v648_v11, %v613_v52 }
 0x387   : > { %v651_v40 = vadd.f32 %v647_v1, %v612_v63  ;;  %v633_v39 = vadd.f32 %v629_v23, %v594_v56 }
 0x389   : > { %v654_v2 = vadd.f32 %v652_v5, %v633_v39  ;;  %v653_v36 = vadd.f32 %v651_v40, %v632_v28 }
 0x390   : > { %v2193_v43 = vpop.permute.xlu0 %2192 }
 0x391   : > { %v2200_v0 = vsel %vm2077_vm7, 0.0, %v2193_v43 }
 0x394   : > { %v2195_v22 = vpop.permute.xlu1 %2194  ;;  %v2205_v30 = vpop.permute.xlu0 %2204 }
 0x395   : > { %v2213_v48 = vmul.f32 %v2205_v30, %v2200_v0  ;;  %v2201_v35 = vsel %vm2077_vm7, %v2195_v22, 0.0  ;;  %v2196_v46 = vsel %vm2077_vm7, %v2193_v43, %v2195_v22 }
 0x397   : > { %2281 = vrot.lane.b32.xlu1 %v2213_v48, %s2873_s13 }
 0x398   : > { %v2207_v29 = vpop.permute.xlu1 %2206  ;;  %v2087_v33 = vpop.permute.xlu0 %2086 }
 0x399   : > { %v2209_v45 = vsel %vm2208_vm9, %v2205_v30, %v2207_v29  ;;  %v2215_v51 = vmul.f32 %v2207_v29, %v2201_v35  ;;  %v2094_v15 = vsel %vm2077_vm7, 0.0, %v2087_v33 }
 0x39a   : > { %v2214_v19 = vmul.f32 %v2209_v45, %v2196_v46 }
 0x39b   : > { %2285 = vrot.lane.b32.xlu1 %v2215_v51, %s2873_s13 }
 0x39c   : > { %v2089_v58 = vpop.permute.xlu1 %2088  ;;  %2283 = vrot.lane.b32.xlu0 %v2214_v19, %s2873_s13  ;;  %v2101_v44 = vpop.permute.xlu0 %2100 }
 0x39d   : > { %v2090_v6 = vsel %vm2077_vm7, %v2087_v33, %v2089_v58  ;;  %v2109_v16 = vmul.f32 %v2101_v44, %v2094_v15  ;;  %v2095_v13 = vsel %vm2077_vm7, %v2089_v58, 0.0 }
 0x39f   : > { %2075 = vrot.lane.b32.xlu1 %v654_v2, %s2866_s11  ;;  %v2687_v2 = vld [vmem:[#allocation8] sm:$0x7f] }
 0x3a0   : > { %v2103_v43 = vpop.permute.xlu1 %2102  ;;  %2073 = vrot.lane.b32.xlu0 %v653_v36, %s2866_s11  ;;  %v2115_v4 = vpop.permute.xlu0 %2114  ;;  %s2874_s11 = smov 124  }
 0x3a1   : > { %v2105_v41 = vsel %vm2104_vm10, %v2101_v44, %v2103_v43  ;;  %v2111_v21 = vmul.f32 %v2103_v43, %v2095_v13  ;;  %v2122_v38 = vsel %vm2077_vm7, 0.0, %v2115_v4 }
 0x3a2   : > { %v2110_v62 = vmul.f32 %v2105_v41, %v2090_v6 }
 0x3a4   : > { %2221 = vrot.lane.b32.xlu1 %v2110_v62, %s2872_s21  ;;  %2219 = vrot.lane.b32.xlu0 %v2109_v16, %s2872_s21  ;;  %v2117_v61 = vpop.permute.xlu1 %2116  ;;  %v2127_v12 = vpop.permute.xlu0 %2126  ;;  %v2688_v16 = vld [vmem:[#allocation8 + $0x8] sm:$0x7f] }
 0x3a5   : > { %v2135_v50 = vmul.f32 %v2127_v12, %v2122_v38  ;;  %v2123_v0 = vsel %vm2077_vm7, %v2117_v61, 0.0  ;;  %v2118_v22 = vsel %vm2077_vm7, %v2115_v4, %v2117_v61 }
 0x3a8   : > { %2223 = vrot.lane.b32.xlu0 %v2111_v21, %s2872_s21  ;;  %v2129_v54 = vpop.permute.xlu1 %2128  ;;  %s2776_s21 = scalar_lea.vmem %s4815_s8, 128 }
 0x3a9   : > { %v2131_v10 = vsel %vm2130_vm11, %v2127_v12, %v2129_v54  ;;  %v2137_v30 = vmul.f32 %v2129_v54, %v2123_v0  ;;  %v2311_v12 = vstv %s350_s20  ;;  %p2777_p6 = scmp.ne.s32.totalorder %s4815_s8, %s2776_s21 }
 0x3aa   : > { %v2136_v47 = vmul.f32 %v2131_v10, %v2118_v22 }
 0x3ab   : > { %p2778_p12 = pnand %p2777_p6, %p5250_p9 }
 0x3ad   : > { %p2779_p3 = pneg %p2778_p12 }
 0x3d8   : > { %v2141_v14 = vpop.permute.xlu0 %2140 }
 0x3d9   : > { %v2148_v57 = vsel %vm2077_vm7, 0.0, %v2141_v14 }
 0x3dc   : > { %v2143_v18 = vpop.permute.xlu1 %2142  ;;  %v2153_v20 = vpop.permute.xlu0 %2152 }
 0x3dd   : > { %v2144_v11 = vsel %vm2077_vm7, %v2141_v14, %v2143_v18  ;;  %v2161_v8 = vmul.f32 %v2153_v20, %v2148_v57  ;;  %v2149_v56 = vsel %vm2077_vm7, %v2143_v18, 0.0 }
 0x3e0   : > { %v2155_v49 = vpop.permute.xlu1 %2154  ;;  %v2235_v55 = vpop.permute.xlu0 %2234 }
 0x3e1   : > { %v2242_v9 = vadd.f32 %v2235_v55, %v2135_v50  ;;  %v2157_v32 = vsel %vm2156_vm12, %v2153_v20, %v2155_v49  ;;  %v2163_v63 = vmul.f32 %v2155_v49, %v2149_v56  ;;  %v2314_v20 = vstv %s2576_s24 }
 0x3e2   : > { %v2162_v60 = vmul.f32 %v2157_v32, %v2144_v11 }
 0x3e3   : > { %2265 = vrot.lane.b32.xlu1 %v2242_v9, %s2873_s13 }
 0x3e4   : > { %v2237_v26 = vpop.permute.xlu1 %2236 }
 0x3e5   : > { %v2238_v25 = vsel %vm2130_vm11, %v2235_v55, %v2237_v26  ;;  %v2244_v37 = vadd.f32 %v2237_v26, %v2137_v30 }
 0x3e6   : > { %v2243_v27 = vadd.f32 %v2238_v25, %v2136_v47 }
 0x3e7   : > { %2269 = vrot.lane.b32.xlu1 %v2244_v37, %s2873_s13 }
 0x3e8   : > { %2267 = vrot.lane.b32.xlu0 %v2243_v27, %s2873_s13 }
 0x3f1   : > { %v2249_v24 = vpop.permute.xlu0 %2248 }
 0x3f5   : > { %v2253_v17 = vpop.permute.xlu0 %2252 }
 0x3f6   : > { %v2251_v48 = vpop.permute.xlu1 %2250  ;;  %v2261_v5 = vadd.f32 %v2253_v17, %v2163_v63 }
 0x3f7   : > { %v2254_v59 = vsel %vm2225_vm13, %v2249_v24, %v2251_v48  ;;  %v2255_v3 = vsel %vm2225_vm13, %v2251_v48, %v2253_v17  ;;  %v2329_v24 = vlaneseq }
 0x3f8   : > { %v2259_v52 = vadd.f32 %v2254_v59, %v2161_v8  ;;  %v2260_v53 = vadd.f32 %v2255_v3, %v2162_v60  ;;  %v2689_v3 = vld [vmem:[%s3086_s7] sm:$0xff]  ;;  %s2782_s7 = scalar_lea.vmem %s2781_s29, 256 }
 0x3f9   : > { %v2330_v48 = vshrl.u32 %v2329_v24, 7  ;;  %p2784_p7 = scmp.lt.s32.totalorder %s2782_s7, %s2776_s21 }
 0x3fb   : > { %v2331_v17 = vsub.s32 0, %v2330_v48  ;;  %p2785_p1 = por %p2784_p7, %p2783_p13 }
 0x3fd   : > { %p2786_p0 = pnand %p2785_p1, %p2779_p3 }
 0x409   : > { %v2282_v42 = vpop.permute.xlu1 %2281 }
 0x40d   : > { %v2286_v34 = vpop.permute.xlu1 %2285 }
 0x40e   : > { %v2284_v1 = vpop.permute.xlu0 %2283  ;;  %v2294_v46 = vadd.f32 %v2286_v34, %v2261_v5 }
 0x40f   : > { %v2287_v7 = vsel %vm2271_vm14, %v2282_v42, %v2284_v1  ;;  %v2288_v23 = vsel %vm2271_vm14, %v2284_v1, %v2286_v34 }
 0x410   : > { %v2292_v35 = vadd.f32 %v2287_v7, %v2259_v52  ;;  %v2293_v29 = vadd.f32 %v2288_v23, %v2260_v53 }
 0x411   : > { %v2076_v51 = vpop.permute.xlu1 %2075 }
 0x412   : > { %2300 = vrot.lane.b32.xlu1 %v2293_v29, %s2874_s11  ;;  %2298 = vrot.lane.b32.xlu0 %v2292_v35, %s2874_s11  ;;  %v2074_v45 = vpop.permute.xlu0 %2073 }
 0x413   : > { %v2081_v39 = vsel %vm2077_vm7, 0.0, %v2074_v45  ;;  %v2078_v43 = vsel %vm2077_vm7, %v2074_v45, %v2076_v51 }
 0x414   : > { %v2082_v36 = vmul.f32 %v2687_v2, %v2081_v39  ;;  %v2083_v62 = vmul.f32 %v2688_v16, %v2078_v43 }
 0x416   : > { %2302 = vrot.lane.b32.xlu0 %v2294_v46, %s2874_s11  ;;  %v2220_v33 = vpop.permute.xlu0 %2219  ;;  %v2222_v31 = vpop.permute.xlu1 %2221 }
 0x417   : > { %v2226_v58 = vsel %vm2225_vm13, %v2220_v33, %v2222_v31 }
 0x418   : > { %v2230_v6 = vadd.f32 %v2226_v58, %v2082_v36 }
 0x41a   : > { %v2224_v40 = vpop.permute.xlu0 %2223 }
 0x41b   : > { %v2227_v41 = vsel %vm2225_vm13, %v2222_v31, %v2224_v40 }
 0x41c   : > { %v2231_v14 = vadd.f32 %v2227_v41, %v2083_v62 }
 0x455   : > { %v2266_v19 = vpop.permute.xlu1 %2265 }
 0x459   : > { %v2270_v44 = vpop.permute.xlu1 %2269 }
 0x45a   : > { %v2268_v28 = vpop.permute.xlu0 %2267 }
 0x45b   : > { %v2272_v15 = vsel %vm2271_vm14, %v2266_v19, %v2268_v28  ;;  %v2273_v61 = vsel %vm2271_vm14, %v2268_v28, %v2270_v44 }
 0x45c   : > { %v2276_v13 = vadd.f32 %v2272_v15, %v2230_v6  ;;  %v2277_v38 = vadd.f32 %v2273_v61, %v2231_v14 }
 0x484   : > { %v2301_v21 = vpop.permute.xlu1 %2300  ;;  %v2299_v4 = vpop.permute.xlu0 %2298 }
 0x485   : > { %v2305_v54 = vsel %vm2304_vm15, %v2299_v4, %v2301_v21 }
 0x486   : > { %v2309_v18 = vadd.f32 %v2305_v54, %v2276_v13 }
 0x488   : > { %v2312_v50 = vmul.f32 %v2311_v12, %v2309_v18  ;;  %v2303_v49 = vpop.permute.xlu0 %2302 }
 0x489   : > { %v2306_v55 = vsel %vm2304_vm15, %v2301_v21, %v2303_v49 }
 0x48a   : > { %v2315_v10 = vadd.f32 %v2314_v20, %v2312_v50  ;;  %v2310_v9 = vadd.f32 %v2306_v55, %v2277_v38 }
 0x48c   : > { %v2577_v0 = vmul.f32 -1.442695, %v2315_v10  ;;  %v2313_v22 = vmul.f32 %v2311_v12, %v2310_v9 }
 0x48e   : > { %2679 = vpow2.f32 %v2577_v0  ;;  %v2316_v30 = vadd.f32 %v2314_v20, %v2313_v22 }
 0x490   : > { %v2578_v47 = vmul.f32 -1.442695, %v2316_v30 }
 0x492   : > { %2681 = vpow2.f32 %v2578_v47 }
 0x498   : > { %v2680_v26 = vpop.eup %2679 }
 0x499   : > { %v2323_v25 = vadd.f32 1.0, %v2680_v26 }
 0x49b   : > { %2683 = vrcp.f32 %v2323_v25 }
 0x49c   : > { %v2682_v37 = vpop.eup %2681 }
 0x49d   : > { %v2324_v27 = vadd.f32 1.0, %v2682_v37 }
 0x49f   : > { %2685 = vrcp.f32 %v2324_v27 }
 0x4a5   : > { %v2684_v32 = vpop.eup %2683 }
 0x4a6   : > { %v2332_v57 = vrot.slane %v2684_v32, %v2331_v17 }
 0x4a9   : > { %v2686_v42 = vpop.eup %2685 }
 0x4aa   : > { %v2336_v11 = vrot.slane %v2686_v42, %v2331_v17 }
 0x4ac   : > { %v2339_v59 = vcombine.low %v2332_v57, %v2336_v11 }
 0x4ae   : > { %v2341_v8 = vmul.f32 %v2689_v3, %v2339_v59 }
 0x4b0   : > { %2342 = vst [vmem:[%s251_s25] sm:$0xff] %v2341_v8 }
 0x4b1   : > { %2789 = shalt.err (!%p2786_p0)
}
 0x4b2   : > { %s2790_s23 = scalar_lea.hbm %s4813_s9, 128  ;;  %s2794_s13 = scalar_lea.hbm %s4861_s4, 256 }
 0x4b3   : > { %p2791_p5 = scmp.ne.s32.totalorder %s4813_s9, %s2790_s23  ;;  %p2795_p10 = scmp.lt.u32.totalorder %s4813_s9, %s4861_s4 }
 0x4b4   : > { %p2796_p11 = scmp.lt.u32.totalorder %s2794_s13, %s2790_s23  ;;  %p2798_p6 = scmp.lt.u32.totalorder %s2790_s23, %s4813_s9 }
 0x4b5   : > { %p2792_p2 = pnand %p2791_p5, %p5250_p9 }
 0x4b6   : > { %p2797_p8 = por %p2796_p11, %p2795_p10 }
 0x4b7   : > { %p2793_p4 = pneg %p2792_p2 }
 0x4b8   : > { %p2799_p12 = por %p2798_p6, %p2797_p8 }
 0x4ba   : > { %p2800_p3 = pnand %p2799_p12, %p2793_p4 }
 0x4bc   : > { %2803 = shalt.err (!%p2800_p3)
}
 0x4bd   : > { %2600 = dma.vmem_to_hbm [thread:$0]  (%p5250_p9), %s4815_s8, 128, %s4813_s9, %s2344_s26  }
 0x4be PF: > { %s2370_s24 = sand.u32 1, %s2842_s15   ;;  %p5251_p13 = scmp.ne.s32.totalorder %s4917_s22, 0 }
 0x4bf   : > { %p5252_p7 = scmp.ge.s32.totalorder %s2854_s18, 2  ;;  %s2371_s28 = scalar_lea.sflag [#allocation4], %s2370_s24 }
 0x4c1   : > { %p2617_p1 = pnand %p5252_p7, %p5251_p13 }
 0x4c3   : > { %2837 = dma.done.wait (!%p2617_p1), %s2371_s28, 128  }
 0x4c4   : > { %2839 = vsyncadd (!%p2617_p1), %s2371_s28, 4294967168  ;;  %p20_p0 = scmp.ge.s32.totalorder %s2960_s30, 4   ;;  %s5253_s15 = smov %s2846_s16 }
 0x4c5   : > { %s5254_s16 = smov %s2850_s17  ;;  %s5255_s17 = smov %s3019_s27 }
 0x4c6   : > { %s5256_s18 = smov %s2960_s30  ;;  %22 = sbr.rel (!%p20_p0) target bundleno = 8 (0x8), region = 96 }
 0x4cd   :  { %2376 = vsyncpa [#allocation3], 1 }
 0x4ce   :  { %2378 = vsyncpa [#allocation3 + $0x1], 1 }
 0x4cf   :  { %2379 = vsyncpa [#allocation10], 1 }
 0x4d0   :  { %2381 = vsyncpa [#allocation10 + $0x1], 1 }
 0x4d1   :  { %2382 = vsyncpa [#allocation4], 1 }
 0x4d2   :  { %2384 = vsyncpa [#allocation4 + $0x1], 1 }
 0x4d3   :  { %2385 = vsyncpa [#allocation5], 1 }
 0x4d4   :  { %2387 = vsyncpa [#allocation5 + $0x1], 1 }
 0x4d5   :  { %2388 = vsyncpa [#allocation6], 1 }
 0x4d6   :  { %2390 = vsyncpa [#allocation6 + $0x1], 1 }

</bundles_post_ra>
